<compile_context>
chip_gen: v6e
topology: v6e:2x2x1
jax: 0.10.0
libtpu: 0.0.40
codegen_flags: <defaults>
</compile_context>

<pallas_src>
import functools

import jax
import jax.numpy as jnp
from jax import lax
from jax.experimental import pallas as pl
from jax.experimental.pallas import tpu as pltpu


def _round_up(x, m):
    return ((x + m - 1) // m) * m


def _gru_chunk_kernel(gi_ref,     # (TQ, 3H) f32  precomputed x_t @ W_ih^T + b_ih
                      h0_ref,     # (1, H)   f32  initial hidden
                      whh_ref,    # (H, 3H)  param_dtype  W_hh^T (VMEM-resident)
                      bhh_ref,    # (1, 3H)  f32  b_hh
                      out_ref,    # (TQ, H)  f32  per-step hidden for this chunk
                      h_scratch): # (1, H)   f32  hidden carried across chunks
    c = pl.program_id(0)
    H = h0_ref.shape[-1]
    TQ = gi_ref.shape[0]

    @pl.when(c == 0)
    def _():
        h_scratch[...] = h0_ref[...]

    # Hoisted: load the (small) recurrent weight/bias once per chunk.
    w = whh_ref[...]
    b = bhh_ref[...]

    def step(t, h):
        gi = gi_ref[pl.ds(t, 1), :]                                  # (1, 3H) f32
        # Serial critical path per step: one (1,H) x (H,3H) MXU matmul.
        gh = jnp.dot(h.astype(w.dtype), w,
                     preferred_element_type=jnp.float32) + b         # (1, 3H) f32
        # PyTorch GRU cell (gate order r, z, n):
        r = jax.nn.sigmoid(gi[:, 0:H] + gh[:, 0:H])
        z = jax.nn.sigmoid(gi[:, H:2 * H] + gh[:, H:2 * H])
        n = jnp.tanh(gi[:, 2 * H:3 * H] + r * gh[:, 2 * H:3 * H])
        h_new = (1.0 - z) * n + z * h
        out_ref[pl.ds(t, 1), :] = h_new.astype(out_ref.dtype)
        return h_new

    # In-kernel time loop (unrolled when short) -- no per-step grid overhead.
    h_final = lax.fori_loop(0, TQ, step, h_scratch[...], unroll=(TQ <= 16))
    h_scratch[...] = h_final


@functools.partial(jax.jit, static_argnames=("param_dtype", "chunk"))
def encoder_rnn_sequence(tokens, hidden0, emb_table, w_ih, w_hh, b_ih, b_hh,
                         *, param_dtype=jnp.bfloat16, chunk=128):
    """Run the EncoderRNN over a whole token sequence.

    tokens: int array with T elements.  hidden0: (1, 1, H) initial hidden.
    Returns (outputs, hidden): outputs (T, 1, H) per-step GRU outputs, hidden
    (1, 1, H) final hidden -- same semantics as calling EncoderRNN.forward
    once per token.
    """
    V, H = emb_table.shape
    # OOB token ids are clipped (PyTorch embedding would error).
    toks = jnp.clip(tokens.reshape(-1).astype(jnp.int32), 0, V - 1)
    T = int(toks.shape[0])

    TQ = min(_round_up(chunk, 8), _round_up(T, 8))   # chunk of time steps
    T_pad = _round_up(T, TQ)

    # Hoist the input projection off the serial chain: one batched MXU matmul
    # over all T tokens (gather + gemm handled by XLA in the wrapper).
    x = jnp.take(emb_table, toks, axis=0).astype(param_dtype)          # (T, H)
    gi = jnp.dot(x, jnp.swapaxes(w_ih, 0, 1).astype(param_dtype),
                 preferred_element_type=jnp.float32)
    gi = gi + b_ih.astype(jnp.float32)[None, :]                        # (T, 3H)
    if T_pad != T:
        # Padded steps only write into padded output rows, which are dropped.
        gi = jnp.pad(gi, ((0, T_pad - T), (0, 0)))

    whh_t = jnp.swapaxes(w_hh, 0, 1).astype(param_dtype)               # (H, 3H)
    bhh = b_hh.reshape(1, 3 * H).astype(jnp.float32)
    h0 = hidden0.reshape(1, H).astype(jnp.float32)

    # Explicit scoped-VMEM budget: streamed gi/out chunks (double-buffered) +
    # resident W_hh^T / biases / hidden, with headroom.
    p_bytes = jnp.dtype(param_dtype).itemsize
    vmem_need = (2 * TQ * 3 * H * 4            # gi chunk (double-buffered)
                 + 2 * TQ * H * 4              # out chunk (double-buffered)
                 + 2 * H * 3 * H * p_bytes     # W_hh^T
                 + 2 * 3 * H * 4 + 3 * H * 4)  # biases / h0 / scratch
    vmem_limit = int(min(max(2 * vmem_need + (4 << 20), 16 << 20), 32 << 20))

    outputs = pl.pallas_call(
        _gru_chunk_kernel,
        out_shape=jax.ShapeDtypeStruct((T_pad, H), jnp.float32),
        grid_spec=pltpu.PrefetchScalarGridSpec(
            num_scalar_prefetch=0,
            grid=(T_pad // TQ,),
            in_specs=[
                pl.BlockSpec((TQ, 3 * H), lambda c: (c, 0)),     # gi (streamed)
                pl.BlockSpec((1, H), lambda c: (0, 0)),          # h0 (resident)
                pl.BlockSpec((H, 3 * H), lambda c: (0, 0)),      # W_hh^T (resident)
                pl.BlockSpec((1, 3 * H), lambda c: (0, 0)),      # b_hh (resident)
            ],
            out_specs=pl.BlockSpec((TQ, H), lambda c: (c, 0)),   # blocked along T
            scratch_shapes=[pltpu.VMEM((1, H), jnp.float32)],    # carried hidden
        ),
        compiler_params=pltpu.CompilerParams(
            dimension_semantics=("arbitrary",),   # serial recurrence over chunks
            vmem_limit_bytes=vmem_limit,
        ),
    )(gi, h0, whh_t, bhh)

    outputs = outputs[:T].reshape(T, 1, H)
    hidden = outputs[T - 1].reshape(1, 1, H)
    return outputs, hidden


def encoder_rnn_forward(token, hidden, emb_table, w_ih, w_hh, b_ih, b_hh,
                        *, param_dtype=jnp.bfloat16):
    """Single-step forward matching PyTorch EncoderRNN.forward:
    returns (output, hidden), both (1, 1, H)."""
    out_seq, h = encoder_rnn_sequence(token.reshape(-1)[:1], hidden, emb_table,
                                      w_ih, w_hh, b_ih, b_hh,
                                      param_dtype=param_dtype)
    return out_seq.reshape(1, 1, -1), h


def _reference_sequence(tokens, hidden0, emb_table, w_ih, w_hh, b_ih, b_hh):
    """Pure-JAX (f32) replica of the PyTorch forward applied over the sequence."""
    H = emb_table.shape[1]
    toks = tokens.reshape(-1)
    h = hidden0.reshape(1, H)
    outs = []
    for i in range(toks.shape[0]):
        x = emb_table[toks[i]].reshape(1, H)
        gi = x @ w_ih.T + b_ih
        gh = h @ w_hh.T + b_hh
        r = jax.nn.sigmoid(gi[:, 0:H] + gh[:, 0:H])
        z = jax.nn.sigmoid(gi[:, H:2 * H] + gh[:, H:2 * H])
        n = jnp.tanh(gi[:, 2 * H:] + r * gh[:, 2 * H:])
        h = (1.0 - z) * n + z * h
        outs.append(h)
    out = jnp.stack(outs, axis=0).reshape(-1, 1, H)
    return out, h.reshape(1, 1, H)


if __name__ == "__main__":
    # hidden_size = 256 matches the PyTorch module; small vocab + short sequence.
    V, H, T = 16, 256, 8
    key = jax.random.PRNGKey(0)
    k_emb, k_wih, k_whh, k_bih, k_bhh, k_tok = jax.random.split(key, 6)

    bound = 1.0 / float(jnp.sqrt(jnp.float32(H)))
    emb_table = jax.random.normal(k_emb, (V, H), dtype=jnp.float32)
    w_ih = jax.random.uniform(k_wih, (3 * H, H), jnp.float32, -bound, bound)
    w_hh = jax.random.uniform(k_whh, (3 * H, H), jnp.float32, -bound, bound)
    b_ih = jax.random.uniform(k_bih, (3 * H,), jnp.float32, -bound, bound)
    b_hh = jax.random.uniform(k_bhh, (3 * H,), jnp.float32, -bound, bound)

    tokens = jax.random.randint(k_tok, (T,), 0, V, dtype=jnp.int32)
    hidden0 = jnp.zeros((1, 1, H), dtype=jnp.float32)   # EncoderRNN.initHidden()

    ref_out, ref_hid = _reference_sequence(tokens, hidden0, emb_table,
                                           w_ih, w_hh, b_ih, b_hh)

    # f32-weight path: tight numerical check against the pure-JAX reference.
    out32, hid32 = encoder_rnn_sequence(tokens, hidden0, emb_table, w_ih, w_hh,
                                        b_ih, b_hh, param_dtype=jnp.float32)
    jax.block_until_ready((out32, hid32))
    assert out32.shape == (T, 1, H) and hid32.shape == (1, 1, H)
    assert jnp.allclose(out32, ref_out, atol=1e-3, rtol=1e-3), "f32 output mismatch"
    assert jnp.allclose(hid32, ref_hid, atol=1e-3, rtol=1e-3), "f32 hidden mismatch"

    # Default bf16-weight path: looser tolerance (f32 accumulation, bf16 weights).
    out16, hid16 = encoder_rnn_sequence(tokens, hidden0, emb_table,
                                        w_ih, w_hh, b_ih, b_hh)
    jax.block_until_ready((out16, hid16))
    assert jnp.allclose(out16, ref_out, atol=5e-2, rtol=5e-2), "bf16 output mismatch"
    assert jnp.allclose(hid16, ref_hid, atol=5e-2, rtol=5e-2), "bf16 hidden mismatch"

    # Single-step forward (same signature/semantics as EncoderRNN.forward).
    tok0 = jnp.array([[3]], dtype=jnp.int32)
    o1, h1 = encoder_rnn_forward(tok0, hidden0, emb_table, w_ih, w_hh, b_ih, b_hh,
                                 param_dtype=jnp.float32)
    jax.block_until_ready((o1, h1))
    r1_out, r1_hid = _reference_sequence(tok0, hidden0, emb_table,
                                         w_ih, w_hh, b_ih, b_hh)
    assert jnp.allclose(o1, r1_out.reshape(1, 1, H), atol=1e-3, rtol=1e-3)
    assert jnp.allclose(h1, r1_hid, atol=1e-3, rtol=1e-3)

    print("KERNEL_OK")
</pallas_src>

<mosaic_0001>
module attributes {stable_mosaic.version = 11 : i64} {
  func.func @_gru_chunk_kernel(%arg0: i32, %arg1: memref<8x768xf32, #tpu.memory_space<vmem>>, %arg2: memref<1x256xf32, #tpu.memory_space<vmem>>, %arg3: memref<256x768xf32, #tpu.memory_space<vmem>>, %arg4: memref<1x768xf32, #tpu.memory_space<vmem>>, %arg5: memref<8x256xf32, #tpu.memory_space<vmem>>, %arg6: memref<1x256xf32, #tpu.memory_space<vmem>>) attributes {dimension_semantics = [#tpu.dimension_semantics<arbitrary>], iteration_bounds = array<i64: 1>, scalar_prefetch = 0 : i64, scratch_operands = 1 : i64, tpu.core_type = #tpu.core_type<tc>, window_params = [{transform_indices = @transform_0, window_bounds = array<i64: 8, 768>}, {pipeline_mode = #tpu.pipeline_mode<synchronous>, transform_indices = @transform_1, window_bounds = array<i64: 1, 256>}, {pipeline_mode = #tpu.pipeline_mode<synchronous>, transform_indices = @transform_2, window_bounds = array<i64: 256, 768>}, {pipeline_mode = #tpu.pipeline_mode<synchronous>, transform_indices = @transform_3, window_bounds = array<i64: 1, 768>}, {transform_indices = @transform_4, window_bounds = array<i64: 8, 256>}]} {
    %c0_i32 = arith.constant 0 : i32
    %0 = arith.cmpi eq, %arg0, %c0_i32 : i32
    %1 = arith.extui %0 : i1 to i32
    %c0_i32_0 = arith.constant 0 : i32
    %2 = arith.cmpi ne, %1, %c0_i32_0 : i32
    scf.if %2 {
      %c0_56 = arith.constant 0 : index
      %c0_57 = arith.constant 0 : index
      %263 = vector.load %arg2[%c0_56, %c0_57] : memref<1x256xf32, #tpu.memory_space<vmem>>, vector<1x256xf32>
      %c0_58 = arith.constant 0 : index
      %c0_59 = arith.constant 0 : index
      %264 = vector.load %arg6[%c0_58, %c0_59] : memref<1x256xf32, #tpu.memory_space<vmem>>, vector<1x256xf32>
      tpu.vector_store %arg6[%c0_58, %c0_59], %263 {strides = array<i32>} : memref<1x256xf32, #tpu.memory_space<vmem>>, vector<1x256xf32>,
    } else {
    }
    %c0 = arith.constant 0 : index
    %c0_1 = arith.constant 0 : index
    %3 = vector.load %arg3[%c0, %c0_1] : memref<256x768xf32, #tpu.memory_space<vmem>>, vector<256x768xf32>
    %c0_2 = arith.constant 0 : index
    %c0_3 = arith.constant 0 : index
    %4 = vector.load %arg4[%c0_2, %c0_3] : memref<1x768xf32, #tpu.memory_space<vmem>>, vector<1x768xf32>
    %c0_4 = arith.constant 0 : index
    %c0_5 = arith.constant 0 : index
    %5 = vector.load %arg6[%c0_4, %c0_5] : memref<1x256xf32, #tpu.memory_space<vmem>>, vector<1x256xf32>
    %c0_i32_6 = arith.constant 0 : i32
    %6 = arith.index_cast %c0_i32_6 : i32 to index
    %c0_7 = arith.constant 0 : index
    %7 = vector.load %arg1[%6, %c0_7] : memref<8x768xf32, #tpu.memory_space<vmem>>, vector<1x768xf32>
    %cst = arith.constant dense<0.000000e+00> : vector<1x768xf32>
    %8 = tpu.matmul %5, %3, %cst {dimension_numbers = #tpu.dot_dimension_numbers<[1], [0], [0], [1], [0, 0, 1, 1], [], []>} : vector<1x256xf32>, vector<256x768xf32>, vector<1x768xf32> -> vector<1x768xf32>
    %9 = arith.addf %8, %4 : vector<1x768xf32>
    %10 = vector.extract_strided_slice %7 {offsets = [0, 0], sizes = [1, 256], strides = [1, 1]} : vector<1x768xf32> to vector<1x256xf32>
    %11 = vector.extract_strided_slice %9 {offsets = [0, 0], sizes = [1, 256], strides = [1, 1]} : vector<1x768xf32> to vector<1x256xf32>
    %12 = arith.addf %10, %11 : vector<1x256xf32>
    %13 = arith.negf %12 : vector<1x256xf32>
    %14 = math.exp %13 : vector<1x256xf32>
    %cst_8 = arith.constant 1.000000e+00 : f32
    %15 = vector.broadcast %cst_8 : f32 to vector<1x256xf32>
    %16 = arith.addf %15, %14 : vector<1x256xf32>
    %17 = arith.divf %15, %16 : vector<1x256xf32>
    %18 = vector.extract_strided_slice %7 {offsets = [0, 256], sizes = [1, 256], strides = [1, 1]} : vector<1x768xf32> to vector<1x256xf32>
    %19 = vector.extract_strided_slice %9 {offsets = [0, 256], sizes = [1, 256], strides = [1, 1]} : vector<1x768xf32> to vector<1x256xf32>
    %20 = arith.addf %18, %19 : vector<1x256xf32>
    %21 = arith.negf %20 : vector<1x256xf32>
    %22 = math.exp %21 : vector<1x256xf32>
    %cst_9 = arith.constant 1.000000e+00 : f32
    %23 = vector.broadcast %cst_9 : f32 to vector<1x256xf32>
    %24 = arith.addf %23, %22 : vector<1x256xf32>
    %25 = arith.divf %23, %24 : vector<1x256xf32>
    %26 = vector.extract_strided_slice %7 {offsets = [0, 512], sizes = [1, 256], strides = [1, 1]} : vector<1x768xf32> to vector<1x256xf32>
    %27 = vector.extract_strided_slice %9 {offsets = [0, 512], sizes = [1, 256], strides = [1, 1]} : vector<1x768xf32> to vector<1x256xf32>
    %28 = arith.mulf %17, %27 : vector<1x256xf32>
    %29 = arith.addf %26, %28 : vector<1x256xf32>
    %30 = math.tanh %29 : vector<1x256xf32>
    %cst_10 = arith.constant 1.000000e+00 : f32
    %31 = vector.broadcast %cst_10 : f32 to vector<1x256xf32>
    %32 = arith.subf %31, %25 : vector<1x256xf32>
    %33 = arith.mulf %32, %30 : vector<1x256xf32>
    %34 = arith.mulf %25, %5 : vector<1x256xf32>
    %35 = arith.addf %33, %34 : vector<1x256xf32>
    %36 = arith.index_cast %c0_i32_6 : i32 to index
    %c0_11 = arith.constant 0 : index
    %37 = vector.load %arg5[%36, %c0_11] : memref<8x256xf32, #tpu.memory_space<vmem>>, vector<1x256xf32>
    tpu.vector_store %arg5[%36, %c0_11], %35 {strides = array<i32>} : memref<8x256xf32, #tpu.memory_space<vmem>>, vector<1x256xf32>,
    %c1_i32 = arith.constant 1 : i32
    %38 = arith.index_cast %c1_i32 : i32 to index
    %c0_12 = arith.constant 0 : index
    %39 = vector.load %arg1[%38, %c0_12] : memref<8x768xf32, #tpu.memory_space<vmem>>, vector<1x768xf32>
    %cst_13 = arith.constant dense<0.000000e+00> : vector<1x768xf32>
    %40 = tpu.matmul %35, %3, %cst_13 {dimension_numbers = #tpu.dot_dimension_numbers<[1], [0], [0], [1], [0, 0, 1, 1], [], []>} : vector<1x256xf32>, vector<256x768xf32>, vector<1x768xf32> -> vector<1x768xf32>
    %41 = arith.addf %40, %4 : vector<1x768xf32>
    %42 = vector.extract_strided_slice %39 {offsets = [0, 0], sizes = [1, 256], strides = [1, 1]} : vector<1x768xf32> to vector<1x256xf32>
    %43 = vector.extract_strided_slice %41 {offsets = [0, 0], sizes = [1, 256], strides = [1, 1]} : vector<1x768xf32> to vector<1x256xf32>
    %44 = arith.addf %42, %43 : vector<1x256xf32>
    %45 = arith.negf %44 : vector<1x256xf32>
    %46 = math.exp %45 : vector<1x256xf32>
    %cst_14 = arith.constant 1.000000e+00 : f32
    %47 = vector.broadcast %cst_14 : f32 to vector<1x256xf32>
    %48 = arith.addf %47, %46 : vector<1x256xf32>
    %49 = arith.divf %47, %48 : vector<1x256xf32>
    %50 = vector.extract_strided_slice %39 {offsets = [0, 256], sizes = [1, 256], strides = [1, 1]} : vector<1x768xf32> to vector<1x256xf32>
    %51 = vector.extract_strided_slice %41 {offsets = [0, 256], sizes = [1, 256], strides = [1, 1]} : vector<1x768xf32> to vector<1x256xf32>
    %52 = arith.addf %50, %51 : vector<1x256xf32>
    %53 = arith.negf %52 : vector<1x256xf32>
    %54 = math.exp %53 : vector<1x256xf32>
    %cst_15 = arith.constant 1.000000e+00 : f32
    %55 = vector.broadcast %cst_15 : f32 to vector<1x256xf32>
    %56 = arith.addf %55, %54 : vector<1x256xf32>
    %57 = arith.divf %55, %56 : vector<1x256xf32>
    %58 = vector.extract_strided_slice %39 {offsets = [0, 512], sizes = [1, 256], strides = [1, 1]} : vector<1x768xf32> to vector<1x256xf32>
    %59 = vector.extract_strided_slice %41 {offsets = [0, 512], sizes = [1, 256], strides = [1, 1]} : vector<1x768xf32> to vector<1x256xf32>
    %60 = arith.mulf %49, %59 : vector<1x256xf32>
    %61 = arith.addf %58, %60 : vector<1x256xf32>
    %62 = math.tanh %61 : vector<1x256xf32>
    %cst_16 = arith.constant 1.000000e+00 : f32
    %63 = vector.broadcast %cst_16 : f32 to vector<1x256xf32>
    %64 = arith.subf %63, %57 : vector<1x256xf32>
    %65 = arith.mulf %64, %62 : vector<1x256xf32>
    %66 = arith.mulf %57, %35 : vector<1x256xf32>
    %67 = arith.addf %65, %66 : vector<1x256xf32>
    %68 = arith.index_cast %c1_i32 : i32 to index
    %c0_17 = arith.constant 0 : index
    %69 = vector.load %arg5[%68, %c0_17] : memref<8x256xf32, #tpu.memory_space<vmem>>, vector<1x256xf32>
    tpu.vector_store %arg5[%68, %c0_17], %67 {strides = array<i32>} : memref<8x256xf32, #tpu.memory_space<vmem>>, vector<1x256xf32>,
    %c2_i32 = arith.constant 2 : i32
    %70 = arith.index_cast %c2_i32 : i32 to index
    %c0_18 = arith.constant 0 : index
    %71 = vector.load %arg1[%70, %c0_18] : memref<8x768xf32, #tpu.memory_space<vmem>>, vector<1x768xf32>
    %cst_19 = arith.constant dense<0.000000e+00> : vector<1x768xf32>
    %72 = tpu.matmul %67, %3, %cst_19 {dimension_numbers = #tpu.dot_dimension_numbers<[1], [0], [0], [1], [0, 0, 1, 1], [], []>} : vector<1x256xf32>, vector<256x768xf32>, vector<1x768xf32> -> vector<1x768xf32>
    %73 = arith.addf %72, %4 : vector<1x768xf32>
    %74 = vector.extract_strided_slice %71 {offsets = [0, 0], sizes = [1, 256], strides = [1, 1]} : vector<1x768xf32> to vector<1x256xf32>
    %75 = vector.extract_strided_slice %73 {offsets = [0, 0], sizes = [1, 256], strides = [1, 1]} : vector<1x768xf32> to vector<1x256xf32>
    %76 = arith.addf %74, %75 : vector<1x256xf32>
    %77 = arith.negf %76 : vector<1x256xf32>
    %78 = math.exp %77 : vector<1x256xf32>
    %cst_20 = arith.constant 1.000000e+00 : f32
    %79 = vector.broadcast %cst_20 : f32 to vector<1x256xf32>
    %80 = arith.addf %79, %78 : vector<1x256xf32>
    %81 = arith.divf %79, %80 : vector<1x256xf32>
    %82 = vector.extract_strided_slice %71 {offsets = [0, 256], sizes = [1, 256], strides = [1, 1]} : vector<1x768xf32> to vector<1x256xf32>
    %83 = vector.extract_strided_slice %73 {offsets = [0, 256], sizes = [1, 256], strides = [1, 1]} : vector<1x768xf32> to vector<1x256xf32>
    %84 = arith.addf %82, %83 : vector<1x256xf32>
    %85 = arith.negf %84 : vector<1x256xf32>
    %86 = math.exp %85 : vector<1x256xf32>
    %cst_21 = arith.constant 1.000000e+00 : f32
    %87 = vector.broadcast %cst_21 : f32 to vector<1x256xf32>
    %88 = arith.addf %87, %86 : vector<1x256xf32>
    %89 = arith.divf %87, %88 : vector<1x256xf32>
    %90 = vector.extract_strided_slice %71 {offsets = [0, 512], sizes = [1, 256], strides = [1, 1]} : vector<1x768xf32> to vector<1x256xf32>
    %91 = vector.extract_strided_slice %73 {offsets = [0, 512], sizes = [1, 256], strides = [1, 1]} : vector<1x768xf32> to vector<1x256xf32>
    %92 = arith.mulf %81, %91 : vector<1x256xf32>
    %93 = arith.addf %90, %92 : vector<1x256xf32>
    %94 = math.tanh %93 : vector<1x256xf32>
    %cst_22 = arith.constant 1.000000e+00 : f32
    %95 = vector.broadcast %cst_22 : f32 to vector<1x256xf32>
    %96 = arith.subf %95, %89 : vector<1x256xf32>
    %97 = arith.mulf %96, %94 : vector<1x256xf32>
    %98 = arith.mulf %89, %67 : vector<1x256xf32>
    %99 = arith.addf %97, %98 : vector<1x256xf32>
    %100 = arith.index_cast %c2_i32 : i32 to index
    %c0_23 = arith.constant 0 : index
    %101 = vector.load %arg5[%100, %c0_23] : memref<8x256xf32, #tpu.memory_space<vmem>>, vector<1x256xf32>
    tpu.vector_store %arg5[%100, %c0_23], %99 {strides = array<i32>} : memref<8x256xf32, #tpu.memory_space<vmem>>, vector<1x256xf32>,
    %c3_i32 = arith.constant 3 : i32
    %102 = arith.index_cast %c3_i32 : i32 to index
    %c0_24 = arith.constant 0 : index
    %103 = vector.load %arg1[%102, %c0_24] : memref<8x768xf32, #tpu.memory_space<vmem>>, vector<1x768xf32>
    %cst_25 = arith.constant dense<0.000000e+00> : vector<1x768xf32>
    %104 = tpu.matmul %99, %3, %cst_25 {dimension_numbers = #tpu.dot_dimension_numbers<[1], [0], [0], [1], [0, 0, 1, 1], [], []>} : vector<1x256xf32>, vector<256x768xf32>, vector<1x768xf32> -> vector<1x768xf32>
    %105 = arith.addf %104, %4 : vector<1x768xf32>
    %106 = vector.extract_strided_slice %103 {offsets = [0, 0], sizes = [1, 256], strides = [1, 1]} : vector<1x768xf32> to vector<1x256xf32>
    %107 = vector.extract_strided_slice %105 {offsets = [0, 0], sizes = [1, 256], strides = [1, 1]} : vector<1x768xf32> to vector<1x256xf32>
    %108 = arith.addf %106, %107 : vector<1x256xf32>
    %109 = arith.negf %108 : vector<1x256xf32>
    %110 = math.exp %109 : vector<1x256xf32>
    %cst_26 = arith.constant 1.000000e+00 : f32
    %111 = vector.broadcast %cst_26 : f32 to vector<1x256xf32>
    %112 = arith.addf %111, %110 : vector<1x256xf32>
    %113 = arith.divf %111, %112 : vector<1x256xf32>
    %114 = vector.extract_strided_slice %103 {offsets = [0, 256], sizes = [1, 256], strides = [1, 1]} : vector<1x768xf32> to vector<1x256xf32>
    %115 = vector.extract_strided_slice %105 {offsets = [0, 256], sizes = [1, 256], strides = [1, 1]} : vector<1x768xf32> to vector<1x256xf32>
    %116 = arith.addf %114, %115 : vector<1x256xf32>
    %117 = arith.negf %116 : vector<1x256xf32>
    %118 = math.exp %117 : vector<1x256xf32>
    %cst_27 = arith.constant 1.000000e+00 : f32
    %119 = vector.broadcast %cst_27 : f32 to vector<1x256xf32>
    %120 = arith.addf %119, %118 : vector<1x256xf32>
    %121 = arith.divf %119, %120 : vector<1x256xf32>
    %122 = vector.extract_strided_slice %103 {offsets = [0, 512], sizes = [1, 256], strides = [1, 1]} : vector<1x768xf32> to vector<1x256xf32>
    %123 = vector.extract_strided_slice %105 {offsets = [0, 512], sizes = [1, 256], strides = [1, 1]} : vector<1x768xf32> to vector<1x256xf32>
    %124 = arith.mulf %113, %123 : vector<1x256xf32>
    %125 = arith.addf %122, %124 : vector<1x256xf32>
    %126 = math.tanh %125 : vector<1x256xf32>
    %cst_28 = arith.constant 1.000000e+00 : f32
    %127 = vector.broadcast %cst_28 : f32 to vector<1x256xf32>
    %128 = arith.subf %127, %121 : vector<1x256xf32>
    %129 = arith.mulf %128, %126 : vector<1x256xf32>
    %130 = arith.mulf %121, %99 : vector<1x256xf32>
    %131 = arith.addf %129, %130 : vector<1x256xf32>
    %132 = arith.index_cast %c3_i32 : i32 to index
    %c0_29 = arith.constant 0 : index
    %133 = vector.load %arg5[%132, %c0_29] : memref<8x256xf32, #tpu.memory_space<vmem>>, vector<1x256xf32>
    tpu.vector_store %arg5[%132, %c0_29], %131 {strides = array<i32>} : memref<8x256xf32, #tpu.memory_space<vmem>>, vector<1x256xf32>,
    %c4_i32 = arith.constant 4 : i32
    %134 = arith.index_cast %c4_i32 : i32 to index
    %c0_30 = arith.constant 0 : index
    %135 = vector.load %arg1[%134, %c0_30] : memref<8x768xf32, #tpu.memory_space<vmem>>, vector<1x768xf32>
    %cst_31 = arith.constant dense<0.000000e+00> : vector<1x768xf32>
    %136 = tpu.matmul %131, %3, %cst_31 {dimension_numbers = #tpu.dot_dimension_numbers<[1], [0], [0], [1], [0, 0, 1, 1], [], []>} : vector<1x256xf32>, vector<256x768xf32>, vector<1x768xf32> -> vector<1x768xf32>
    %137 = arith.addf %136, %4 : vector<1x768xf32>
    %138 = vector.extract_strided_slice %135 {offsets = [0, 0], sizes = [1, 256], strides = [1, 1]} : vector<1x768xf32> to vector<1x256xf32>
    %139 = vector.extract_strided_slice %137 {offsets = [0, 0], sizes = [1, 256], strides = [1, 1]} : vector<1x768xf32> to vector<1x256xf32>
    %140 = arith.addf %138, %139 : vector<1x256xf32>
    %141 = arith.negf %140 : vector<1x256xf32>
    %142 = math.exp %141 : vector<1x256xf32>
    %cst_32 = arith.constant 1.000000e+00 : f32
    %143 = vector.broadcast %cst_32 : f32 to vector<1x256xf32>
    %144 = arith.addf %143, %142 : vector<1x256xf32>
    %145 = arith.divf %143, %144 : vector<1x256xf32>
    %146 = vector.extract_strided_slice %135 {offsets = [0, 256], sizes = [1, 256], strides = [1, 1]} : vector<1x768xf32> to vector<1x256xf32>
    %147 = vector.extract_strided_slice %137 {offsets = [0, 256], sizes = [1, 256], strides = [1, 1]} : vector<1x768xf32> to vector<1x256xf32>
    %148 = arith.addf %146, %147 : vector<1x256xf32>
    %149 = arith.negf %148 : vector<1x256xf32>
    %150 = math.exp %149 : vector<1x256xf32>
    %cst_33 = arith.constant 1.000000e+00 : f32
    %151 = vector.broadcast %cst_33 : f32 to vector<1x256xf32>
    %152 = arith.addf %151, %150 : vector<1x256xf32>
    %153 = arith.divf %151, %152 : vector<1x256xf32>
    %154 = vector.extract_strided_slice %135 {offsets = [0, 512], sizes = [1, 256], strides = [1, 1]} : vector<1x768xf32> to vector<1x256xf32>
    %155 = vector.extract_strided_slice %137 {offsets = [0, 512], sizes = [1, 256], strides = [1, 1]} : vector<1x768xf32> to vector<1x256xf32>
    %156 = arith.mulf %145, %155 : vector<1x256xf32>
    %157 = arith.addf %154, %156 : vector<1x256xf32>
    %158 = math.tanh %157 : vector<1x256xf32>
    %cst_34 = arith.constant 1.000000e+00 : f32
    %159 = vector.broadcast %cst_34 : f32 to vector<1x256xf32>
    %160 = arith.subf %159, %153 : vector<1x256xf32>
    %161 = arith.mulf %160, %158 : vector<1x256xf32>
    %162 = arith.mulf %153, %131 : vector<1x256xf32>
    %163 = arith.addf %161, %162 : vector<1x256xf32>
    %164 = arith.index_cast %c4_i32 : i32 to index
    %c0_35 = arith.constant 0 : index
    %165 = vector.load %arg5[%164, %c0_35] : memref<8x256xf32, #tpu.memory_space<vmem>>, vector<1x256xf32>
    tpu.vector_store %arg5[%164, %c0_35], %163 {strides = array<i32>} : memref<8x256xf32, #tpu.memory_space<vmem>>, vector<1x256xf32>,
    %c5_i32 = arith.constant 5 : i32
    %166 = arith.index_cast %c5_i32 : i32 to index
    %c0_36 = arith.constant 0 : index
    %167 = vector.load %arg1[%166, %c0_36] : memref<8x768xf32, #tpu.memory_space<vmem>>, vector<1x768xf32>
    %cst_37 = arith.constant dense<0.000000e+00> : vector<1x768xf32>
    %168 = tpu.matmul %163, %3, %cst_37 {dimension_numbers = #tpu.dot_dimension_numbers<[1], [0], [0], [1], [0, 0, 1, 1], [], []>} : vector<1x256xf32>, vector<256x768xf32>, vector<1x768xf32> -> vector<1x768xf32>
    %169 = arith.addf %168, %4 : vector<1x768xf32>
    %170 = vector.extract_strided_slice %167 {offsets = [0, 0], sizes = [1, 256], strides = [1, 1]} : vector<1x768xf32> to vector<1x256xf32>
    %171 = vector.extract_strided_slice %169 {offsets = [0, 0], sizes = [1, 256], strides = [1, 1]} : vector<1x768xf32> to vector<1x256xf32>
    %172 = arith.addf %170, %171 : vector<1x256xf32>
    %173 = arith.negf %172 : vector<1x256xf32>
    %174 = math.exp %173 : vector<1x256xf32>
    %cst_38 = arith.constant 1.000000e+00 : f32
    %175 = vector.broadcast %cst_38 : f32 to vector<1x256xf32>
    %176 = arith.addf %175, %174 : vector<1x256xf32>
    %177 = arith.divf %175, %176 : vector<1x256xf32>
    %178 = vector.extract_strided_slice %167 {offsets = [0, 256], sizes = [1, 256], strides = [1, 1]} : vector<1x768xf32> to vector<1x256xf32>
    %179 = vector.extract_strided_slice %169 {offsets = [0, 256], sizes = [1, 256], strides = [1, 1]} : vector<1x768xf32> to vector<1x256xf32>
    %180 = arith.addf %178, %179 : vector<1x256xf32>
    %181 = arith.negf %180 : vector<1x256xf32>
    %182 = math.exp %181 : vector<1x256xf32>
    %cst_39 = arith.constant 1.000000e+00 : f32
    %183 = vector.broadcast %cst_39 : f32 to vector<1x256xf32>
    %184 = arith.addf %183, %182 : vector<1x256xf32>
    %185 = arith.divf %183, %184 : vector<1x256xf32>
    %186 = vector.extract_strided_slice %167 {offsets = [0, 512], sizes = [1, 256], strides = [1, 1]} : vector<1x768xf32> to vector<1x256xf32>
    %187 = vector.extract_strided_slice %169 {offsets = [0, 512], sizes = [1, 256], strides = [1, 1]} : vector<1x768xf32> to vector<1x256xf32>
    %188 = arith.mulf %177, %187 : vector<1x256xf32>
    %189 = arith.addf %186, %188 : vector<1x256xf32>
    %190 = math.tanh %189 : vector<1x256xf32>
    %cst_40 = arith.constant 1.000000e+00 : f32
    %191 = vector.broadcast %cst_40 : f32 to vector<1x256xf32>
    %192 = arith.subf %191, %185 : vector<1x256xf32>
    %193 = arith.mulf %192, %190 : vector<1x256xf32>
    %194 = arith.mulf %185, %163 : vector<1x256xf32>
    %195 = arith.addf %193, %194 : vector<1x256xf32>
    %196 = arith.index_cast %c5_i32 : i32 to index
    %c0_41 = arith.constant 0 : index
    %197 = vector.load %arg5[%196, %c0_41] : memref<8x256xf32, #tpu.memory_space<vmem>>, vector<1x256xf32>
    tpu.vector_store %arg5[%196, %c0_41], %195 {strides = array<i32>} : memref<8x256xf32, #tpu.memory_space<vmem>>, vector<1x256xf32>,
    %c6_i32 = arith.constant 6 : i32
    %198 = arith.index_cast %c6_i32 : i32 to index
    %c0_42 = arith.constant 0 : index
    %199 = vector.load %arg1[%198, %c0_42] : memref<8x768xf32, #tpu.memory_space<vmem>>, vector<1x768xf32>
    %cst_43 = arith.constant dense<0.000000e+00> : vector<1x768xf32>
    %200 = tpu.matmul %195, %3, %cst_43 {dimension_numbers = #tpu.dot_dimension_numbers<[1], [0], [0], [1], [0, 0, 1, 1], [], []>} : vector<1x256xf32>, vector<256x768xf32>, vector<1x768xf32> -> vector<1x768xf32>
    %201 = arith.addf %200, %4 : vector<1x768xf32>
    %202 = vector.extract_strided_slice %199 {offsets = [0, 0], sizes = [1, 256], strides = [1, 1]} : vector<1x768xf32> to vector<1x256xf32>
    %203 = vector.extract_strided_slice %201 {offsets = [0, 0], sizes = [1, 256], strides = [1, 1]} : vector<1x768xf32> to vector<1x256xf32>
    %204 = arith.addf %202, %203 : vector<1x256xf32>
    %205 = arith.negf %204 : vector<1x256xf32>
    %206 = math.exp %205 : vector<1x256xf32>
    %cst_44 = arith.constant 1.000000e+00 : f32
    %207 = vector.broadcast %cst_44 : f32 to vector<1x256xf32>
    %208 = arith.addf %207, %206 : vector<1x256xf32>
    %209 = arith.divf %207, %208 : vector<1x256xf32>
    %210 = vector.extract_strided_slice %199 {offsets = [0, 256], sizes = [1, 256], strides = [1, 1]} : vector<1x768xf32> to vector<1x256xf32>
    %211 = vector.extract_strided_slice %201 {offsets = [0, 256], sizes = [1, 256], strides = [1, 1]} : vector<1x768xf32> to vector<1x256xf32>
    %212 = arith.addf %210, %211 : vector<1x256xf32>
    %213 = arith.negf %212 : vector<1x256xf32>
    %214 = math.exp %213 : vector<1x256xf32>
    %cst_45 = arith.constant 1.000000e+00 : f32
    %215 = vector.broadcast %cst_45 : f32 to vector<1x256xf32>
    %216 = arith.addf %215, %214 : vector<1x256xf32>
    %217 = arith.divf %215, %216 : vector<1x256xf32>
    %218 = vector.extract_strided_slice %199 {offsets = [0, 512], sizes = [1, 256], strides = [1, 1]} : vector<1x768xf32> to vector<1x256xf32>
    %219 = vector.extract_strided_slice %201 {offsets = [0, 512], sizes = [1, 256], strides = [1, 1]} : vector<1x768xf32> to vector<1x256xf32>
    %220 = arith.mulf %209, %219 : vector<1x256xf32>
    %221 = arith.addf %218, %220 : vector<1x256xf32>
    %222 = math.tanh %221 : vector<1x256xf32>
    %cst_46 = arith.constant 1.000000e+00 : f32
    %223 = vector.broadcast %cst_46 : f32 to vector<1x256xf32>
    %224 = arith.subf %223, %217 : vector<1x256xf32>
    %225 = arith.mulf %224, %222 : vector<1x256xf32>
    %226 = arith.mulf %217, %195 : vector<1x256xf32>
    %227 = arith.addf %225, %226 : vector<1x256xf32>
    %228 = arith.index_cast %c6_i32 : i32 to index
    %c0_47 = arith.constant 0 : index
    %229 = vector.load %arg5[%228, %c0_47] : memref<8x256xf32, #tpu.memory_space<vmem>>, vector<1x256xf32>
    tpu.vector_store %arg5[%228, %c0_47], %227 {strides = array<i32>} : memref<8x256xf32, #tpu.memory_space<vmem>>, vector<1x256xf32>,
    %c7_i32 = arith.constant 7 : i32
    %230 = arith.index_cast %c7_i32 : i32 to index
    %c0_48 = arith.constant 0 : index
    %231 = vector.load %arg1[%230, %c0_48] : memref<8x768xf32, #tpu.memory_space<vmem>>, vector<1x768xf32>
    %cst_49 = arith.constant dense<0.000000e+00> : vector<1x768xf32>
    %232 = tpu.matmul %227, %3, %cst_49 {dimension_numbers = #tpu.dot_dimension_numbers<[1], [0], [0], [1], [0, 0, 1, 1], [], []>} : vector<1x256xf32>, vector<256x768xf32>, vector<1x768xf32> -> vector<1x768xf32>
    %233 = arith.addf %232, %4 : vector<1x768xf32>
    %234 = vector.extract_strided_slice %231 {offsets = [0, 0], sizes = [1, 256], strides = [1, 1]} : vector<1x768xf32> to vector<1x256xf32>
    %235 = vector.extract_strided_slice %233 {offsets = [0, 0], sizes = [1, 256], strides = [1, 1]} : vector<1x768xf32> to vector<1x256xf32>
    %236 = arith.addf %234, %235 : vector<1x256xf32>
    %237 = arith.negf %236 : vector<1x256xf32>
    %238 = math.exp %237 : vector<1x256xf32>
    %cst_50 = arith.constant 1.000000e+00 : f32
    %239 = vector.broadcast %cst_50 : f32 to vector<1x256xf32>
    %240 = arith.addf %239, %238 : vector<1x256xf32>
    %241 = arith.divf %239, %240 : vector<1x256xf32>
    %242 = vector.extract_strided_slice %231 {offsets = [0, 256], sizes = [1, 256], strides = [1, 1]} : vector<1x768xf32> to vector<1x256xf32>
    %243 = vector.extract_strided_slice %233 {offsets = [0, 256], sizes = [1, 256], strides = [1, 1]} : vector<1x768xf32> to vector<1x256xf32>
    %244 = arith.addf %242, %243 : vector<1x256xf32>
    %245 = arith.negf %244 : vector<1x256xf32>
    %246 = math.exp %245 : vector<1x256xf32>
    %cst_51 = arith.constant 1.000000e+00 : f32
    %247 = vector.broadcast %cst_51 : f32 to vector<1x256xf32>
    %248 = arith.addf %247, %246 : vector<1x256xf32>
    %249 = arith.divf %247, %248 : vector<1x256xf32>
    %250 = vector.extract_strided_slice %231 {offsets = [0, 512], sizes = [1, 256], strides = [1, 1]} : vector<1x768xf32> to vector<1x256xf32>
    %251 = vector.extract_strided_slice %233 {offsets = [0, 512], sizes = [1, 256], strides = [1, 1]} : vector<1x768xf32> to vector<1x256xf32>
    %252 = arith.mulf %241, %251 : vector<1x256xf32>
    %253 = arith.addf %250, %252 : vector<1x256xf32>
    %254 = math.tanh %253 : vector<1x256xf32>
    %cst_52 = arith.constant 1.000000e+00 : f32
    %255 = vector.broadcast %cst_52 : f32 to vector<1x256xf32>
    %256 = arith.subf %255, %249 : vector<1x256xf32>
    %257 = arith.mulf %256, %254 : vector<1x256xf32>
    %258 = arith.mulf %249, %227 : vector<1x256xf32>
    %259 = arith.addf %257, %258 : vector<1x256xf32>
    %260 = arith.index_cast %c7_i32 : i32 to index
    %c0_53 = arith.constant 0 : index
    %261 = vector.load %arg5[%260, %c0_53] : memref<8x256xf32, #tpu.memory_space<vmem>>, vector<1x256xf32>
    tpu.vector_store %arg5[%260, %c0_53], %259 {strides = array<i32>} : memref<8x256xf32, #tpu.memory_space<vmem>>, vector<1x256xf32>,
    %c8_i32 = arith.constant 8 : i32
    %c0_54 = arith.constant 0 : index
    %c0_55 = arith.constant 0 : index
    %262 = vector.load %arg6[%c0_54, %c0_55] : memref<1x256xf32, #tpu.memory_space<vmem>>, vector<1x256xf32>
    tpu.vector_store %arg6[%c0_54, %c0_55], %259 {strides = array<i32>} : memref<1x256xf32, #tpu.memory_space<vmem>>, vector<1x256xf32>,
    return
  }
  func.func @transform_0(%arg0: i32) -> (i32, i32) {
    %c0_i32 = arith.constant 0 : i32
    %c0_i32_0 = arith.constant 0 : i32
    return %arg0, %c0_i32 : i32, i32
  }
  func.func @transform_1(%arg0: i32) -> (i32, i32) {
    %c0_i32 = arith.constant 0 : i32
    %c0_i32_0 = arith.constant 0 : i32
    %c0_i32_1 = arith.constant 0 : i32
    return %c0_i32, %c0_i32_0 : i32, i32
  }
  func.func @transform_2(%arg0: i32) -> (i32, i32) {
    %c0_i32 = arith.constant 0 : i32
    %c0_i32_0 = arith.constant 0 : i32
    %c0_i32_1 = arith.constant 0 : i32
    return %c0_i32, %c0_i32_0 : i32, i32
  }
  func.func @transform_3(%arg0: i32) -> (i32, i32) {
    %c0_i32 = arith.constant 0 : i32
    %c0_i32_0 = arith.constant 0 : i32
    %c0_i32_1 = arith.constant 0 : i32
    return %c0_i32, %c0_i32_0 : i32, i32
  }
  func.func @transform_4(%arg0: i32) -> (i32, i32) {
    %c0_i32 = arith.constant 0 : i32
    %c0_i32_0 = arith.constant 0 : i32
    return %arg0, %c0_i32 : i32, i32
  }
}

</mosaic_0001>

<bundles_post_ra>
// kernel: encoder_rnn_sequence.1
= control target key start
LH: loop header
LB: loop body
LE: loop exit
PB: predicated region body
PF: predicated region fallthrough
CT: control target
= control target key end

     0   :  { %v22_v33 = vlaneseq  ;;  %v8727_v42 = vmov 0  ;;  %s8029_s2 = inlined_call_operand.vmem [shape: f32[256,768], index: 2, kind: input, shape index: {}]   ;;  %s8030_s1 = inlined_call_operand.vmem [shape: f32[1,256], index: 1, kind: input, shape index: {}]   ;;  %s8031_s3 = inlined_call_operand.vmem [shape: f32[1,768], index: 3, kind: input, shape index: {}]   ;;  %s8032_s0 = inlined_call_operand.vmem [shape: f32[8,768], index: 0, kind: input, shape index: {}]   ;;  %s8033_s4 = inlined_call_operand.vmem [shape: f32[8,256], index: 4, kind: output, shape index: {}]  }
   0x1   :  { %v3279_v0 = vld [vmem:[%s8029_s2 + $0x2d8] sm:$0xff]  ;;  %v3284_v1 = vld [vmem:[%s8029_s2 + $0x2d0] sm:$0xff]  ;;  %v3289_v2 = vld [vmem:[%s8029_s2 + $0x2a8] sm:$0xff] }
   0x2   :  { %266 = vmatprep.subr.mxu0 %v3279_v0  ;;  %v3295_v3 = vld [vmem:[%s8029_s2 + $0x2a0] sm:$0xff]  ;;  %v3301_v4 = vld [vmem:[%s8029_s2 + $0x278] sm:$0xff]  ;;  %v3307_v5 = vld [vmem:[%s8029_s2 + $0x270] sm:$0xff]  ;;  %vm3516_vm0 = vcmp.lt.s32.totalorder %v22_v33, 256  ;;  %v3561_v50 = vshrl.u32 %v22_v33, 7 }
   0x3   :  { %267 = vmatpush1.msra.mxu0 %v3284_v1  ;;  %v3313_v6 = vld [vmem:[%s8029_s2 + $0x248] sm:$0xff]  ;;  %v3319_v7 = vld [vmem:[%s8029_s2 + $0x240] sm:$0xff]  ;;  %v3325_v8 = vld [vmem:[%s8029_s2 + $0x218] sm:$0xff]  ;;  %v8728_v42 = vsel %vm3516_vm0, 4294967295, %v8727_v42 }
   0x4   :  { %268 = vmatprep.subr.mxu0 %v3289_v2  ;;  %v3331_v9 = vld [vmem:[%s8029_s2 + $0x210] sm:$0xff]  ;;  %v3337_v10 = vld [vmem:[%s8029_s2 + $0x1e8] sm:$0xff]  ;;  %v3343_v11 = vld [vmem:[%s8029_s2 + $0x1e0] sm:$0xff]  ;;  %8729 = vst [vmem:[#allocation11_spill] sm:$0xff] %v8728_v42  ;;  %v3607_v58 = vsub.s32 1, %v3561_v50 }
   0x5   :  { %269 = vmatpush1.msra.mxu0 %v3295_v3  ;;  %v3349_v12 = vld [vmem:[%s8029_s2 + $0x1b8] sm:$0xff]  ;;  %v3355_v13 = vld [vmem:[%s8029_s2 + $0x1b0] sm:$0xff]  ;;  %v3361_v14 = vld [vmem:[%s8029_s2 + $0x188] sm:$0xff]  ;;  %8733 = vst [vmem:[#allocation15_spill] sm:$0xff] %v3561_v50 }
   0x6   :  { %270 = vmatprep.subr.mxu0 %v3301_v4  ;;  %v3367_v15 = vld [vmem:[%s8029_s2 + $0x180] sm:$0xff]  ;;  %v3373_v16 = vld [vmem:[%s8029_s2 + $0x158] sm:$0xff]  ;;  %v3379_v17 = vld [vmem:[%s8029_s2 + $0x150] sm:$0xff]  ;;  %8737 = vst [vmem:[#allocation19_spill] sm:$0xff] %v3607_v58 }
   0x7   :  { %271 = vmatpush1.msra.mxu0 %v3307_v5  ;;  %v3384_v18 = vld [vmem:[%s8029_s2 + $0x2e8] sm:$0xff]  ;;  %v3389_v19 = vld [vmem:[%s8029_s2 + $0x2e0] sm:$0xff]  ;;  %v3401_v21 = vld [vmem:[%s8029_s2 + $0x2b8] sm:$0xff] }
   0x8   :  { %272 = vmatprep.subr.mxu0 %v3313_v6  ;;  %v3395_v20 = vld [vmem:[%s8029_s2 + $0x128] sm:$0xff]  ;;  %337 = vmatprep.subr.mxu1 %v3384_v18  ;;  %v3407_v22 = vld [vmem:[%s8029_s2 + $0x120] sm:$0xff]  ;;  %v3413_v23 = vld [vmem:[%s8029_s2 + $0x2b0] sm:$0xff] }
   0x9   :  { %273 = vmatpush1.msra.mxu0 %v3319_v7  ;;  %338 = vmatpush1.msra.mxu1 %v3389_v19  ;;  %v3418_v24 = vld [vmem:[%s8029_s2 + $0x288] sm:$0xff]  ;;  %v3424_v25 = vld [vmem:[%s8029_s2 + $0xf8] sm:$0xff]  ;;  %v3430_v26 = vld [vmem:[%s8029_s2 + $0x280] sm:$0xff] }
   0xa   :  { %274 = vmatprep.subr.mxu0 %v3325_v8  ;;  %339 = vmatprep.subr.mxu1 %v3401_v21  ;;  %8719 = vst [vmem:[#allocation3_spill] sm:$0xff] %v3430_v26  ;;  %v3436_v27 = vld [vmem:[%s8029_s2 + $0xf0] sm:$0xff]  ;;  %v3442_v28 = vld [vmem:[%s8029_s2 + $0x258] sm:$0xff]  ;;  %v3448_v29 = vld [vmem:[%s8029_s2 + $0xc8] sm:$0xff] }
   0xb   :  { %275 = vmatpush1.msra.mxu0 %v3331_v9  ;;  %340 = vmatpush1.msra.mxu1 %v3413_v23  ;;  %8720 = vst [vmem:[#allocation4_spill] sm:$0xff] %v3442_v28  ;;  %v3454_v30 = vld [vmem:[%s8029_s2 + $0x250] sm:$0xff]  ;;  %v3460_v31 = vld [vmem:[%s8029_s2 + $0xc0] sm:$0xff]  ;;  %v3466_v32 = vld [vmem:[%s8029_s2 + $0x228] sm:$0xff] }
   0xc   :  { %276 = vmatprep.subr.mxu0 %v3337_v10  ;;  %341 = vmatprep.subr.mxu1 %v3418_v24  ;;  %8721 = vst [vmem:[#allocation5_spill] sm:$0xff] %v3454_v30  ;;  %8722 = vst [vmem:[#allocation6_spill] sm:$0xff] %v3466_v32  ;;  %v3472_v34 = vld [vmem:[%s8029_s2 + $0x98] sm:$0xff]  ;;  %v3478_v35 = vld [vmem:[%s8029_s2 + $0x220] sm:$0xff] }
   0xd   :  { %277 = vmatpush1.msra.mxu0 %v3343_v11  ;;  %342 = vmatpush1.msra.mxu1 %v3430_v26  ;;  %8723 = vst [vmem:[#allocation7_spill] sm:$0xff] %v3478_v35  ;;  %v3484_v36 = vld [vmem:[%s8029_s2 + $0x90] sm:$0xff]  ;;  %v3490_v37 = vld [vmem:[%s8029_s2 + $0x1f8] sm:$0xff]  ;;  %v3496_v38 = vld [vmem:[%s8029_s2 + $0x68] sm:$0xff] }
   0xe   :  { %278 = vmatprep.subr.mxu0 %v3349_v12  ;;  %343 = vmatprep.subr.mxu1 %v3442_v28  ;;  %8724 = vst [vmem:[#allocation8_spill] sm:$0xff] %v3490_v37  ;;  %v3502_v39 = vld [vmem:[%s8029_s2 + $0x1f0] sm:$0xff]  ;;  %v3508_v40 = vld [vmem:[%s8029_s2 + $0x60] sm:$0xff]  ;;  %v3514_v41 = vld [vmem:[%s8029_s2 + $0x1c8] sm:$0xff] }
   0xf   :  { %279 = vmatpush1.msra.mxu0 %v3355_v13  ;;  %344 = vmatpush1.msra.mxu1 %v3454_v30  ;;  %8725 = vst [vmem:[#allocation9_spill] sm:$0xff] %v3502_v39  ;;  %8726 = vst [vmem:[#allocation10_spill] sm:$0xff] %v3514_v41  ;;  %v3524_v43 = vld [vmem:[%s8029_s2 + $0x38] sm:$0xff]  ;;  %v3530_v44 = vld [vmem:[%s8029_s2 + $0x1c0] sm:$0xff] }
  0x10   :  { %280 = vmatprep.subr.mxu0 %v3361_v14  ;;  %345 = vmatprep.subr.mxu1 %v3466_v32  ;;  %8730 = vst [vmem:[#allocation12_spill] sm:$0xff] %v3530_v44  ;;  %v3536_v45 = vld [vmem:[%s8029_s2 + $0x30] sm:$0xff]  ;;  %v3542_v46 = vld [vmem:[%s8029_s2 + $0x198] sm:$0xff]  ;;  %v21_v47 = vld [vmem:[%s8030_s1] sm:$0x3] }
  0x11   :  { %281 = vmatpush1.msra.mxu0 %v3367_v15  ;;  %346 = vmatpush1.msra.mxu1 %v3478_v35  ;;  %8731 = vst [vmem:[#allocation13_spill] sm:$0xff] %v3542_v46  ;;  %v3551_v48 = vld [vmem:[%s8029_s2 + $0x8] sm:$0xff]  ;;  %v3557_v49 = vld [vmem:[%s8029_s2 + $0x190] sm:$0xff]  ;;  %26 = vst.msk [vmem:[#allocation2] sm:$0x3] %vm3516_vm0, %v21_v47 }
  0x12   :  { %282 = vmatprep.subr.mxu0 %v3373_v16  ;;  %347 = vmatprep.subr.mxu1 %v3490_v37  ;;  %8732 = vst [vmem:[#allocation14_spill] sm:$0xff] %v3557_v49  ;;  %v3567_v51 = vld [vmem:[%s8029_s2] sm:$0xff]  ;;  %v3573_v52 = vld [vmem:[%s8029_s2 + $0x168] sm:$0xff]  ;;  %v3579_v53 = vld [vmem:[%s8029_s2 + $0x5d8] sm:$0xff] }
  0x13   :  { %283 = vmatpush1.msra.mxu0 %v3379_v17  ;;  %348 = vmatpush1.msra.mxu1 %v3502_v39  ;;  %8734 = vst [vmem:[#allocation16_spill] sm:$0xff] %v3573_v52  ;;  %v3585_v54 = vld [vmem:[%s8029_s2 + $0x160] sm:$0xff]  ;;  %v3591_v55 = vld [vmem:[%s8029_s2 + $0x5d0] sm:$0xff]  ;;  %v3597_v56 = vld [vmem:[%s8029_s2 + $0x138] sm:$0xff] }
  0x14   :  { %284 = vmatprep.subr.mxu0 %v3395_v20  ;;  %349 = vmatprep.subr.mxu1 %v3514_v41  ;;  %8735 = vst [vmem:[#allocation17_spill] sm:$0xff] %v3585_v54  ;;  %8736 = vst [vmem:[#allocation18_spill] sm:$0xff] %v3597_v56  ;;  %v3603_v57 = vld [vmem:[%s8029_s2 + $0x5a8] sm:$0xff]  ;;  %v3612_v59 = vld [vmem:[%s8029_s2 + $0x130] sm:$0xff] }
  0x15   :  { %285 = vmatpush1.msra.mxu0 %v3407_v22  ;;  %350 = vmatpush1.msra.mxu1 %v3530_v44  ;;  %8738 = vst [vmem:[#allocation20_spill] sm:$0xff] %v3612_v59  ;;  %v3618_v60 = vld [vmem:[%s8029_s2 + $0x5a0] sm:$0xff]  ;;  %v3624_v61 = vld [vmem:[%s8029_s2 + $0x108] sm:$0xff]  ;;  %v3630_v62 = vld [vmem:[%s8029_s2 + $0x578] sm:$0xff] }
  0x16   :  { %286 = vmatprep.subr.mxu0 %v3424_v25  ;;  %351 = vmatprep.subr.mxu1 %v3542_v46  ;;  %8739 = vst [vmem:[#allocation21_spill] sm:$0xff] %v3624_v61  ;;  %v3636_v63 = vld [vmem:[%s8029_s2 + $0x100] sm:$0xff]  ;;  %v3642_v33 = vld [vmem:[%s8029_s2 + $0x570] sm:$0xff]  ;;  %v3651_v42 = vld [vmem:[%s8029_s2 + $0x548] sm:$0xff] }
  0x17   :  { %287 = vmatpush1.msra.mxu0 %v3436_v27  ;;  %352 = vmatpush1.msra.mxu1 %v3557_v49  ;;  %8740 = vst [vmem:[#allocation22_spill] sm:$0xff] %v3636_v63  ;;  %v3697_v49 = vld [vmem:[%s8029_s2 + $0xa0] sm:$0xff]  ;;  %v3703_v46 = vld [vmem:[%s8029_s2 + $0x4e8] sm:$0xff]  ;;  %v3709_v44 = vld [vmem:[%s8029_s2 + $0x78] sm:$0xff] }
  0x18   :  { %288 = vmatprep.subr.mxu0 %v3448_v29  ;;  %353 = vmatprep.subr.mxu1 %v3573_v52  ;;  %v3644_v47 = vld [vmem:[#allocation2] sm:$0x3]  ;;  %v3685_v52 = vld [vmem:[%s8029_s2 + $0xa8] sm:$0xff]  ;;  %8745 = vst [vmem:[#allocation27_spill] sm:$0xff] %v3697_v49  ;;  %8746 = vst [vmem:[#allocation28_spill] sm:$0xff] %v3709_v44 }
  0x19   :  { %289 = vmatpush1.msra.mxu0 %v3460_v31  ;;  %354 = vmatpush1.msra.mxu1 %v3585_v54  ;;  %8741 = vst [vmem:[#allocation23_spill] sm:$0xff] %v3644_v47  ;;  %v3661_v54 = vld [vmem:[%s8029_s2 + $0xd8] sm:$0xff]  ;;  %8744 = vst [vmem:[#allocation26_spill] sm:$0xff] %v3685_v52  ;;  %v3721_v41 = vld [vmem:[%s8029_s2 + $0x70] sm:$0xff] }
  0x1a   :  { %290 = vmatprep.subr.mxu0 %v3472_v34  ;;  %355 = vmatprep.subr.mxu1 %v3597_v56  ;;  %v3655_v56 = vrot.slane %v3644_v47, %v3607_v58  ;;  %8742 = vst [vmem:[#allocation24_spill] sm:$0xff] %v3661_v54  ;;  %v3673_v58 = vld [vmem:[%s8029_s2 + $0xd0] sm:$0xff]  ;;  %8747 = vst [vmem:[#allocation29_spill] sm:$0xff] %v3721_v41  ;;  %v3733_v39 = vld [vmem:[%s8029_s2 + $0x48] sm:$0xff] }
  0x1b   :  { %291 = vmatpush1.msra.mxu0 %v3484_v36  ;;  %356 = vmatpush1.msra.mxu1 %v3612_v59  ;;  %v3667_v59 = vld [vmem:[%s8029_s2 + $0x540] sm:$0xff]  ;;  %8743 = vst [vmem:[#allocation25_spill] sm:$0xff] %v3673_v58  ;;  %8748 = vst [vmem:[#allocation30_spill] sm:$0xff] %v3733_v39  ;;  %v3757_v35 = vld [vmem:[%s8029_s2 + $0x18] sm:$0xff] }
  0x1c   :  { %292 = vmatprep.subr.mxu0 %v3496_v38  ;;  %357 = vmatprep.subr.mxu1 %v3624_v61  ;;  %v3679_v61 = vld [vmem:[%s8029_s2 + $0x518] sm:$0xff]  ;;  %v3745_v37 = vld [vmem:[%s8029_s2 + $0x40] sm:$0xff]  ;;  %8750 = vst [vmem:[#allocation32_spill] sm:$0xff] %v3757_v35  ;;  %v3769_v32 = vld [vmem:[%s8029_s2 + $0x10] sm:$0xff] }
  0x1d   :  { %293 = vmatpush1.msra.mxu0 %v3508_v40  ;;  %358 = vmatpush1.msra.mxu1 %v3636_v63  ;;  %v3691_v63 = vld [vmem:[%s8029_s2 + $0x510] sm:$0xff]  ;;  %8749 = vst [vmem:[#allocation31_spill] sm:$0xff] %v3745_v37  ;;  %8752 = vst [vmem:[#allocation34_spill] sm:$0xff] %v3769_v32  ;;  %v3781_v30 = vld [vmem:[%s8029_s2 + $0x5e8] sm:$0xff] }
  0x1e   :  { %294 = vmatprep.subr.mxu0 %v3524_v43  ;;  %330 = vmatprep.mubr.f32.mxu0 %v3655_v56  ;;  %8754 = vst [vmem:[#allocation36_spill] sm:$0xff] %v3781_v30  ;;  %v3793_v28 = vld [vmem:[%s8029_s2 + $0x5e0] sm:$0xff]  ;;  %v3805_v26 = vld [vmem:[%s8029_s2 + $0x5b8] sm:$0xff] }
  0x1f   :  { %295 = vmatpush1.msra.mxu0 %v3536_v45  ;;  %359 = vmatprep.subr.mxu1 %v3661_v54  ;;  %v3715_v54 = vld [vmem:[%s8029_s2 + $0x4e0] sm:$0xff]  ;;  %8756 = vst [vmem:[#allocation38_spill] sm:$0xff] %v3793_v28  ;;  %8758 = vst [vmem:[#allocation40_spill] sm:$0xff] %v3805_v26 }
  0x20   :  { %296 = vmatprep.subr.mxu0 %v3551_v48  ;;  %360 = vmatpush1.msra.mxu1 %v3673_v58  ;;  %v3727_v58 = vld [vmem:[%s8029_s2 + $0x4b8] sm:$0xff] }
  0x21   :  { %297 = vmatpush1.msra.mxu0 %v3567_v51  ;;  %361 = vmatprep.subr.mxu1 %v3685_v52  ;;  %v3739_v52 = vld [vmem:[%s8029_s2 + $0x4b0] sm:$0xff] }
  0x22   :  { %298 = vmatprep.subr.mxu0 %v3579_v53  ;;  %362 = vmatpush1.msra.mxu1 %v3697_v49  ;;  %v3751_v49 = vld [vmem:[%s8029_s2 + $0x488] sm:$0xff] }
  0x23   :  { %299 = vmatpush2.msra.mxu0 %v3591_v55  ;;  %363 = vmatprep.subr.mxu1 %v3709_v44  ;;  %v3763_v44 = vld [vmem:[%s8029_s2 + $0x480] sm:$0xff] }
  0x24   :  { %300 = vmatprep.subr.mxu0 %v3603_v57  ;;  %364 = vmatpush1.msra.mxu1 %v3721_v41  ;;  %8751 = vst [vmem:[#allocation33_spill] sm:$0xff] %v3763_v44  ;;  %v3775_v41 = vld [vmem:[%s8029_s2 + $0x458] sm:$0xff] }
  0x25   :  { %301 = vmatpush2.msra.mxu0 %v3618_v60  ;;  %365 = vmatprep.subr.mxu1 %v3733_v39  ;;  %8753 = vst [vmem:[#allocation35_spill] sm:$0xff] %v3775_v41  ;;  %v3787_v39 = vld [vmem:[%s8029_s2 + $0x450] sm:$0xff] }
  0x26   :  { %302 = vmatprep.subr.mxu0 %v3630_v62  ;;  %366 = vmatpush1.msra.mxu1 %v3745_v37  ;;  %8755 = vst [vmem:[#allocation37_spill] sm:$0xff] %v3787_v39  ;;  %v3799_v37 = vld [vmem:[%s8029_s2 + $0x428] sm:$0xff] }
  0x27   :  { %303 = vmatpush2.msra.mxu0 %v3642_v33  ;;  %367 = vmatprep.subr.mxu1 %v3757_v35  ;;  %8757 = vst [vmem:[#allocation39_spill] sm:$0xff] %v3799_v37  ;;  %v3811_v35 = vld [vmem:[%s8029_s2 + $0x420] sm:$0xff] }
  0x28   :  { %304 = vmatprep.subr.mxu0 %v3651_v42  ;;  %368 = vmatpush1.msra.mxu1 %v3769_v32  ;;  %8759 = vst [vmem:[#allocation41_spill] sm:$0xff] %v3811_v35  ;;  %v3823_v32 = vld [vmem:[%s8029_s2 + $0x3f8] sm:$0xff] }
  0x29   :  { %305 = vmatpush2.msra.mxu0 %v3667_v59  ;;  %369 = vmatprep.subr.mxu1 %v3781_v30  ;;  %8761 = vst [vmem:[#allocation43_spill] sm:$0xff] %v3823_v32  ;;  %v3835_v30 = vld [vmem:[%s8029_s2 + $0x3f0] sm:$0xff] }
  0x2a   :  { %306 = vmatprep.subr.mxu0 %v3679_v61  ;;  %370 = vmatpush2.msra.mxu1 %v3793_v28  ;;  %8763 = vst [vmem:[#allocation45_spill] sm:$0xff] %v3835_v30  ;;  %v3847_v28 = vld [vmem:[%s8029_s2 + $0x3c8] sm:$0xff] }
  0x2b   :  { %307 = vmatpush2.msra.mxu0 %v3691_v63  ;;  %371 = vmatprep.subr.mxu1 %v3805_v26  ;;  %8765 = vst [vmem:[#allocation47_spill] sm:$0xff] %v3847_v28  ;;  %v3859_v26 = vld [vmem:[%s8029_s2 + $0x3c0] sm:$0xff] }
  0x2c   :  { %308 = vmatprep.subr.mxu0 %v3703_v46  ;;  %8767 = vst [vmem:[#allocation49_spill] sm:$0xff] %v3859_v26  ;;  %401 = vmatprep.mubr.f32.mxu1 %v3655_v56 }
  0x2d   :  { %309 = vmatpush2.msra.mxu0 %v3715_v54 }
  0x2e   :  { %310 = vmatprep.subr.mxu0 %v3727_v58 }
  0x2f   :  { %311 = vmatpush2.msra.mxu0 %v3739_v52 }
  0x30   :  { %312 = vmatprep.subr.mxu0 %v3751_v49 }
  0x31   :  { %313 = vmatpush2.msra.mxu0 %v3763_v44  ;;  %v3817_v44 = vld [vmem:[%s8029_s2 + $0x5b0] sm:$0xff] }
  0x32   :  { %314 = vmatprep.subr.mxu0 %v3775_v41  ;;  %8760 = vst [vmem:[#allocation42_spill] sm:$0xff] %v3817_v44  ;;  %v3829_v41 = vld [vmem:[%s8029_s2 + $0x588] sm:$0xff]  ;;  %372 = vmatpush2.msra.mxu1 %v3817_v44  ;;  %v3871_v44 = vld [vmem:[%s8029_s2 + $0x398] sm:$0xff] }
  0x33   :  { %315 = vmatpush2.msra.mxu0 %v3787_v39  ;;  %8762 = vst [vmem:[#allocation44_spill] sm:$0xff] %v3829_v41  ;;  %v3841_v39 = vld [vmem:[%s8029_s2 + $0x580] sm:$0xff]  ;;  %373 = vmatprep.subr.mxu1 %v3829_v41  ;;  %8769 = vst [vmem:[#allocation51_spill] sm:$0xff] %v3871_v44  ;;  %v3883_v41 = vld [vmem:[%s8029_s2 + $0x390] sm:$0xff] }
  0x34   :  { %316 = vmatprep.subr.mxu0 %v3799_v37  ;;  %8764 = vst [vmem:[#allocation46_spill] sm:$0xff] %v3841_v39  ;;  %v3853_v37 = vld [vmem:[%s8029_s2 + $0x558] sm:$0xff]  ;;  %374 = vmatpush2.msra.mxu1 %v3841_v39  ;;  %8771 = vst [vmem:[#allocation53_spill] sm:$0xff] %v3883_v41  ;;  %v3895_v39 = vld [vmem:[%s8029_s2 + $0x368] sm:$0xff] }
  0x35   :  { %317 = vmatpush2.msra.mxu0 %v3811_v35  ;;  %8766 = vst [vmem:[#allocation48_spill] sm:$0xff] %v3853_v37  ;;  %v3865_v35 = vld [vmem:[%s8029_s2 + $0x550] sm:$0xff]  ;;  %375 = vmatprep.subr.mxu1 %v3853_v37  ;;  %8773 = vst [vmem:[#allocation55_spill] sm:$0xff] %v3895_v39  ;;  %v3907_v37 = vld [vmem:[%s8029_s2 + $0x360] sm:$0xff] }
  0x36   :  { %318 = vmatprep.subr.mxu0 %v3823_v32  ;;  %8768 = vst [vmem:[#allocation50_spill] sm:$0xff] %v3865_v35  ;;  %v3877_v32 = vld [vmem:[%s8029_s2 + $0x528] sm:$0xff]  ;;  %376 = vmatpush2.msra.mxu1 %v3865_v35  ;;  %8775 = vst [vmem:[#allocation57_spill] sm:$0xff] %v3907_v37  ;;  %v3916_v35 = vld [vmem:[%s8029_s2 + $0x4f0] sm:$0xff] }
  0x37   :  { %319 = vmatpush2.msra.mxu0 %v3835_v30  ;;  %8770 = vst [vmem:[#allocation52_spill] sm:$0xff] %v3877_v32  ;;  %v3889_v30 = vld [vmem:[%s8029_s2 + $0x520] sm:$0xff]  ;;  %377 = vmatprep.subr.mxu1 %v3877_v32  ;;  %8777 = vst [vmem:[#allocation59_spill] sm:$0xff] %v3916_v35  ;;  %v3934_v32 = vld [vmem:[%s8029_s2 + $0x330] sm:$0xff] }
  0x38   :  { %320 = vmatprep.subr.mxu0 %v3847_v28  ;;  %8772 = vst [vmem:[#allocation54_spill] sm:$0xff] %v3889_v30  ;;  %v3901_v28 = vld [vmem:[%s8029_s2 + $0x4f8] sm:$0xff]  ;;  %378 = vmatpush2.msra.mxu1 %v3889_v30  ;;  %8780 = vst [vmem:[#allocation62_spill] sm:$0xff] %v3934_v32  ;;  %v3946_v30 = vld [vmem:[%s8029_s2 + $0x308] sm:$0xff] }
  0x39   :  { %321 = vmatpush2.msra.mxu0 %v3859_v26  ;;  %8774 = vst [vmem:[#allocation56_spill] sm:$0xff] %v3901_v28  ;;  %v3910_v26 = vsub.s32 0, %v3561_v50  ;;  %v3928_v50 = vld [vmem:[%s8029_s2 + $0x4c8] sm:$0xff]  ;;  %379 = vmatprep.subr.mxu1 %v3901_v28  ;;  %8782 = vst [vmem:[#allocation64_spill] sm:$0xff] %v3946_v30  ;;  %v3958_v28 = vld [vmem:[%s8029_s2 + $0x300] sm:$0xff] }
  0x3a   :  { %322 = vmatprep.subr.mxu0 %v3871_v44  ;;  %v3922_v44 = vld [vmem:[%s8029_s2 + $0x338] sm:$0xff]  ;;  %8779 = vst [vmem:[#allocation61_spill] sm:$0xff] %v3928_v50  ;;  %380 = vmatpush2.msra.mxu1 %v3916_v35  ;;  %8784 = vst [vmem:[#allocation66_spill] sm:$0xff] %v3958_v28  ;;  %v3968_v35 = vld [vmem:[%s8029_s2 + $0x490] sm:$0xff] }
  0x3b   :  { %8776 = vst [vmem:[#allocation58_spill] sm:$0xff] %v3910_v26  ;;  %323 = vmatpush2.msra.mxu0 %v3883_v41  ;;  %8778 = vst [vmem:[#allocation60_spill] sm:$0xff] %v3922_v44  ;;  %v3940_v41 = vld [vmem:[%s8029_s2 + $0x4c0] sm:$0xff]  ;;  %381 = vmatprep.subr.mxu1 %v3928_v50 }
  0x3c   :  { %324 = vmatprep.subr.mxu0 %v3895_v39  ;;  %8781 = vst [vmem:[#allocation63_spill] sm:$0xff] %v3940_v41  ;;  %v3952_v39 = vld [vmem:[%s8029_s2 + $0x498] sm:$0xff]  ;;  %8785 = vst [vmem:[#allocation67_spill] sm:$0xff] %v3968_v35  ;;  %382 = vmatpush2.msra.mxu1 %v3940_v41  ;;  %v3993_v41 = vld [vmem:[%s8029_s2 + $0x2c8] sm:$0xff] }
  0x3d   :  { %325 = vmatpush2.msra.mxu0 %v3907_v37  ;;  %8783 = vst [vmem:[#allocation65_spill] sm:$0xff] %v3952_v39  ;;  %v3962_v37 = vrot.slane %v3644_v47, %v3910_v26  ;;  %v3981_v47 = vld [vmem:[%s8029_s2 + $0x2f0] sm:$0xff]  ;;  %383 = vmatprep.subr.mxu1 %v3952_v39  ;;  %v3987_v26 = vld [vmem:[%s8029_s2 + $0x468] sm:$0xff]  ;;  %8789 = vst [vmem:[#allocation71_spill] sm:$0xff] %v3993_v41 }
  0x3e   :  { %326 = vmatprep.subr.mxu0 %v3922_v44  ;;  %v3974_v44 = vld [vmem:[%s8029_s2 + $0x2f8] sm:$0xff]  ;;  %8787 = vst [vmem:[#allocation69_spill] sm:$0xff] %v3981_v47  ;;  %8788 = vst [vmem:[#allocation70_spill] sm:$0xff] %v3987_v26  ;;  %384 = vmatpush2.msra.mxu1 %v3968_v35  ;;  %v3999_v50 = vld [vmem:[%s8029_s2 + $0x460] sm:$0xff] }
  0x3f   :  { %327 = vmatpush2.msra.mxu0 %v3934_v32  ;;  %8786 = vst [vmem:[#allocation68_spill] sm:$0xff] %v3974_v44  ;;  %8790 = vst [vmem:[#allocation72_spill] sm:$0xff] %v3999_v50  ;;  %v4006_v39 = vld [vmem:[%s8029_s2 + $0x2c0] sm:$0xff]  ;;  %v4017_v35 = vld [vmem:[%s8029_s2 + $0x298] sm:$0xff]  ;;  %385 = vmatprep.subr.mxu1 %v3987_v26 }
  0x40   :  { %328 = vmatprep.subr.mxu0 %v3946_v30  ;;  %8791 = vst [vmem:[#allocation73_spill] sm:$0xff] %v4006_v39  ;;  %8793 = vst [vmem:[#allocation75_spill] sm:$0xff] %v4017_v35  ;;  %v4029_v30 = vld [vmem:[%s8029_s2 + $0x290] sm:$0xff]  ;;  %386 = vmatpush2.msra.mxu1 %v3999_v50  ;;  %v4041_v26 = vld [vmem:[%s8029_s2 + $0x268] sm:$0xff] }
  0x41   :  { %329 = vmatpush2.msra.mxu0 %v3958_v28  ;;  %v4011_v28 = vld [vmem:[%s8029_s2 + $0x438] sm:$0xff]  ;;  %8795 = vst [vmem:[#allocation77_spill] sm:$0xff] %v4029_v30  ;;  %8797 = vst [vmem:[#allocation79_spill] sm:$0xff] %v4041_v26  ;;  %v4053_v50 = vld [vmem:[%s8029_s2 + $0x260] sm:$0xff] }
  0x42   :  { %331 = vmatmul.mubr.f32.vlgmr.msra.gmra.mxu0 %v3962_v37  ;;  %408 = vmatprep.subr.mxu0 %v3974_v44  ;;  %8792 = vst [vmem:[#allocation74_spill] sm:$0xff] %v4011_v28  ;;  %v4023_v44 = vld [vmem:[%s8029_s2 + $0x430] sm:$0xff]  ;;  %8799 = vst [vmem:[#allocation81_spill] sm:$0xff] %v4053_v50 }
  0x43   :  { %409 = vmatpush1.msra.mxu0 %v3981_v47  ;;  %8794 = vst [vmem:[#allocation76_spill] sm:$0xff] %v4023_v44  ;;  %v4035_v47 = vld [vmem:[%s8029_s2 + $0x408] sm:$0xff]  ;;  %387 = vmatprep.subr.mxu1 %v4011_v28  ;;  %v4065_v28 = vld [vmem:[%s8029_s2 + $0x238] sm:$0xff] }
  0x44   :  { %410 = vmatprep.subr.mxu0 %v3993_v41  ;;  %8796 = vst [vmem:[#allocation78_spill] sm:$0xff] %v4035_v47  ;;  %v4047_v41 = vld [vmem:[%s8029_s2 + $0x400] sm:$0xff]  ;;  %388 = vmatpush2.msra.mxu1 %v4023_v44  ;;  %8801 = vst [vmem:[#allocation83_spill] sm:$0xff] %v4065_v28  ;;  %v4077_v44 = vld [vmem:[%s8029_s2 + $0x230] sm:$0xff] }
  0x45   :  { %411 = vmatpush1.msra.mxu0 %v4006_v39  ;;  %8798 = vst [vmem:[#allocation80_spill] sm:$0xff] %v4047_v41  ;;  %v4059_v39 = vld [vmem:[%s8029_s2 + $0x3d8] sm:$0xff]  ;;  %389 = vmatprep.subr.mxu1 %v4035_v47  ;;  %8803 = vst [vmem:[#allocation85_spill] sm:$0xff] %v4077_v44  ;;  %v4089_v47 = vld [vmem:[%s8029_s2 + $0x208] sm:$0xff] }
  0x46   :  { %412 = vmatprep.subr.mxu0 %v4017_v35  ;;  %8800 = vst [vmem:[#allocation82_spill] sm:$0xff] %v4059_v39  ;;  %v4071_v35 = vld [vmem:[%s8029_s2 + $0x3d0] sm:$0xff]  ;;  %390 = vmatpush2.msra.mxu1 %v4047_v41  ;;  %8805 = vst [vmem:[#allocation87_spill] sm:$0xff] %v4089_v47  ;;  %v4101_v41 = vld [vmem:[%s8029_s2 + $0x200] sm:$0xff] }
  0x47   :  { %413 = vmatpush1.msra.mxu0 %v4029_v30  ;;  %8802 = vst [vmem:[#allocation84_spill] sm:$0xff] %v4071_v35  ;;  %v4083_v30 = vld [vmem:[%s8029_s2 + $0x3a8] sm:$0xff]  ;;  %391 = vmatprep.subr.mxu1 %v4059_v39  ;;  %8807 = vst [vmem:[#allocation89_spill] sm:$0xff] %v4101_v41  ;;  %v4113_v39 = vld [vmem:[%s8029_s2 + $0x1d8] sm:$0xff] }
  0x48   :  { %414 = vmatprep.subr.mxu0 %v4041_v26  ;;  %8804 = vst [vmem:[#allocation86_spill] sm:$0xff] %v4083_v30  ;;  %v4095_v26 = vld [vmem:[%s8029_s2 + $0x3a0] sm:$0xff]  ;;  %392 = vmatpush2.msra.mxu1 %v4071_v35  ;;  %8809 = vst [vmem:[#allocation91_spill] sm:$0xff] %v4113_v39  ;;  %v4125_v35 = vld [vmem:[%s8029_s2 + $0x1d0] sm:$0xff] }
  0x49   :  { %415 = vmatpush1.msra.mxu0 %v4053_v50  ;;  %8806 = vst [vmem:[#allocation88_spill] sm:$0xff] %v4095_v26  ;;  %v4107_v50 = vld [vmem:[%s8029_s2 + $0x378] sm:$0xff]  ;;  %393 = vmatprep.subr.mxu1 %v4083_v30  ;;  %8811 = vst [vmem:[#allocation93_spill] sm:$0xff] %v4125_v35  ;;  %v4137_v30 = vld [vmem:[%s8029_s2 + $0x1a8] sm:$0xff] }
  0x4a   :  { %416 = vmatprep.subr.mxu0 %v4065_v28  ;;  %8808 = vst [vmem:[#allocation90_spill] sm:$0xff] %v4107_v50  ;;  %v4119_v28 = vld [vmem:[%s8029_s2 + $0x370] sm:$0xff]  ;;  %394 = vmatpush2.msra.mxu1 %v4095_v26  ;;  %8813 = vst [vmem:[#allocation95_spill] sm:$0xff] %v4137_v30  ;;  %v4149_v26 = vld [vmem:[%s8029_s2 + $0x1a0] sm:$0xff] }
  0x4b   :  { %417 = vmatpush1.msra.mxu0 %v4077_v44  ;;  %8810 = vst [vmem:[#allocation92_spill] sm:$0xff] %v4119_v28  ;;  %v4131_v44 = vld [vmem:[%s8029_s2 + $0x348] sm:$0xff]  ;;  %395 = vmatprep.subr.mxu1 %v4107_v50  ;;  %8815 = vst [vmem:[#allocation97_spill] sm:$0xff] %v4149_v26  ;;  %v4161_v50 = vld [vmem:[%s8029_s2 + $0x178] sm:$0xff] }
  0x4c   :  { %418 = vmatprep.subr.mxu0 %v4089_v47  ;;  %8812 = vst [vmem:[#allocation94_spill] sm:$0xff] %v4131_v44  ;;  %v4143_v47 = vld [vmem:[%s8029_s2 + $0x340] sm:$0xff]  ;;  %396 = vmatpush2.msra.mxu1 %v4119_v28  ;;  %8817 = vst [vmem:[#allocation99_spill] sm:$0xff] %v4161_v50  ;;  %v4173_v28 = vld [vmem:[%s8029_s2 + $0x170] sm:$0xff] }
  0x4d   :  { %419 = vmatpush1.msra.mxu0 %v4101_v41  ;;  %8814 = vst [vmem:[#allocation96_spill] sm:$0xff] %v4143_v47  ;;  %v4155_v41 = vld [vmem:[%s8029_s2 + $0x318] sm:$0xff]  ;;  %397 = vmatprep.subr.mxu1 %v4131_v44  ;;  %8819 = vst [vmem:[#allocation101_spill] sm:$0xff] %v4173_v28 }
  0x4e   :  { %420 = vmatprep.subr.mxu0 %v4113_v39  ;;  %8816 = vst [vmem:[#allocation98_spill] sm:$0xff] %v4155_v41  ;;  %v4167_v39 = vld [vmem:[%s8029_s2 + $0x310] sm:$0xff]  ;;  %398 = vmatpush2.msra.mxu1 %v4143_v47 }
  0x4f   :  { %421 = vmatpush1.msra.mxu0 %v4125_v35  ;;  %8818 = vst [vmem:[#allocation100_spill] sm:$0xff] %v4167_v39  ;;  %v4180_v35 = vld [vmem:[%s8029_s2 + $0x148] sm:$0xff]  ;;  %399 = vmatprep.subr.mxu1 %v4155_v41 }
  0x50   :  { %422 = vmatprep.subr.mxu0 %v4137_v30  ;;  %8820 = vst [vmem:[#allocation102_spill] sm:$0xff] %v4180_v35  ;;  %v4187_v30 = vld [vmem:[%s8029_s2 + $0x140] sm:$0xff]  ;;  %400 = vmatpush2.msra.mxu1 %v4167_v39 }
  0x51   :  { %423 = vmatpush1.msra.mxu0 %v4149_v26  ;;  %8821 = vst [vmem:[#allocation103_spill] sm:$0xff] %v4187_v30  ;;  %v4194_v26 = vld [vmem:[%s8029_s2 + $0x118] sm:$0xff]  ;;  %402 = vmatmul.mubr.f32.vlgmr.msra.gmra.mxu1 %v3962_v37 }
  0x52   :  { %424 = vmatprep.subr.mxu0 %v4161_v50  ;;  %v4201_v50 = vld [vmem:[%s8029_s2 + $0x110] sm:$0xff]  ;;  %472 = vmatprep.mubr.f32.mxu0 %v3655_v56 }
  0x53   :  { %425 = vmatpush1.msra.mxu0 %v4173_v28  ;;  %v4208_v28 = vld [vmem:[%s8029_s2 + $0xe8] sm:$0xff]  ;;  %580 = vmatprep.subr.mxu1 %v3279_v0  ;;  %v4229_v56 = vld [vmem:[%s8029_s2 + $0xb0] sm:$0xff] }
  0x54   :  { %426 = vmatprep.subr.mxu0 %v4180_v35  ;;  %v4215_v35 = vld [vmem:[%s8029_s2 + $0xe0] sm:$0xff]  ;;  %581 = vmatpush1.msra.mxu1 %v3284_v1  ;;  %v4236_v0 = vld [vmem:[%s8029_s2 + $0x88] sm:$0xff] }
  0x55   :  { %427 = vmatpush1.msra.mxu0 %v4187_v30  ;;  %v4222_v30 = vld [vmem:[%s8029_s2 + $0xb8] sm:$0xff]  ;;  %582 = vmatprep.subr.mxu1 %v3289_v2  ;;  %v4243_v1 = vld [vmem:[%s8029_s2 + $0x80] sm:$0xff] }
  0x56   :  { %428 = vmatprep.subr.mxu0 %v4194_v26  ;;  %583 = vmatpush1.msra.mxu1 %v3295_v3  ;;  %v4250_v2 = vld [vmem:[%s8029_s2 + $0x58] sm:$0xff]  ;;  %v4257_v3 = vld [vmem:[%s8029_s2 + $0x50] sm:$0xff] }
  0x57   :  { %429 = vmatpush1.msra.mxu0 %v4201_v50  ;;  %584 = vmatprep.subr.mxu1 %v3301_v4  ;;  %v4264_v4 = vld [vmem:[%s8029_s2 + $0x28] sm:$0xff] }
  0x58   :  { %430 = vmatprep.subr.mxu0 %v4208_v28  ;;  %585 = vmatpush1.msra.mxu1 %v3307_v5  ;;  %v4271_v5 = vld [vmem:[%s8029_s2 + $0x20] sm:$0xff] }
  0x59   :  { %431 = vmatpush1.msra.mxu0 %v4215_v35  ;;  %586 = vmatprep.subr.mxu1 %v3313_v6  ;;  %v4278_v6 = vld [vmem:[%s8029_s2 + $0x5f8] sm:$0xff] }
  0x5a   :  { %432 = vmatprep.subr.mxu0 %v4222_v30  ;;  %587 = vmatpush1.msra.mxu1 %v3319_v7  ;;  %v4285_v7 = vld [vmem:[%s8029_s2 + $0x5f0] sm:$0xff] }
  0x5b   :  { %433 = vmatpush1.msra.mxu0 %v4229_v56  ;;  %588 = vmatprep.subr.mxu1 %v3325_v8  ;;  %v4292_v8 = vld [vmem:[%s8029_s2 + $0x5c8] sm:$0xff] }
  0x5c   :  { %434 = vmatprep.subr.mxu0 %v4236_v0  ;;  %589 = vmatpush1.msra.mxu1 %v3331_v9  ;;  %v4299_v9 = vld [vmem:[%s8029_s2 + $0x5c0] sm:$0xff] }
  0x5d   :  { %435 = vmatpush1.msra.mxu0 %v4243_v1  ;;  %590 = vmatprep.subr.mxu1 %v3337_v10  ;;  %v4306_v10 = vld [vmem:[%s8029_s2 + $0x598] sm:$0xff] }
  0x5e   :  { %436 = vmatprep.subr.mxu0 %v4250_v2  ;;  %591 = vmatpush1.msra.mxu1 %v3343_v11  ;;  %v4313_v11 = vld [vmem:[%s8029_s2 + $0x590] sm:$0xff] }
  0x5f   :  { %437 = vmatpush1.msra.mxu0 %v4257_v3  ;;  %592 = vmatprep.subr.mxu1 %v3349_v12  ;;  %v4320_v12 = vld [vmem:[%s8029_s2 + $0x568] sm:$0xff] }
  0x60   :  { %438 = vmatprep.subr.mxu0 %v4264_v4  ;;  %593 = vmatpush1.msra.mxu1 %v3355_v13  ;;  %v4327_v13 = vld [vmem:[%s8029_s2 + $0x560] sm:$0xff] }
  0x61   :  { %439 = vmatpush1.msra.mxu0 %v4271_v5  ;;  %594 = vmatprep.subr.mxu1 %v3361_v14  ;;  %v4334_v14 = vld [vmem:[%s8029_s2 + $0x538] sm:$0xff] }
  0x62   :  { %440 = vmatprep.subr.mxu0 %v4278_v6  ;;  %595 = vmatpush1.msra.mxu1 %v3367_v15  ;;  %v4341_v15 = vld [vmem:[%s8029_s2 + $0x530] sm:$0xff] }
  0x63   :  { %441 = vmatpush2.msra.mxu0 %v4285_v7  ;;  %596 = vmatprep.subr.mxu1 %v3373_v16  ;;  %v4348_v16 = vld [vmem:[%s8029_s2 + $0x508] sm:$0xff] }
  0x64   :  { %442 = vmatprep.subr.mxu0 %v4292_v8  ;;  %597 = vmatpush1.msra.mxu1 %v3379_v17  ;;  %v4355_v17 = vld [vmem:[%s8029_s2 + $0x500] sm:$0xff] }
  0x65   :  { %443 = vmatpush2.msra.mxu0 %v4299_v9  ;;  %598 = vmatprep.subr.mxu1 %v3395_v20  ;;  %v4362_v20 = vld [vmem:[%s8029_s2 + $0x4d8] sm:$0xff] }
  0x66   :  { %444 = vmatprep.subr.mxu0 %v4306_v10  ;;  %599 = vmatpush1.msra.mxu1 %v3407_v22  ;;  %v4369_v22 = vld [vmem:[%s8029_s2 + $0x4d0] sm:$0xff] }
  0x67   :  { %445 = vmatpush2.msra.mxu0 %v4313_v11  ;;  %600 = vmatprep.subr.mxu1 %v3424_v25  ;;  %v4376_v25 = vld [vmem:[%s8029_s2 + $0x4a8] sm:$0xff] }
  0x68   :  { %446 = vmatprep.subr.mxu0 %v4320_v12  ;;  %601 = vmatpush1.msra.mxu1 %v3436_v27  ;;  %v4383_v27 = vld [vmem:[%s8029_s2 + $0x4a0] sm:$0xff] }
  0x69   :  { %447 = vmatpush2.msra.mxu0 %v4327_v13  ;;  %602 = vmatprep.subr.mxu1 %v3448_v29  ;;  %v4390_v29 = vld [vmem:[%s8029_s2 + $0x478] sm:$0xff] }
  0x6a   :  { %448 = vmatprep.subr.mxu0 %v4334_v14  ;;  %603 = vmatpush1.msra.mxu1 %v3460_v31  ;;  %v4397_v31 = vld [vmem:[%s8029_s2 + $0x470] sm:$0xff] }
  0x6b   :  { %449 = vmatpush2.msra.mxu0 %v4341_v15  ;;  %604 = vmatprep.subr.mxu1 %v3472_v34  ;;  %v4404_v34 = vld [vmem:[%s8029_s2 + $0x448] sm:$0xff] }
  0x6c   :  { %450 = vmatprep.subr.mxu0 %v4348_v16  ;;  %605 = vmatpush1.msra.mxu1 %v3484_v36  ;;  %v4411_v36 = vld [vmem:[%s8029_s2 + $0x440] sm:$0xff] }
  0x6d   :  { %451 = vmatpush2.msra.mxu0 %v4355_v17  ;;  %606 = vmatprep.subr.mxu1 %v3496_v38  ;;  %v4418_v38 = vld [vmem:[%s8029_s2 + $0x418] sm:$0xff] }
  0x6e   :  { %452 = vmatprep.subr.mxu0 %v4362_v20  ;;  %607 = vmatpush1.msra.mxu1 %v3508_v40  ;;  %v4425_v40 = vld [vmem:[%s8029_s2 + $0x410] sm:$0xff] }
  0x6f   :  { %453 = vmatpush2.msra.mxu0 %v4369_v22  ;;  %608 = vmatprep.subr.mxu1 %v3524_v43  ;;  %v4432_v43 = vld [vmem:[%s8029_s2 + $0x3e8] sm:$0xff] }
  0x70   :  { %454 = vmatprep.subr.mxu0 %v4376_v25  ;;  %609 = vmatpush1.msra.mxu1 %v3536_v45  ;;  %v4439_v45 = vld [vmem:[%s8029_s2 + $0x3e0] sm:$0xff] }
  0x71   :  { %455 = vmatpush2.msra.mxu0 %v4383_v27  ;;  %610 = vmatprep.subr.mxu1 %v3551_v48  ;;  %v4446_v48 = vld [vmem:[%s8029_s2 + $0x3b8] sm:$0xff] }
  0x72   :  { %456 = vmatprep.subr.mxu0 %v4390_v29  ;;  %611 = vmatpush1.msra.mxu1 %v3567_v51  ;;  %v4453_v51 = vld [vmem:[%s8029_s2 + $0x3b0] sm:$0xff] }
  0x73   :  { %457 = vmatpush2.msra.mxu0 %v4397_v31  ;;  %612 = vmatprep.subr.mxu1 %v3579_v53  ;;  %v4460_v53 = vld [vmem:[%s8029_s2 + $0x388] sm:$0xff] }
  0x74   :  { %458 = vmatprep.subr.mxu0 %v4404_v34  ;;  %613 = vmatpush2.msra.mxu1 %v3591_v55  ;;  %v4467_v55 = vld [vmem:[%s8029_s2 + $0x380] sm:$0xff] }
  0x75   :  { %459 = vmatpush2.msra.mxu0 %v4411_v36  ;;  %614 = vmatprep.subr.mxu1 %v3603_v57  ;;  %8822 = vst [vmem:[#allocation104_spill] sm:$0xff] %v4467_v55  ;;  %v4474_v57 = vld [vmem:[%s8029_s2 + $0x358] sm:$0xff] }
  0x76   :  { %460 = vmatprep.subr.mxu0 %v4418_v38  ;;  %615 = vmatpush2.msra.mxu1 %v3618_v60  ;;  %8823 = vst [vmem:[#allocation105_spill] sm:$0xff] %v4474_v57  ;;  %v4481_v60 = vld [vmem:[%s8029_s2 + $0x350] sm:$0xff] }
  0x77   :  { %461 = vmatpush2.msra.mxu0 %v4425_v40  ;;  %616 = vmatprep.subr.mxu1 %v3630_v62  ;;  %8824 = vst [vmem:[#allocation106_spill] sm:$0xff] %v4481_v60  ;;  %v4488_v62 = vld [vmem:[%s8029_s2 + $0x328] sm:$0xff] }
  0x78   :  { %462 = vmatprep.subr.mxu0 %v4432_v43  ;;  %617 = vmatpush2.msra.mxu1 %v3642_v33  ;;  %8825 = vst [vmem:[#allocation107_spill] sm:$0xff] %v4488_v62  ;;  %v4495_v33 = vld [vmem:[%s8029_s2 + $0x320] sm:$0xff] }
  0x79   :  { %463 = vmatpush2.msra.mxu0 %v4439_v45  ;;  %618 = vmatprep.subr.mxu1 %v3651_v42  ;;  %8826 = vst [vmem:[#allocation108_spill] sm:$0xff] %v4495_v33  ;;  %v8827_v42 = vld [vmem:[#allocation33_spill] sm:$0xff] }
  0x7a   :  { %464 = vmatprep.subr.mxu0 %v4446_v48  ;;  %619 = vmatpush2.msra.mxu1 %v3667_v59  ;;  %v8839_v59 = vld [vmem:[#allocation45_spill] sm:$0xff] }
  0x7b   :  { %465 = vmatpush2.msra.mxu0 %v4453_v51  ;;  %620 = vmatprep.subr.mxu1 %v3679_v61  ;;  %v8840_v61 = vld [vmem:[#allocation9_spill] sm:$0xff] }
  0x7c   :  { %466 = vmatprep.subr.mxu0 %v4460_v53  ;;  %621 = vmatpush2.msra.mxu1 %v3691_v63  ;;  %v8841_v63 = vld [vmem:[#allocation47_spill] sm:$0xff] }
  0x7d   :  { %467 = vmatpush2.msra.mxu0 %v4467_v55  ;;  %622 = vmatprep.subr.mxu1 %v3703_v46  ;;  %v8828_v46 = vld [vmem:[#allocation3_spill] sm:$0xff] }
  0x7e   :  { %468 = vmatprep.subr.mxu0 %v4474_v57  ;;  %623 = vmatpush2.msra.mxu1 %v3715_v54  ;;  %v8832_v54 = vld [vmem:[#allocation5_spill] sm:$0xff] }
  0x7f   :  { %469 = vmatpush2.msra.mxu0 %v4481_v60  ;;  %624 = vmatprep.subr.mxu1 %v3727_v58  ;;  %v8838_v58 = vld [vmem:[#allocation8_spill] sm:$0xff] }
  0x80   :  { %470 = vmatprep.subr.mxu0 %v4488_v62  ;;  %625 = vmatpush2.msra.mxu1 %v3739_v52  ;;  %v8834_v52 = vld [vmem:[#allocation6_spill] sm:$0xff] }
  0x81   :  { %471 = vmatpush2.msra.mxu0 %v4495_v33  ;;  %626 = vmatprep.subr.mxu1 %v3751_v49  ;;  %v8836_v49 = vld [vmem:[#allocation7_spill] sm:$0xff] }
  0x82   :  { %473 = vmatmul.mubr.f32.vlgmr.msra.gmra.mxu0 %v3962_v37  ;;  %651 = vmatprep.subr.mxu0 %v3384_v18  ;;  %v8829_v37 = vld [vmem:[#allocation35_spill] sm:$0xff]  ;;  %v8830_v18 = vld [vmem:[#allocation4_spill] sm:$0xff] }
  0x83   :  { %652 = vmatpush1.msra.mxu0 %v3389_v19  ;;  %627 = vmatpush2.msra.mxu1 %v8827_v42  ;;  %v8831_v19 = vld [vmem:[#allocation37_spill] sm:$0xff]  ;;  %v8842_v42 = vld [vmem:[#allocation10_spill] sm:$0xff] }
  0x84   :  { %653 = vmatprep.subr.mxu0 %v3401_v21  ;;  %628 = vmatprep.subr.mxu1 %v8829_v37  ;;  %v8833_v21 = vld [vmem:[#allocation39_spill] sm:$0xff]  ;;  %v8844_v37 = vld [vmem:[#allocation12_spill] sm:$0xff] }
  0x85   :  { %654 = vmatpush1.msra.mxu0 %v3413_v23  ;;  %629 = vmatpush2.msra.mxu1 %v8831_v19  ;;  %v8835_v23 = vld [vmem:[#allocation41_spill] sm:$0xff] }
  0x86   :  { %655 = vmatprep.subr.mxu0 %v3418_v24  ;;  %630 = vmatprep.subr.mxu1 %v8833_v21  ;;  %v8837_v24 = vld [vmem:[#allocation43_spill] sm:$0xff]  ;;  %v8846_v19 = vld [vmem:[#allocation13_spill] sm:$0xff]  ;;  %v8848_v21 = vld [vmem:[#allocation14_spill] sm:$0xff] }
  0x87   :  { %656 = vmatpush1.msra.mxu0 %v8828_v46  ;;  %631 = vmatpush2.msra.mxu1 %v8835_v23  ;;  %v8843_v46 = vld [vmem:[#allocation49_spill] sm:$0xff]  ;;  %v8850_v23 = vld [vmem:[#allocation16_spill] sm:$0xff] }
  0x88   :  { %657 = vmatprep.subr.mxu0 %v8830_v18  ;;  %632 = vmatprep.subr.mxu1 %v8837_v24  ;;  %v8845_v18 = vld [vmem:[#allocation51_spill] sm:$0xff]  ;;  %v8852_v24 = vld [vmem:[#allocation17_spill] sm:$0xff] }
  0x89   :  { %658 = vmatpush1.msra.mxu0 %v8832_v54  ;;  %633 = vmatpush2.msra.mxu1 %v8839_v59  ;;  %v8847_v54 = vld [vmem:[#allocation53_spill] sm:$0xff]  ;;  %v8854_v59 = vld [vmem:[#allocation18_spill] sm:$0xff] }
  0x8a   :  { %659 = vmatprep.subr.mxu0 %v8834_v52  ;;  %634 = vmatprep.subr.mxu1 %v8841_v63  ;;  %v8849_v52 = vld [vmem:[#allocation55_spill] sm:$0xff]  ;;  %v8856_v63 = vld [vmem:[#allocation64_spill] sm:$0xff] }
  0x8b   :  { %660 = vmatpush1.msra.mxu0 %v8836_v49  ;;  %635 = vmatpush2.msra.mxu1 %v8843_v46  ;;  %v8851_v49 = vld [vmem:[#allocation57_spill] sm:$0xff]  ;;  %v8858_v46 = vld [vmem:[#allocation66_spill] sm:$0xff] }
  0x8c   :  { %661 = vmatprep.subr.mxu0 %v8838_v58  ;;  %636 = vmatprep.subr.mxu1 %v8845_v18  ;;  %v8853_v58 = vld [vmem:[#allocation60_spill] sm:$0xff] }
  0x8d   :  { %662 = vmatpush1.msra.mxu0 %v8840_v61  ;;  %637 = vmatpush2.msra.mxu1 %v8847_v54  ;;  %v8855_v61 = vld [vmem:[#allocation20_spill] sm:$0xff]  ;;  %v8862_v54 = vld [vmem:[#allocation25_spill] sm:$0xff] }
  0x8e   :  { %663 = vmatprep.subr.mxu0 %v8842_v42  ;;  %638 = vmatprep.subr.mxu1 %v8849_v52  ;;  %v8857_v42 = vld [vmem:[#allocation21_spill] sm:$0xff]  ;;  %v8860_v18 = vld [vmem:[#allocation68_spill] sm:$0xff]  ;;  %v8864_v52 = vld [vmem:[#allocation27_spill] sm:$0xff] }
  0x8f   :  { %664 = vmatpush1.msra.mxu0 %v8844_v37  ;;  %639 = vmatpush2.msra.mxu1 %v8851_v49  ;;  %v8859_v37 = vld [vmem:[#allocation22_spill] sm:$0xff]  ;;  %v8866_v49 = vld [vmem:[#allocation29_spill] sm:$0xff] }
  0x90   :  { %665 = vmatprep.subr.mxu0 %v8846_v19  ;;  %640 = vmatprep.subr.mxu1 %v8853_v58  ;;  %v8861_v19 = vld [vmem:[#allocation24_spill] sm:$0xff] }
  0x91   :  { %666 = vmatpush1.msra.mxu0 %v8848_v21  ;;  %641 = vmatpush2.msra.mxu1 %v3934_v32  ;;  %v8863_v21 = vld [vmem:[#allocation26_spill] sm:$0xff] }
  0x92   :  { %667 = vmatprep.subr.mxu0 %v8850_v23  ;;  %642 = vmatprep.subr.mxu1 %v8856_v63  ;;  %v8865_v23 = vld [vmem:[#allocation28_spill] sm:$0xff] }
  0x93   :  { %668 = vmatpush1.msra.mxu0 %v8852_v24  ;;  %643 = vmatpush2.msra.mxu1 %v8858_v46  ;;  %v8867_v24 = vld [vmem:[#allocation30_spill] sm:$0xff] }
  0x94   :  { %669 = vmatprep.subr.mxu0 %v8854_v59  ;;  %722 = vmatprep.subr.mxu1 %v8860_v18  ;;  %v8868_v59 = vld [vmem:[#allocation31_spill] sm:$0xff] }
  0x95   :  { %670 = vmatpush1.msra.mxu0 %v8855_v61  ;;  %v8869_v61 = vld [vmem:[#allocation32_spill] sm:$0xff] }
  0x96   :  { %671 = vmatprep.subr.mxu0 %v8857_v42  ;;  %v8870_v42 = vld [vmem:[#allocation34_spill] sm:$0xff] }
  0x97   :  { %672 = vmatpush1.msra.mxu0 %v8859_v37  ;;  %v8871_v37 = vld [vmem:[#allocation36_spill] sm:$0xff] }
  0x98   :  { %673 = vmatprep.subr.mxu0 %v8861_v19  ;;  %v8872_v19 = vld [vmem:[#allocation38_spill] sm:$0xff] }
  0x99   :  { %674 = vmatpush1.msra.mxu0 %v8862_v54  ;;  %v8873_v54 = vld [vmem:[#allocation40_spill] sm:$0xff] }
  0x9a   :  { %675 = vmatprep.subr.mxu0 %v8863_v21  ;;  %v8874_v21 = vld [vmem:[#allocation42_spill] sm:$0xff] }
  0x9b   :  { %676 = vmatpush1.msra.mxu0 %v8864_v52  ;;  %v8875_v52 = vld [vmem:[#allocation44_spill] sm:$0xff] }
  0x9c   :  { %677 = vmatprep.subr.mxu0 %v8865_v23  ;;  %v8876_v23 = vld [vmem:[#allocation46_spill] sm:$0xff] }
  0x9d   :  { %678 = vmatpush1.msra.mxu0 %v8866_v49  ;;  %v8877_v49 = vld [vmem:[#allocation48_spill] sm:$0xff] }
  0x9e   :  { %679 = vmatprep.subr.mxu0 %v8867_v24  ;;  %v8878_v24 = vld [vmem:[#allocation50_spill] sm:$0xff] }
  0x9f   :  { %680 = vmatpush1.msra.mxu0 %v8868_v59  ;;  %v8879_v59 = vld [vmem:[#allocation52_spill] sm:$0xff] }
  0xa0   :  { %681 = vmatprep.subr.mxu0 %v8869_v61  ;;  %v8880_v61 = vld [vmem:[#allocation54_spill] sm:$0xff] }
  0xa1   :  { %682 = vmatpush1.msra.mxu0 %v8870_v42  ;;  %v8881_v42 = vld [vmem:[#allocation56_spill] sm:$0xff] }
  0xa2   :  { %683 = vmatprep.subr.mxu0 %v8871_v37  ;;  %v8882_v37 = vld [vmem:[#allocation59_spill] sm:$0xff] }
  0xa3   :  { %684 = vmatpush2.msra.mxu0 %v8872_v19  ;;  %v8883_v19 = vld [vmem:[#allocation61_spill] sm:$0xff] }
  0xa4   :  { %685 = vmatprep.subr.mxu0 %v8873_v54  ;;  %v8884_v54 = vld [vmem:[#allocation63_spill] sm:$0xff] }
  0xa5   :  { %686 = vmatpush2.msra.mxu0 %v8874_v21  ;;  %v8885_v21 = vld [vmem:[#allocation65_spill] sm:$0xff] }
  0xa6   :  { %687 = vmatprep.subr.mxu0 %v8875_v52  ;;  %v8886_v52 = vld [vmem:[#allocation67_spill] sm:$0xff] }
  0xa7   :  { %688 = vmatpush2.msra.mxu0 %v8876_v23  ;;  %v8887_v23 = vld [vmem:[#allocation70_spill] sm:$0xff] }
  0xa8   :  { %689 = vmatprep.subr.mxu0 %v8877_v49  ;;  %v8888_v49 = vld [vmem:[#allocation72_spill] sm:$0xff] }
  0xa9   :  { %690 = vmatpush2.msra.mxu0 %v8878_v24  ;;  %v8889_v24 = vld [vmem:[#allocation74_spill] sm:$0xff] }
  0xaa   :  { %691 = vmatprep.subr.mxu0 %v8879_v59  ;;  %v8890_v59 = vld [vmem:[#allocation76_spill] sm:$0xff] }
  0xab   :  { %692 = vmatpush2.msra.mxu0 %v8880_v61  ;;  %v8891_v61 = vld [vmem:[#allocation78_spill] sm:$0xff] }
  0xac   :  { %693 = vmatprep.subr.mxu0 %v8881_v42  ;;  %v8892_v42 = vld [vmem:[#allocation80_spill] sm:$0xff] }
  0xad   :  { %694 = vmatpush2.msra.mxu0 %v8882_v37  ;;  %v8893_v37 = vld [vmem:[#allocation82_spill] sm:$0xff] }
  0xae   :  { %695 = vmatprep.subr.mxu0 %v8883_v19  ;;  %v8894_v19 = vld [vmem:[#allocation84_spill] sm:$0xff] }
  0xaf   :  { %696 = vmatpush2.msra.mxu0 %v8884_v54  ;;  %v8895_v54 = vld [vmem:[#allocation86_spill] sm:$0xff] }
  0xb0   :  { %697 = vmatprep.subr.mxu0 %v8885_v21  ;;  %v8896_v21 = vld [vmem:[#allocation88_spill] sm:$0xff] }
  0xb1   :  { %698 = vmatpush2.msra.mxu0 %v8886_v52  ;;  %v8897_v52 = vld [vmem:[#allocation90_spill] sm:$0xff] }
  0xb2   :  { %699 = vmatprep.subr.mxu0 %v8887_v23  ;;  %v8898_v23 = vld [vmem:[#allocation92_spill] sm:$0xff] }
  0xb3   :  { %700 = vmatpush2.msra.mxu0 %v8888_v49  ;;  %v4593_v49 = vld [vmem:[%s8029_s2 + $0x2d8] sm:$0xff] }
  0xb4   :  { %701 = vmatprep.subr.mxu0 %v8889_v24  ;;  %8899 = vst [vmem:[#allocation33_spill] sm:$0xff] %v4593_v49  ;;  %v219_v24 = vld [vmem:[%s8031_s3] sm:$0x3f] }
  0xb5   :  { %702 = vmatpush2.msra.mxu0 %v8890_v59  ;;  %v221_v33 = vld [vmem:[%s8032_s0] ss:$8 sm:$0xf] }
  0xb6   :  { %703 = vmatprep.subr.mxu0 %v8891_v61  ;;  %v3250_v61 = vmov 1966171168  }
  0xb7   :  { %704 = vmatpush2.msra.mxu0 %v8892_v42  ;;  %v483_v42 = vunpack.c.l.s4 %v3250_v61 }
  0xb8   :  { %705 = vmatprep.subr.mxu0 %v8893_v37  ;;  %v8900_v37 = vld [vmem:[#allocation58_spill] sm:$0xff] }
  0xb9   :  { %706 = vmatpush2.msra.mxu0 %v8894_v19  ;;  %v4600_v19 = vrot.slane %v219_v24, %v8900_v37 }
  0xba   :  { %707 = vmatprep.subr.mxu0 %v8895_v54  ;;  %v8902_v54 = vld [vmem:[#allocation19_spill] sm:$0xff] }
  0xbb   :  { %708 = vmatpush2.msra.mxu0 %v8896_v21  ;;  %8901 = vst [vmem:[#allocation3_spill] sm:$0xff] %v4600_v19  ;;  %v4603_v21 = vrot.slane %v219_v24, %v8902_v54 }
  0xbc   :  { %709 = vmatprep.subr.mxu0 %v8897_v52 }
  0xbd   :  { %710 = vmatpush2.msra.mxu0 %v8898_v23  ;;  %8903 = vst [vmem:[#allocation35_spill] sm:$0xff] %v4603_v21  ;;  %v484_v23 = vunpack.c.0.s8 %v483_v42 }
  0xbe   :  { %711 = vmatprep.subr.mxu0 %v4131_v44 }
  0xbf   :  { %712 = vmatpush2.msra.mxu0 %v4143_v47 }
  0xc0   :  { %713 = vmatprep.subr.mxu0 %v4155_v41 }
  0xc1   :  { %714 = vmatpush2.msra.mxu0 %v4167_v39 }
  0xc2   :  { %891 = vmatprep.subr.mxu0 %v4593_v49  ;;  %v8904_v49 = vld [vmem:[#allocation15_spill] sm:$0xff] }
  0xc3   :  { %v4608_v47 = vsub.s32 %v484_v23, %v8904_v49  ;;  %v246_v18 = vsub.s32 2, %v8904_v49  ;;  %v250_v61 = vsub.s32 3, %v8904_v49 }
  0xc5   :  { %v4619_v42 = vrot.slane %v219_v24, %v246_v18 }
 0x102   :  { %v332_v59 = vpop.f32.mrf.mxu0 }
 0x103   :  { %v333_v39 = vadd.f32 %v332_v59, %v4600_v19  ;;  %v222_v59 = vld [vmem:[%s8032_s0] ss:$8 sm:$0x30] }
 0x104   :  { %v334_v52 = vpop.f32.mrf.mxu0 }
 0x105   :  { %v335_v41 = vadd.f32 %v334_v52, %v4603_v21  ;;  %v4621_v52 = vrot.slane %v219_v24, %v250_v61 }
 0x107   :  { %v481_v44 = vcombine.low %v333_v39, %v335_v41  ;;  %v223_v41 = vor.u32 %v222_v59, %v221_v33 }
 0x109   :  { %v488_v63 = vrot.slane %v481_v44, %v4608_v47  ;;  %v505_v60 = vrot.slane %v223_v41, 2 }
 0x10b   :  { %v495_v23 = vrot.slane %v488_v63, %v4608_v47  ;;  %v254_v63 = vsub.s32 4, %v8904_v49 }
 0x10d   :  { %v497_v21 = vadd.f32 %v495_v23, %v223_v41  ;;  %v4630_v59 = vrot.slane %v219_v24, %v254_v63 }
 0x10f   :  { %v2747_v62 = vmul.f32 -1.442695, %v497_v21  ;;  %8905 = vst [vmem:[#allocation4_spill] sm:$0xff] %v4630_v59 }
 0x111   :  { %v403_v46 = vpop.f32.mrf.mxu1  ;;  %2785 = vpow2.f32 %v2747_v62 }
 0x112   :  { %v404_v19 = vadd.f32 %v403_v46, %v4619_v42  ;;  %v258_v46 = vsub.s32 5, %v8904_v49 }
 0x113   :  { %v405_v39 = vpop.f32.mrf.mxu1 }
 0x114   :  { %v406_v44 = vadd.f32 %v405_v39, %v4621_v52 }
 0x116   :  { %v509_v32 = vcombine.low %v404_v19, %v406_v44  ;;  %v4632_v19 = vrot.slane %v219_v24, %v258_v46  ;;  %v551_v44 = vrot.slane %v223_v41, 4 }
 0x118   :  { %v516_v58 = vrot.slane %v509_v32, %v4608_v47 }
 0x11a   :  { %v523_v18 = vrot.slane %v516_v58, %v4608_v47 }
 0x11c   :  { %v525_v57 = vadd.f32 %v523_v18, %v505_v60 }
 0x11e   :  { %v2748_v61 = vmul.f32 -1.442695, %v525_v57  ;;  %v2786_v55 = vpop.eup %2785 }
 0x11f   :  { %v501_v33 = vadd.f32 1.0, %v2786_v55 }
 0x120   :  { %2787 = vpow2.f32 %v2748_v61 }
 0x121   :  { %2789 = vrcp.f32 %v501_v33 }
 0x12d   :  { %v2788_v60 = vpop.eup %2787 }
 0x12e   :  { %v529_v39 = vadd.f32 1.0, %v2788_v60  ;;  %v2790_v49 = vpop.eup %2789  ;;  %v8909_v60 = vld [vmem:[#allocation71_spill] sm:$0xff] }
 0x130   :  { %2791 = vrcp.f32 %v529_v39  ;;  %v8910_v39 = vld [vmem:[#allocation73_spill] sm:$0xff] }
 0x13d   :  { %v2792_v24 = vpop.eup %2791 }
 0x13e   :  { %v555_v33 = vsub.f32 1.0, %v2792_v24 }
 0x142   :  { %v474_v21 = vpop.f32.mrf.mxu0 }
 0x143   :  { %v475_v62 = vadd.f32 %v474_v21, %v4630_v59  ;;  %v8906_v21 = vld [vmem:[#allocation23_spill] sm:$0xff] }
 0x144   :  { %v476_v32 = vpop.f32.mrf.mxu0  ;;  %v557_v59 = vmul.f32 %v2792_v24, %v8906_v21  ;;  %v4688_v24 = vld [vmem:[%s8029_s2 + $0x270] sm:$0xff]  ;;  %v4702_v21 = vld [vmem:[%s8029_s2 + $0x240] sm:$0xff] }
 0x145   :  { %v477_v58 = vadd.f32 %v476_v32, %v4632_v19 }
 0x147   :  { %v534_v57 = vcombine.low %v475_v62, %v477_v58 }
 0x149   :  { %v541_v55 = vrot.slane %v534_v57, %v4608_v47  ;;  %v4660_v57 = vld [vmem:[%s8029_s2 + $0x2d0] sm:$0xff] }
 0x14b   :  { %v548_v23 = vrot.slane %v541_v55, %v4608_v47  ;;  %v4667_v55 = vld [vmem:[%s8029_s2 + $0x2a8] sm:$0xff] }
 0x14d   :  { %v550_v18 = vmul.f32 %v2790_v49, %v548_v23  ;;  %v8911_v23 = vld [vmem:[#allocation75_spill] sm:$0xff]  ;;  %v8912_v49 = vld [vmem:[#allocation77_spill] sm:$0xff] }
 0x14f   :  { %v553_v61 = vadd.f32 %v551_v44, %v550_v18  ;;  %v4674_v44 = vld [vmem:[%s8029_s2 + $0x2a0] sm:$0xff]  ;;  %v4681_v18 = vld [vmem:[%s8029_s2 + $0x278] sm:$0xff] }
 0x151   :  { %2793 = vtanh.f32 %v553_v61  ;;  %v8913_v61 = vld [vmem:[#allocation79_spill] sm:$0xff] }
 0x15e   :  { %v2794_v63 = vpop.eup %2793 }
 0x15f   :  { %v556_v46 = vmul.f32 %v2794_v63, %v555_v33  ;;  %v8914_v33 = vld [vmem:[#allocation81_spill] sm:$0xff]  ;;  %v4695_v63 = vld [vmem:[%s8029_s2 + $0x248] sm:$0xff] }
 0x161   :  { %v4639_v32 = vadd.f32 %v557_v59, %v556_v46  ;;  %v8908_v59 = vld [vmem:[#allocation69_spill] sm:$0xff]  ;;  %v8915_v46 = vld [vmem:[#allocation83_spill] sm:$0xff] }
 0x163   :  { %563 = vst.msk [vmem:[%s8033_s4] ss:$8 sm:$0x3] %vm3516_vm0, %v4639_v32  ;;  %v577_v41 = vrot.slane %v4639_v32, %v8902_v54  ;;  %v4651_v58 = vrot.slane %v4639_v32, %v8900_v37 }
 0x165   :  { %644 = vmatprep.mubr.f32.mxu1 %v577_v41  ;;  %715 = vmatprep.mubr.f32.mxu0 %v577_v41 }
 0x166   :  { %645 = vmatmul.mubr.f32.vlgmr.msra.gmra.mxu1 %v4651_v58  ;;  %716 = vmatmul.mubr.f32.vlgmr.msra.gmra.mxu0 %v4651_v58 }
 0x167   :  { %723 = vmatpush1.msra.mxu1 %v8908_v59  ;;  %786 = vmatprep.mubr.f32.mxu1 %v577_v41  ;;  %v8916_v41 = vld [vmem:[#allocation85_spill] sm:$0xff] }
 0x168   :  { %724 = vmatprep.subr.mxu1 %v8909_v60  ;;  %892 = vmatpush1.msra.mxu0 %v4660_v57  ;;  %v4709_v59 = vld [vmem:[%s8029_s2 + $0x218] sm:$0xff]  ;;  %v8917_v60 = vld [vmem:[#allocation87_spill] sm:$0xff] }
 0x169   :  { %725 = vmatpush1.msra.mxu1 %v8910_v39  ;;  %893 = vmatprep.subr.mxu0 %v4667_v55  ;;  %v4716_v39 = vld [vmem:[%s8029_s2 + $0x210] sm:$0xff] }
 0x16a   :  { %726 = vmatprep.subr.mxu1 %v8911_v23  ;;  %894 = vmatpush1.msra.mxu0 %v4674_v44  ;;  %v8918_v23 = vld [vmem:[#allocation89_spill] sm:$0xff] }
 0x16b   :  { %727 = vmatpush1.msra.mxu1 %v8912_v49  ;;  %895 = vmatprep.subr.mxu0 %v4681_v18  ;;  %v4723_v49 = vld [vmem:[%s8029_s2 + $0x1e8] sm:$0xff] }
 0x16c   :  { %728 = vmatprep.subr.mxu1 %v8913_v61  ;;  %896 = vmatpush1.msra.mxu0 %v4688_v24  ;;  %v8919_v61 = vld [vmem:[#allocation91_spill] sm:$0xff] }
 0x16d   :  { %729 = vmatpush1.msra.mxu1 %v8914_v33  ;;  %897 = vmatprep.subr.mxu0 %v4695_v63  ;;  %v4730_v33 = vld [vmem:[%s8029_s2 + $0x1e0] sm:$0xff] }
 0x16e   :  { %730 = vmatprep.subr.mxu1 %v8915_v46  ;;  %898 = vmatpush1.msra.mxu0 %v4702_v21  ;;  %8920 = vst [vmem:[#allocation37_spill] sm:$0xff] %v4730_v33  ;;  %v8921_v46 = vld [vmem:[#allocation93_spill] sm:$0xff] }
 0x16f   :  { %731 = vmatpush1.msra.mxu1 %v8916_v41  ;;  %899 = vmatprep.subr.mxu0 %v4709_v59  ;;  %v4737_v41 = vld [vmem:[%s8029_s2 + $0x1b8] sm:$0xff] }
 0x170   :  { %732 = vmatprep.subr.mxu1 %v8917_v60  ;;  %900 = vmatpush1.msra.mxu0 %v4716_v39  ;;  %8922 = vst [vmem:[#allocation5_spill] sm:$0xff] %v4737_v41  ;;  %v8923_v60 = vld [vmem:[#allocation95_spill] sm:$0xff] }
 0x171   :  { %733 = vmatpush1.msra.mxu1 %v8918_v23  ;;  %901 = vmatprep.subr.mxu0 %v4723_v49  ;;  %v4744_v23 = vld [vmem:[%s8029_s2 + $0x1b0] sm:$0xff] }
 0x172   :  { %734 = vmatprep.subr.mxu1 %v8919_v61  ;;  %902 = vmatpush1.msra.mxu0 %v4730_v33  ;;  %8924 = vst [vmem:[#allocation39_spill] sm:$0xff] %v4744_v23  ;;  %v8925_v61 = vld [vmem:[#allocation97_spill] sm:$0xff]  ;;  %v8927_v33 = vld [vmem:[#allocation99_spill] sm:$0xff] }
 0x173   :  { %735 = vmatpush1.msra.mxu1 %v8921_v46  ;;  %903 = vmatprep.subr.mxu0 %v4737_v41  ;;  %v4751_v46 = vld [vmem:[%s8029_s2 + $0x188] sm:$0xff]  ;;  %v8929_v41 = vld [vmem:[#allocation101_spill] sm:$0xff] }
 0x174   :  { %736 = vmatprep.subr.mxu1 %v8923_v60  ;;  %904 = vmatpush1.msra.mxu0 %v4744_v23  ;;  %8926 = vst [vmem:[#allocation6_spill] sm:$0xff] %v4751_v46  ;;  %v4758_v60 = vld [vmem:[%s8029_s2 + $0x180] sm:$0xff] }
 0x175   :  { %737 = vmatpush1.msra.mxu1 %v8925_v61  ;;  %905 = vmatprep.subr.mxu0 %v4751_v46  ;;  %8928 = vst [vmem:[#allocation41_spill] sm:$0xff] %v4758_v60  ;;  %v4765_v61 = vld [vmem:[%s8029_s2 + $0x158] sm:$0xff]  ;;  %v8933_v46 = vld [vmem:[#allocation103_spill] sm:$0xff] }
 0x176   :  { %738 = vmatprep.subr.mxu1 %v8927_v33  ;;  %906 = vmatpush1.msra.mxu0 %v4758_v60  ;;  %8930 = vst [vmem:[#allocation7_spill] sm:$0xff] %v4765_v61  ;;  %v8931_v23 = vld [vmem:[#allocation102_spill] sm:$0xff]  ;;  %v4772_v33 = vld [vmem:[%s8029_s2 + $0x150] sm:$0xff] }
 0x177   :  { %739 = vmatpush1.msra.mxu1 %v8929_v41  ;;  %907 = vmatprep.subr.mxu0 %v4765_v61  ;;  %8932 = vst [vmem:[#allocation43_spill] sm:$0xff] %v4772_v33  ;;  %v4779_v41 = vld [vmem:[%s8029_s2 + $0x128] sm:$0xff] }
 0x178   :  { %740 = vmatprep.subr.mxu1 %v8931_v23  ;;  %908 = vmatpush1.msra.mxu0 %v4772_v33  ;;  %8934 = vst [vmem:[#allocation8_spill] sm:$0xff] %v4779_v41  ;;  %v4786_v23 = vld [vmem:[%s8029_s2 + $0x120] sm:$0xff] }
 0x179   :  { %741 = vmatpush1.msra.mxu1 %v8933_v46  ;;  %909 = vmatprep.subr.mxu0 %v4779_v41  ;;  %8935 = vst [vmem:[#allocation45_spill] sm:$0xff] %v4786_v23  ;;  %v4793_v46 = vld [vmem:[%s8029_s2 + $0xf8] sm:$0xff] }
 0x17a   :  { %742 = vmatprep.subr.mxu1 %v4194_v26  ;;  %910 = vmatpush1.msra.mxu0 %v4786_v23  ;;  %8936 = vst [vmem:[#allocation9_spill] sm:$0xff] %v4793_v46  ;;  %v4800_v26 = vld [vmem:[%s8029_s2 + $0xf0] sm:$0xff] }
 0x17b   :  { %743 = vmatpush1.msra.mxu1 %v4201_v50  ;;  %911 = vmatprep.subr.mxu0 %v4793_v46  ;;  %8937 = vst [vmem:[#allocation47_spill] sm:$0xff] %v4800_v26  ;;  %v4807_v50 = vld [vmem:[%s8029_s2 + $0xc8] sm:$0xff] }
 0x17c   :  { %744 = vmatprep.subr.mxu1 %v4208_v28  ;;  %912 = vmatpush1.msra.mxu0 %v4800_v26  ;;  %8938 = vst [vmem:[#allocation10_spill] sm:$0xff] %v4807_v50  ;;  %v4814_v28 = vld [vmem:[%s8029_s2 + $0xc0] sm:$0xff] }
 0x17d   :  { %745 = vmatpush1.msra.mxu1 %v4215_v35  ;;  %913 = vmatprep.subr.mxu0 %v4807_v50  ;;  %8939 = vst [vmem:[#allocation49_spill] sm:$0xff] %v4814_v28  ;;  %v4821_v35 = vld [vmem:[%s8029_s2 + $0x98] sm:$0xff] }
 0x17e   :  { %746 = vmatprep.subr.mxu1 %v4222_v30  ;;  %914 = vmatpush1.msra.mxu0 %v4814_v28  ;;  %8940 = vst [vmem:[#allocation12_spill] sm:$0xff] %v4821_v35  ;;  %v4828_v30 = vld [vmem:[%s8029_s2 + $0x90] sm:$0xff] }
 0x17f   :  { %747 = vmatpush1.msra.mxu1 %v4229_v56  ;;  %915 = vmatprep.subr.mxu0 %v4821_v35  ;;  %8941 = vst [vmem:[#allocation51_spill] sm:$0xff] %v4828_v30  ;;  %v4835_v56 = vld [vmem:[%s8029_s2 + $0x68] sm:$0xff] }
 0x180   :  { %748 = vmatprep.subr.mxu1 %v4236_v0  ;;  %916 = vmatpush1.msra.mxu0 %v4828_v30  ;;  %8942 = vst [vmem:[#allocation13_spill] sm:$0xff] %v4835_v56  ;;  %v4842_v0 = vld [vmem:[%s8029_s2 + $0x60] sm:$0xff] }
 0x181   :  { %749 = vmatpush1.msra.mxu1 %v4243_v1  ;;  %917 = vmatprep.subr.mxu0 %v4835_v56  ;;  %8943 = vst [vmem:[#allocation53_spill] sm:$0xff] %v4842_v0  ;;  %v4849_v1 = vld [vmem:[%s8029_s2 + $0x38] sm:$0xff] }
 0x182   :  { %750 = vmatprep.subr.mxu1 %v4250_v2  ;;  %918 = vmatpush1.msra.mxu0 %v4842_v0  ;;  %8944 = vst [vmem:[#allocation14_spill] sm:$0xff] %v4849_v1  ;;  %v4856_v2 = vld [vmem:[%s8029_s2 + $0x30] sm:$0xff] }
 0x183   :  { %751 = vmatpush1.msra.mxu1 %v4257_v3  ;;  %919 = vmatprep.subr.mxu0 %v4849_v1  ;;  %8945 = vst [vmem:[#allocation55_spill] sm:$0xff] %v4856_v2  ;;  %v4863_v3 = vld [vmem:[%s8029_s2 + $0x8] sm:$0xff] }
 0x184   :  { %752 = vmatprep.subr.mxu1 %v4264_v4  ;;  %920 = vmatpush1.msra.mxu0 %v4856_v2  ;;  %8946 = vst [vmem:[#allocation16_spill] sm:$0xff] %v4863_v3  ;;  %v4870_v4 = vld [vmem:[%s8029_s2] sm:$0xff] }
 0x185   :  { %753 = vmatpush1.msra.mxu1 %v4271_v5  ;;  %921 = vmatprep.subr.mxu0 %v4863_v3  ;;  %8947 = vst [vmem:[#allocation57_spill] sm:$0xff] %v4870_v4  ;;  %v4877_v5 = vld [vmem:[%s8029_s2 + $0x5d8] sm:$0xff] }
 0x186   :  { %754 = vmatprep.subr.mxu1 %v4278_v6  ;;  %922 = vmatpush1.msra.mxu0 %v4870_v4  ;;  %8948 = vst [vmem:[#allocation17_spill] sm:$0xff] %v4877_v5  ;;  %v4884_v6 = vld [vmem:[%s8029_s2 + $0x5d0] sm:$0xff] }
 0x187   :  { %755 = vmatpush2.msra.mxu1 %v4285_v7  ;;  %923 = vmatprep.subr.mxu0 %v4877_v5  ;;  %8949 = vst [vmem:[#allocation18_spill] sm:$0xff] %v4884_v6  ;;  %v4891_v7 = vld [vmem:[%s8029_s2 + $0x5a8] sm:$0xff] }
 0x188   :  { %756 = vmatprep.subr.mxu1 %v4292_v8  ;;  %924 = vmatpush2.msra.mxu0 %v4884_v6  ;;  %8950 = vst [vmem:[#allocation20_spill] sm:$0xff] %v4891_v7  ;;  %v4898_v8 = vld [vmem:[%s8029_s2 + $0x5a0] sm:$0xff] }
 0x189   :  { %757 = vmatpush2.msra.mxu1 %v4299_v9  ;;  %925 = vmatprep.subr.mxu0 %v4891_v7  ;;  %8951 = vst [vmem:[#allocation21_spill] sm:$0xff] %v4898_v8  ;;  %v4905_v9 = vld [vmem:[%s8029_s2 + $0x578] sm:$0xff] }
 0x18a   :  { %758 = vmatprep.subr.mxu1 %v4306_v10  ;;  %926 = vmatpush2.msra.mxu0 %v4898_v8  ;;  %8952 = vst [vmem:[#allocation22_spill] sm:$0xff] %v4905_v9  ;;  %v4912_v10 = vld [vmem:[%s8029_s2 + $0x570] sm:$0xff] }
 0x18b   :  { %759 = vmatpush2.msra.mxu1 %v4313_v11  ;;  %927 = vmatprep.subr.mxu0 %v4905_v9  ;;  %8953 = vst [vmem:[#allocation24_spill] sm:$0xff] %v4912_v10  ;;  %v4919_v11 = vld [vmem:[%s8029_s2 + $0x548] sm:$0xff] }
 0x18c   :  { %760 = vmatprep.subr.mxu1 %v4320_v12  ;;  %928 = vmatpush2.msra.mxu0 %v4912_v10  ;;  %8954 = vst [vmem:[#allocation25_spill] sm:$0xff] %v4919_v11  ;;  %v4926_v12 = vld [vmem:[%s8029_s2 + $0x540] sm:$0xff] }
 0x18d   :  { %761 = vmatpush2.msra.mxu1 %v4327_v13  ;;  %929 = vmatprep.subr.mxu0 %v4919_v11  ;;  %8955 = vst [vmem:[#allocation26_spill] sm:$0xff] %v4926_v12  ;;  %v4933_v13 = vld [vmem:[%s8029_s2 + $0x518] sm:$0xff] }
 0x18e   :  { %762 = vmatprep.subr.mxu1 %v4334_v14  ;;  %930 = vmatpush2.msra.mxu0 %v4926_v12  ;;  %8956 = vst [vmem:[#allocation27_spill] sm:$0xff] %v4933_v13  ;;  %v4940_v14 = vld [vmem:[%s8029_s2 + $0x510] sm:$0xff] }
 0x18f   :  { %763 = vmatpush2.msra.mxu1 %v4341_v15  ;;  %931 = vmatprep.subr.mxu0 %v4933_v13  ;;  %8957 = vst [vmem:[#allocation28_spill] sm:$0xff] %v4940_v14  ;;  %v4947_v15 = vld [vmem:[%s8029_s2 + $0x4e8] sm:$0xff] }
 0x190   :  { %764 = vmatprep.subr.mxu1 %v4348_v16  ;;  %932 = vmatpush2.msra.mxu0 %v4940_v14  ;;  %8958 = vst [vmem:[#allocation29_spill] sm:$0xff] %v4947_v15  ;;  %v4954_v16 = vld [vmem:[%s8029_s2 + $0x4e0] sm:$0xff] }
 0x191   :  { %765 = vmatpush2.msra.mxu1 %v4355_v17  ;;  %933 = vmatprep.subr.mxu0 %v4947_v15  ;;  %8959 = vst [vmem:[#allocation30_spill] sm:$0xff] %v4954_v16  ;;  %v4961_v17 = vld [vmem:[%s8029_s2 + $0x4b8] sm:$0xff] }
 0x192   :  { %766 = vmatprep.subr.mxu1 %v4362_v20  ;;  %934 = vmatpush2.msra.mxu0 %v4954_v16  ;;  %8960 = vst [vmem:[#allocation31_spill] sm:$0xff] %v4961_v17  ;;  %v4968_v20 = vld [vmem:[%s8029_s2 + $0x4b0] sm:$0xff] }
 0x193   :  { %767 = vmatpush2.msra.mxu1 %v4369_v22  ;;  %935 = vmatprep.subr.mxu0 %v4961_v17  ;;  %8961 = vst [vmem:[#allocation32_spill] sm:$0xff] %v4968_v20  ;;  %v4975_v22 = vld [vmem:[%s8029_s2 + $0x488] sm:$0xff] }
 0x194   :  { %768 = vmatprep.subr.mxu1 %v4376_v25  ;;  %936 = vmatpush2.msra.mxu0 %v4968_v20  ;;  %8962 = vst [vmem:[#allocation34_spill] sm:$0xff] %v4975_v22  ;;  %v4982_v25 = vld [vmem:[%s8029_s2 + $0x480] sm:$0xff] }
 0x195   :  { %769 = vmatpush2.msra.mxu1 %v4383_v27  ;;  %937 = vmatprep.subr.mxu0 %v4975_v22  ;;  %8963 = vst [vmem:[#allocation36_spill] sm:$0xff] %v4982_v25  ;;  %v4989_v27 = vld [vmem:[%s8029_s2 + $0x458] sm:$0xff] }
 0x196   :  { %770 = vmatprep.subr.mxu1 %v4390_v29  ;;  %938 = vmatpush2.msra.mxu0 %v4982_v25  ;;  %8964 = vst [vmem:[#allocation38_spill] sm:$0xff] %v4989_v27  ;;  %v4996_v29 = vld [vmem:[%s8029_s2 + $0x450] sm:$0xff] }
 0x197   :  { %771 = vmatpush2.msra.mxu1 %v4397_v31  ;;  %939 = vmatprep.subr.mxu0 %v4989_v27  ;;  %8965 = vst [vmem:[#allocation40_spill] sm:$0xff] %v4996_v29  ;;  %v5003_v31 = vld [vmem:[%s8029_s2 + $0x428] sm:$0xff] }
 0x198   :  { %772 = vmatprep.subr.mxu1 %v4404_v34  ;;  %940 = vmatpush2.msra.mxu0 %v4996_v29  ;;  %8966 = vst [vmem:[#allocation42_spill] sm:$0xff] %v5003_v31  ;;  %v5010_v34 = vld [vmem:[%s8029_s2 + $0x420] sm:$0xff] }
 0x199   :  { %773 = vmatpush2.msra.mxu1 %v4411_v36  ;;  %941 = vmatprep.subr.mxu0 %v5003_v31  ;;  %8967 = vst [vmem:[#allocation44_spill] sm:$0xff] %v5010_v34  ;;  %v5017_v36 = vld [vmem:[%s8029_s2 + $0x3f8] sm:$0xff]  ;;  %v9052_v31 = vld [vmem:[#allocation3_spill] sm:$0xff] }
 0x19a   :  { %774 = vmatprep.subr.mxu1 %v4418_v38  ;;  %942 = vmatpush2.msra.mxu0 %v5010_v34  ;;  %8968 = vst [vmem:[#allocation46_spill] sm:$0xff] %v5017_v36  ;;  %v5024_v38 = vld [vmem:[%s8029_s2 + $0x3f0] sm:$0xff] }
 0x19b   :  { %775 = vmatpush2.msra.mxu1 %v4425_v40  ;;  %943 = vmatprep.subr.mxu0 %v5017_v36  ;;  %8969 = vst [vmem:[#allocation48_spill] sm:$0xff] %v5024_v38  ;;  %v5031_v40 = vld [vmem:[%s8029_s2 + $0x3c8] sm:$0xff] }
 0x19c   :  { %776 = vmatprep.subr.mxu1 %v4432_v43  ;;  %944 = vmatpush2.msra.mxu0 %v5024_v38  ;;  %8970 = vst [vmem:[#allocation50_spill] sm:$0xff] %v5031_v40  ;;  %v5038_v43 = vld [vmem:[%s8029_s2 + $0x3c0] sm:$0xff]  ;;  %v8982_v36 = vld [vmem:[#allocation108_spill] sm:$0xff] }
 0x19d   :  { %777 = vmatpush2.msra.mxu1 %v4439_v45  ;;  %945 = vmatprep.subr.mxu0 %v5031_v40  ;;  %8971 = vst [vmem:[#allocation52_spill] sm:$0xff] %v5038_v43  ;;  %v5045_v45 = vld [vmem:[%s8029_s2 + $0x398] sm:$0xff]  ;;  %v8974_v40 = vld [vmem:[#allocation104_spill] sm:$0xff] }
 0x19e   :  { %778 = vmatprep.subr.mxu1 %v4446_v48  ;;  %946 = vmatpush2.msra.mxu0 %v5038_v43  ;;  %8972 = vst [vmem:[#allocation54_spill] sm:$0xff] %v5045_v45  ;;  %v5052_v48 = vld [vmem:[%s8029_s2 + $0x390] sm:$0xff]  ;;  %v8981_v38 = vld [vmem:[#allocation62_spill] sm:$0xff] }
 0x19f   :  { %779 = vmatpush2.msra.mxu1 %v4453_v51  ;;  %947 = vmatprep.subr.mxu0 %v5045_v45  ;;  %8973 = vst [vmem:[#allocation56_spill] sm:$0xff] %v5052_v48  ;;  %v5059_v51 = vld [vmem:[%s8029_s2 + $0x368] sm:$0xff]  ;;  %v8976_v43 = vld [vmem:[#allocation105_spill] sm:$0xff]  ;;  %v8978_v45 = vld [vmem:[#allocation106_spill] sm:$0xff] }
 0x1a0   :  { %780 = vmatprep.subr.mxu1 %v4460_v53  ;;  %948 = vmatpush2.msra.mxu0 %v5052_v48  ;;  %8975 = vst [vmem:[#allocation59_spill] sm:$0xff] %v5059_v51  ;;  %v5066_v53 = vld [vmem:[%s8029_s2 + $0x360] sm:$0xff]  ;;  %v8979_v48 = vld [vmem:[#allocation60_spill] sm:$0xff] }
 0x1a1   :  { %781 = vmatpush2.msra.mxu1 %v8974_v40  ;;  %949 = vmatprep.subr.mxu0 %v5059_v51  ;;  %8977 = vst [vmem:[#allocation61_spill] sm:$0xff] %v5066_v53  ;;  %v8980_v40 = vld [vmem:[#allocation107_spill] sm:$0xff]  ;;  %v8983_v51 = vld [vmem:[#allocation64_spill] sm:$0xff] }
 0x1a2   :  { %782 = vmatprep.subr.mxu1 %v8976_v43  ;;  %950 = vmatpush2.msra.mxu0 %v5066_v53  ;;  %v5079_v43 = vld [vmem:[%s8029_s2 + $0x2e8] sm:$0xff] }
 0x1a3   :  { %783 = vmatpush2.msra.mxu1 %v8978_v45  ;;  %951 = vmatprep.subr.mxu0 %v8979_v48  ;;  %8984 = vst [vmem:[#allocation63_spill] sm:$0xff] %v5079_v43  ;;  %v5085_v45 = vld [vmem:[%s8029_s2 + $0x2e0] sm:$0xff]  ;;  %v5099_v48 = vld [vmem:[%s8029_s2 + $0x2b0] sm:$0xff] }
 0x1a4   :  { %784 = vmatprep.subr.mxu1 %v8980_v40  ;;  %952 = vmatpush2.msra.mxu0 %v8981_v38  ;;  %8985 = vst [vmem:[#allocation65_spill] sm:$0xff] %v5085_v45  ;;  %v8986_v38 = vld [vmem:[#allocation66_spill] sm:$0xff]  ;;  %8989 = vst [vmem:[#allocation70_spill] sm:$0xff] %v5099_v48 }
 0x1a5   :  { %785 = vmatpush2.msra.mxu1 %v8982_v36  ;;  %953 = vmatprep.subr.mxu0 %v8983_v51  ;;  %v8988_v36 = vld [vmem:[#allocation68_spill] sm:$0xff]  ;;  %v5111_v40 = vld [vmem:[%s8029_s2 + $0x280] sm:$0xff] }
 0x1a6   :  { %787 = vmatmul.mubr.f32.vlgmr.msra.gmra.mxu1 %v4651_v58  ;;  %962 = vmatprep.subr.mxu1 %v5079_v43  ;;  %v5092_v58 = vld [vmem:[%s8029_s2 + $0x2b8] sm:$0xff]  ;;  %v5105_v51 = vld [vmem:[%s8029_s2 + $0x288] sm:$0xff]  ;;  %8991 = vst [vmem:[#allocation74_spill] sm:$0xff] %v5111_v40 }
 0x1a7   :  { %963 = vmatpush1.msra.mxu1 %v5085_v45  ;;  %954 = vmatpush2.msra.mxu0 %v8986_v38  ;;  %8987 = vst [vmem:[#allocation67_spill] sm:$0xff] %v5092_v58  ;;  %8990 = vst [vmem:[#allocation72_spill] sm:$0xff] %v5105_v51  ;;  %v5117_v38 = vld [vmem:[%s8029_s2 + $0x258] sm:$0xff] }
 0x1a8   :  { %964 = vmatprep.subr.mxu1 %v5092_v58  ;;  %1033 = vmatprep.subr.mxu0 %v8988_v36  ;;  %8992 = vst [vmem:[#allocation76_spill] sm:$0xff] %v5117_v38  ;;  %v5123_v36 = vld [vmem:[%s8029_s2 + $0x250] sm:$0xff]  ;;  %v9048_v58 = vld [vmem:[#allocation98_spill] sm:$0xff] }
 0x1a9   :  { %965 = vmatpush1.msra.mxu1 %v5099_v48  ;;  %8993 = vst [vmem:[#allocation78_spill] sm:$0xff] %v5123_v36  ;;  %v9047_v48 = vld [vmem:[#allocation96_spill] sm:$0xff]  ;;  %v9050_v45 = vld [vmem:[#allocation33_spill] sm:$0xff] }
 0x1aa   :  { %966 = vmatprep.subr.mxu1 %v5105_v51  ;;  %v5129_v51 = vld [vmem:[%s8029_s2 + $0x228] sm:$0xff] }
 0x1ab   :  { %967 = vmatpush1.msra.mxu1 %v5111_v40  ;;  %8994 = vst [vmem:[#allocation80_spill] sm:$0xff] %v5129_v51  ;;  %v5135_v40 = vld [vmem:[%s8029_s2 + $0x220] sm:$0xff] }
 0x1ac   :  { %968 = vmatprep.subr.mxu1 %v5117_v38  ;;  %8995 = vst [vmem:[#allocation82_spill] sm:$0xff] %v5135_v40  ;;  %v5141_v38 = vld [vmem:[%s8029_s2 + $0x1f8] sm:$0xff] }
 0x1ad   :  { %969 = vmatpush1.msra.mxu1 %v5123_v36  ;;  %8996 = vst [vmem:[#allocation84_spill] sm:$0xff] %v5141_v38  ;;  %v5147_v36 = vld [vmem:[%s8029_s2 + $0x1f0] sm:$0xff] }
 0x1ae   :  { %970 = vmatprep.subr.mxu1 %v5129_v51  ;;  %8997 = vst [vmem:[#allocation86_spill] sm:$0xff] %v5147_v36  ;;  %v5153_v51 = vld [vmem:[%s8029_s2 + $0x1c8] sm:$0xff] }
 0x1af   :  { %971 = vmatpush1.msra.mxu1 %v5135_v40  ;;  %8998 = vst [vmem:[#allocation88_spill] sm:$0xff] %v5153_v51  ;;  %v5159_v40 = vld [vmem:[%s8029_s2 + $0x1c0] sm:$0xff] }
 0x1b0   :  { %972 = vmatprep.subr.mxu1 %v5141_v38  ;;  %8999 = vst [vmem:[#allocation90_spill] sm:$0xff] %v5159_v40  ;;  %v5165_v38 = vld [vmem:[%s8029_s2 + $0x198] sm:$0xff] }
 0x1b1   :  { %973 = vmatpush1.msra.mxu1 %v5147_v36  ;;  %9000 = vst [vmem:[#allocation92_spill] sm:$0xff] %v5165_v38  ;;  %v5171_v36 = vld [vmem:[%s8029_s2 + $0x190] sm:$0xff] }
 0x1b2   :  { %974 = vmatprep.subr.mxu1 %v5153_v51  ;;  %9001 = vst [vmem:[#allocation58_spill] sm:$0xff] %v5171_v36  ;;  %v5177_v51 = vld [vmem:[%s8029_s2 + $0x168] sm:$0xff] }
 0x1b3   :  { %975 = vmatpush1.msra.mxu1 %v5159_v40  ;;  %9002 = vst [vmem:[#allocation19_spill] sm:$0xff] %v5177_v51  ;;  %v5183_v40 = vld [vmem:[%s8029_s2 + $0x160] sm:$0xff] }
 0x1b4   :  { %976 = vmatprep.subr.mxu1 %v5165_v38  ;;  %9003 = vst [vmem:[#allocation15_spill] sm:$0xff] %v5183_v40  ;;  %v5189_v38 = vld [vmem:[%s8029_s2 + $0x138] sm:$0xff] }
 0x1b5   :  { %977 = vmatpush1.msra.mxu1 %v5171_v36  ;;  %9004 = vst [vmem:[#allocation23_spill] sm:$0xff] %v5189_v38  ;;  %v5195_v36 = vld [vmem:[%s8029_s2 + $0x130] sm:$0xff] }
 0x1b6   :  { %978 = vmatprep.subr.mxu1 %v5177_v51  ;;  %9005 = vst [vmem:[#allocation11_spill] sm:$0xff] %v5195_v36  ;;  %v5201_v51 = vld [vmem:[%s8029_s2 + $0x108] sm:$0xff] }
 0x1b7   :  { %979 = vmatpush1.msra.mxu1 %v5183_v40  ;;  %9006 = vst [vmem:[#allocation69_spill] sm:$0xff] %v5201_v51  ;;  %v5207_v40 = vld [vmem:[%s8029_s2 + $0x100] sm:$0xff] }
 0x1b8   :  { %980 = vmatprep.subr.mxu1 %v5189_v38  ;;  %9007 = vst [vmem:[#allocation71_spill] sm:$0xff] %v5207_v40  ;;  %v5213_v38 = vld [vmem:[%s8029_s2 + $0xd8] sm:$0xff] }
 0x1b9   :  { %981 = vmatpush1.msra.mxu1 %v5195_v36  ;;  %9008 = vst [vmem:[#allocation73_spill] sm:$0xff] %v5213_v38  ;;  %v5219_v36 = vld [vmem:[%s8029_s2 + $0xd0] sm:$0xff] }
 0x1ba   :  { %982 = vmatprep.subr.mxu1 %v5201_v51  ;;  %9009 = vst [vmem:[#allocation75_spill] sm:$0xff] %v5219_v36  ;;  %v5225_v51 = vld [vmem:[%s8029_s2 + $0xa8] sm:$0xff] }
 0x1bb   :  { %983 = vmatpush1.msra.mxu1 %v5207_v40  ;;  %9010 = vst [vmem:[#allocation77_spill] sm:$0xff] %v5225_v51  ;;  %v5231_v40 = vld [vmem:[%s8029_s2 + $0xa0] sm:$0xff] }
 0x1bc   :  { %984 = vmatprep.subr.mxu1 %v5213_v38  ;;  %9011 = vst [vmem:[#allocation79_spill] sm:$0xff] %v5231_v40  ;;  %v5237_v38 = vld [vmem:[%s8029_s2 + $0x78] sm:$0xff] }
 0x1bd   :  { %985 = vmatpush1.msra.mxu1 %v5219_v36  ;;  %9012 = vst [vmem:[#allocation81_spill] sm:$0xff] %v5237_v38  ;;  %v5243_v36 = vld [vmem:[%s8029_s2 + $0x70] sm:$0xff] }
 0x1be   :  { %986 = vmatprep.subr.mxu1 %v5225_v51  ;;  %9013 = vst [vmem:[#allocation83_spill] sm:$0xff] %v5243_v36  ;;  %v5249_v51 = vld [vmem:[%s8029_s2 + $0x48] sm:$0xff] }
 0x1bf   :  { %987 = vmatpush1.msra.mxu1 %v5231_v40  ;;  %9014 = vst [vmem:[#allocation85_spill] sm:$0xff] %v5249_v51  ;;  %v5255_v40 = vld [vmem:[%s8029_s2 + $0x40] sm:$0xff] }
 0x1c0   :  { %988 = vmatprep.subr.mxu1 %v5237_v38  ;;  %9015 = vst [vmem:[#allocation87_spill] sm:$0xff] %v5255_v40  ;;  %v5261_v38 = vld [vmem:[%s8029_s2 + $0x18] sm:$0xff] }
 0x1c1   :  { %989 = vmatpush1.msra.mxu1 %v5243_v36  ;;  %9016 = vst [vmem:[#allocation89_spill] sm:$0xff] %v5261_v38  ;;  %v5267_v36 = vld [vmem:[%s8029_s2 + $0x10] sm:$0xff] }
 0x1c2   :  { %990 = vmatprep.subr.mxu1 %v5249_v51  ;;  %9017 = vst [vmem:[#allocation91_spill] sm:$0xff] %v5267_v36  ;;  %v5273_v51 = vld [vmem:[%s8029_s2 + $0x5e8] sm:$0xff] }
 0x1c3   :  { %991 = vmatpush1.msra.mxu1 %v5255_v40  ;;  %9018 = vst [vmem:[#allocation93_spill] sm:$0xff] %v5273_v51  ;;  %v5279_v40 = vld [vmem:[%s8029_s2 + $0x5e0] sm:$0xff] }
 0x1c4   :  { %992 = vmatprep.subr.mxu1 %v5261_v38  ;;  %9019 = vst [vmem:[#allocation95_spill] sm:$0xff] %v5279_v40  ;;  %v5285_v38 = vld [vmem:[%s8029_s2 + $0x5b8] sm:$0xff] }
 0x1c5   :  { %993 = vmatpush1.msra.mxu1 %v5267_v36  ;;  %9020 = vst [vmem:[#allocation97_spill] sm:$0xff] %v5285_v38  ;;  %v5291_v36 = vld [vmem:[%s8029_s2 + $0x5b0] sm:$0xff] }
 0x1c6   :  { %994 = vmatprep.subr.mxu1 %v5273_v51  ;;  %9021 = vst [vmem:[#allocation99_spill] sm:$0xff] %v5291_v36  ;;  %v5297_v51 = vld [vmem:[%s8029_s2 + $0x588] sm:$0xff] }
 0x1c7   :  { %995 = vmatpush2.msra.mxu1 %v5279_v40  ;;  %9022 = vst [vmem:[#allocation101_spill] sm:$0xff] %v5297_v51  ;;  %v5303_v40 = vld [vmem:[%s8029_s2 + $0x580] sm:$0xff] }
 0x1c8   :  { %996 = vmatprep.subr.mxu1 %v5285_v38  ;;  %9023 = vst [vmem:[#allocation102_spill] sm:$0xff] %v5303_v40  ;;  %v5309_v38 = vld [vmem:[%s8029_s2 + $0x558] sm:$0xff] }
 0x1c9   :  { %997 = vmatpush2.msra.mxu1 %v5291_v36  ;;  %9024 = vst [vmem:[#allocation103_spill] sm:$0xff] %v5309_v38  ;;  %v5315_v36 = vld [vmem:[%s8029_s2 + $0x550] sm:$0xff] }
 0x1ca   :  { %998 = vmatprep.subr.mxu1 %v5297_v51  ;;  %9025 = vst [vmem:[#allocation104_spill] sm:$0xff] %v5315_v36  ;;  %v5321_v51 = vld [vmem:[%s8029_s2 + $0x528] sm:$0xff] }
 0x1cb   :  { %999 = vmatpush2.msra.mxu1 %v5303_v40  ;;  %9026 = vst [vmem:[#allocation105_spill] sm:$0xff] %v5321_v51  ;;  %v5327_v40 = vld [vmem:[%s8029_s2 + $0x520] sm:$0xff] }
 0x1cc   :  { %1000 = vmatprep.subr.mxu1 %v5309_v38  ;;  %9027 = vst [vmem:[#allocation106_spill] sm:$0xff] %v5327_v40  ;;  %v5333_v38 = vld [vmem:[%s8029_s2 + $0x4f8] sm:$0xff] }
 0x1cd   :  { %1001 = vmatpush2.msra.mxu1 %v5315_v36  ;;  %9028 = vst [vmem:[#allocation60_spill] sm:$0xff] %v5333_v38  ;;  %v5339_v36 = vld [vmem:[%s8029_s2 + $0x4f0] sm:$0xff] }
 0x1ce   :  { %1002 = vmatprep.subr.mxu1 %v5321_v51  ;;  %9029 = vst [vmem:[#allocation107_spill] sm:$0xff] %v5339_v36  ;;  %v5345_v51 = vld [vmem:[%s8029_s2 + $0x4c8] sm:$0xff] }
 0x1cf   :  { %1003 = vmatpush2.msra.mxu1 %v5327_v40  ;;  %9030 = vst [vmem:[#allocation62_spill] sm:$0xff] %v5345_v51  ;;  %v5351_v40 = vld [vmem:[%s8029_s2 + $0x4c0] sm:$0xff] }
 0x1d0   :  { %1004 = vmatprep.subr.mxu1 %v5333_v38  ;;  %9031 = vst [vmem:[#allocation108_spill] sm:$0xff] %v5351_v40  ;;  %v5357_v38 = vld [vmem:[%s8029_s2 + $0x498] sm:$0xff] }
 0x1d1   :  { %1005 = vmatpush2.msra.mxu1 %v5339_v36  ;;  %9032 = vst [vmem:[#allocation64_spill] sm:$0xff] %v5357_v38  ;;  %v5363_v36 = vld [vmem:[%s8029_s2 + $0x490] sm:$0xff] }
 0x1d2   :  { %1006 = vmatprep.subr.mxu1 %v5345_v51  ;;  %9033 = vst [vmem:[#allocation66_spill] sm:$0xff] %v5363_v36  ;;  %v5369_v51 = vld [vmem:[%s8029_s2 + $0x468] sm:$0xff] }
 0x1d3   :  { %1007 = vmatpush2.msra.mxu1 %v5351_v40  ;;  %9034 = vst [vmem:[#allocation68_spill] sm:$0xff] %v5369_v51  ;;  %v5375_v40 = vld [vmem:[%s8029_s2 + $0x460] sm:$0xff] }
 0x1d4   :  { %1008 = vmatprep.subr.mxu1 %v5357_v38  ;;  %9035 = vst [vmem:[#allocation109_spill] sm:$0xff] %v5375_v40  ;;  %v5381_v38 = vld [vmem:[%s8029_s2 + $0x438] sm:$0xff] }
 0x1d5   :  { %1009 = vmatpush2.msra.mxu1 %v5363_v36  ;;  %9036 = vst [vmem:[#allocation110_spill] sm:$0xff] %v5381_v38  ;;  %v5387_v36 = vld [vmem:[%s8029_s2 + $0x430] sm:$0xff] }
 0x1d6   :  { %1010 = vmatprep.subr.mxu1 %v5369_v51  ;;  %9037 = vst [vmem:[#allocation111_spill] sm:$0xff] %v5387_v36  ;;  %v5393_v51 = vld [vmem:[%s8029_s2 + $0x408] sm:$0xff] }
 0x1d7   :  { %1011 = vmatpush2.msra.mxu1 %v5375_v40  ;;  %9038 = vst [vmem:[#allocation112_spill] sm:$0xff] %v5393_v51  ;;  %v5399_v40 = vld [vmem:[%s8029_s2 + $0x400] sm:$0xff] }
 0x1d8   :  { %1012 = vmatprep.subr.mxu1 %v5381_v38  ;;  %9039 = vst [vmem:[#allocation113_spill] sm:$0xff] %v5399_v40  ;;  %v5405_v38 = vld [vmem:[%s8029_s2 + $0x3d8] sm:$0xff] }
 0x1d9   :  { %1013 = vmatpush2.msra.mxu1 %v5387_v36  ;;  %9040 = vst [vmem:[#allocation114_spill] sm:$0xff] %v5405_v38  ;;  %v5411_v36 = vld [vmem:[%s8029_s2 + $0x3d0] sm:$0xff] }
 0x1da   :  { %1014 = vmatprep.subr.mxu1 %v5393_v51  ;;  %9041 = vst [vmem:[#allocation115_spill] sm:$0xff] %v5411_v36  ;;  %v5417_v51 = vld [vmem:[%s8029_s2 + $0x3a8] sm:$0xff] }
 0x1db   :  { %1015 = vmatpush2.msra.mxu1 %v5399_v40  ;;  %9042 = vst [vmem:[#allocation116_spill] sm:$0xff] %v5417_v51  ;;  %v5423_v40 = vld [vmem:[%s8029_s2 + $0x3a0] sm:$0xff] }
 0x1dc   :  { %1016 = vmatprep.subr.mxu1 %v5405_v38  ;;  %9043 = vst [vmem:[#allocation117_spill] sm:$0xff] %v5423_v40  ;;  %v5429_v38 = vld [vmem:[%s8029_s2 + $0x378] sm:$0xff] }
 0x1dd   :  { %1017 = vmatpush2.msra.mxu1 %v5411_v36  ;;  %9044 = vst [vmem:[#allocation118_spill] sm:$0xff] %v5429_v38  ;;  %v5435_v36 = vld [vmem:[%s8029_s2 + $0x370] sm:$0xff] }
 0x1de   :  { %1018 = vmatprep.subr.mxu1 %v5417_v51  ;;  %9045 = vst [vmem:[#allocation119_spill] sm:$0xff] %v5435_v36  ;;  %v9046_v51 = vld [vmem:[#allocation94_spill] sm:$0xff] }
 0x1df   :  { %1019 = vmatpush2.msra.mxu1 %v5423_v40  ;;  %v9049_v40 = vld [vmem:[#allocation100_spill] sm:$0xff] }
 0x1e0   :  { %1020 = vmatprep.subr.mxu1 %v5429_v38  ;;  %v9051_v38 = vld [vmem:[#allocation35_spill] sm:$0xff] }
 0x1e1   :  { %1021 = vmatpush2.msra.mxu1 %v5435_v36 }
 0x1e2   :  { %1022 = vmatprep.subr.mxu1 %v9046_v51 }
 0x1e3   :  { %1023 = vmatpush2.msra.mxu1 %v9047_v48  ;;  %v2749_v48 = vld [vmem:[%s8032_s0 + $0x1] ss:$8 sm:$0xf] }
 0x1e4   :  { %1024 = vmatprep.subr.mxu1 %v9048_v58  ;;  %v2750_v58 = vld [vmem:[%s8032_s0 + $0x1] ss:$8 sm:$0x30] }
 0x1e5   :  { %1025 = vmatpush2.msra.mxu1 %v9049_v40  ;;  %v568_v40 = vor.u32 %v2750_v58, %v2749_v48  ;;  %v9053_v58 = vld [vmem:[#allocation4_spill] sm:$0xff] }
 0x1e6   :  { %1202 = vmatprep.subr.mxu1 %v9050_v45 }
 0x226   :  { %v646_v43 = vpop.f32.mrf.mxu1  ;;  %v717_v25 = vpop.f32.mrf.mxu0 }
 0x227   :  { %v647_v29 = vadd.f32 %v646_v43, %v9052_v31  ;;  %v718_v43 = vadd.f32 %v717_v25, %v4619_v42 }
 0x228   :  { %v648_v53 = vpop.f32.mrf.mxu1  ;;  %v719_v51 = vpop.f32.mrf.mxu0 }
 0x229   :  { %v649_v34 = vadd.f32 %v648_v53, %v9051_v38  ;;  %v720_v53 = vadd.f32 %v719_v51, %v4621_v52  ;;  %v819_v38 = vrot.slane %v568_v40, 2 }
 0x22b   :  { %v795_v27 = vcombine.low %v647_v29, %v649_v34  ;;  %v823_v34 = vcombine.low %v718_v43, %v720_v53 }
 0x22d   :  { %v802_v36 = vrot.slane %v795_v27, %v4608_v47  ;;  %v830_v27 = vrot.slane %v823_v34, %v4608_v47  ;;  %v865_v34 = vrot.slane %v568_v40, 4 }
 0x22f   :  { %v809_v45 = vrot.slane %v802_v36, %v4608_v47  ;;  %v837_v22 = vrot.slane %v830_v27, %v4608_v47 }
 0x231   :  { %v811_v29 = vadd.f32 %v809_v45, %v568_v40  ;;  %v839_v20 = vadd.f32 %v837_v22, %v819_v38 }
 0x233   :  { %v2751_v31 = vmul.f32 -1.442695, %v811_v29  ;;  %v2752_v17 = vmul.f32 -1.442695, %v839_v20 }
 0x235   :  { %2795 = vpow2.f32 %v2751_v31 }
 0x236   :  { %2797 = vpow2.f32 %v2752_v17 }
 0x242   :  { %v2796_v16 = vpop.eup %2795 }
 0x243   :  { %v815_v15 = vadd.f32 1.0, %v2796_v16  ;;  %v2798_v45 = vpop.eup %2797 }
 0x244   :  { %v843_v43 = vadd.f32 1.0, %v2798_v45  ;;  %v5494_v45 = vld [vmem:[%s8029_s2 + $0x2c0] sm:$0xff] }
 0x245   :  { %2799 = vrcp.f32 %v815_v15 }
 0x246   :  { %2801 = vrcp.f32 %v843_v43  ;;  %v5508_v43 = vld [vmem:[%s8029_s2 + $0x290] sm:$0xff] }
 0x252   :  { %v2800_v22 = vpop.eup %2799 }
 0x253   :  { %v2802_v15 = vpop.eup %2801 }
 0x254   :  { %v869_v16 = vsub.f32 1.0, %v2802_v15 }
 0x266   :  { %v788_v36 = vpop.f32.mrf.mxu1 }
 0x267   :  { %v789_v51 = vadd.f32 %v788_v36, %v9053_v58  ;;  %v871_v36 = vmul.f32 %v2802_v15, %v4639_v32  ;;  %v5481_v32 = vld [vmem:[%s8029_s2 + $0x2f0] sm:$0xff]  ;;  %v5557_v15 = vld [vmem:[%s8029_s2 + $0x1d8] sm:$0xff] }
 0x268   :  { %v790_v48 = vpop.f32.mrf.mxu1  ;;  %9054 = vst [vmem:[#allocation94_spill] sm:$0xff] %v5557_v15 }
 0x269   :  { %v791_v25 = vadd.f32 %v790_v48, %v4632_v19 }
 0x26b   :  { %v848_v53 = vcombine.low %v789_v51, %v791_v25  ;;  %v5487_v25 = vld [vmem:[%s8029_s2 + $0x2c8] sm:$0xff] }
 0x26d   :  { %v855_v31 = vrot.slane %v848_v53, %v4608_v47  ;;  %v5501_v53 = vld [vmem:[%s8029_s2 + $0x298] sm:$0xff] }
 0x26f   :  { %v862_v29 = vrot.slane %v855_v31, %v4608_v47  ;;  %v5515_v31 = vld [vmem:[%s8029_s2 + $0x268] sm:$0xff] }
 0x271   :  { %v864_v20 = vmul.f32 %v2800_v22, %v862_v29  ;;  %v5522_v29 = vld [vmem:[%s8029_s2 + $0x260] sm:$0xff]  ;;  %v5536_v22 = vld [vmem:[%s8029_s2 + $0x230] sm:$0xff] }
 0x273   :  { %v867_v17 = vadd.f32 %v865_v34, %v864_v20  ;;  %v5529_v34 = vld [vmem:[%s8029_s2 + $0x238] sm:$0xff]  ;;  %v5543_v20 = vld [vmem:[%s8029_s2 + $0x208] sm:$0xff] }
 0x275   :  { %2803 = vtanh.f32 %v867_v17  ;;  %v5550_v17 = vld [vmem:[%s8029_s2 + $0x200] sm:$0xff] }
 0x282   :  { %v2804_v38 = vpop.eup %2803 }
 0x283   :  { %v870_v27 = vmul.f32 %v2804_v38, %v869_v16  ;;  %v9055_v16 = vld [vmem:[#allocation37_spill] sm:$0xff] }
 0x284   :  { %v5564_v38 = vld [vmem:[%s8029_s2 + $0x1d0] sm:$0xff] }
 0x285   :  { %v5462_v48 = vadd.f32 %v871_v36, %v870_v27  ;;  %v9056_v27 = vld [vmem:[#allocation5_spill] sm:$0xff]  ;;  %v5571_v36 = vld [vmem:[%s8029_s2 + $0x1a8] sm:$0xff] }
 0x287   :  { %2753 = vst.msk [vmem:[%s8033_s4 + $0x1] ss:$8 sm:$0x3] %vm3516_vm0, %v5462_v48  ;;  %v888_v40 = vrot.slane %v5462_v48, %v8902_v54  ;;  %v5474_v51 = vrot.slane %v5462_v48, %v8900_v37 }
 0x289   :  { %955 = vmatprep.mubr.f32.mxu0 %v888_v40  ;;  %1026 = vmatprep.mubr.f32.mxu1 %v888_v40 }
 0x28a   :  { %956 = vmatmul.mubr.f32.vlgmr.msra.gmra.mxu0 %v5474_v51  ;;  %1027 = vmatmul.mubr.f32.vlgmr.msra.gmra.mxu1 %v5474_v51 }
 0x28b   :  { %1034 = vmatpush1.msra.mxu0 %v5481_v32  ;;  %1097 = vmatprep.mubr.f32.mxu0 %v888_v40  ;;  %v9057_v40 = vld [vmem:[#allocation39_spill] sm:$0xff] }
 0x28c   :  { %1035 = vmatprep.subr.mxu0 %v5487_v25  ;;  %1203 = vmatpush1.msra.mxu1 %v4660_v57 }
 0x28d   :  { %1036 = vmatpush1.msra.mxu0 %v5494_v45  ;;  %1204 = vmatprep.subr.mxu1 %v4667_v55 }
 0x28e   :  { %1037 = vmatprep.subr.mxu0 %v5501_v53  ;;  %1205 = vmatpush1.msra.mxu1 %v4674_v44 }
 0x28f   :  { %1038 = vmatpush1.msra.mxu0 %v5508_v43  ;;  %1206 = vmatprep.subr.mxu1 %v4681_v18 }
 0x290   :  { %1039 = vmatprep.subr.mxu0 %v5515_v31  ;;  %1207 = vmatpush1.msra.mxu1 %v4688_v24 }
 0x291   :  { %1040 = vmatpush1.msra.mxu0 %v5522_v29  ;;  %1208 = vmatprep.subr.mxu1 %v4695_v63 }
 0x292   :  { %1041 = vmatprep.subr.mxu0 %v5529_v34  ;;  %1209 = vmatpush1.msra.mxu1 %v4702_v21 }
 0x293   :  { %1042 = vmatpush1.msra.mxu0 %v5536_v22  ;;  %1210 = vmatprep.subr.mxu1 %v4709_v59 }
 0x294   :  { %1043 = vmatprep.subr.mxu0 %v5543_v20  ;;  %1211 = vmatpush1.msra.mxu1 %v4716_v39 }
 0x295   :  { %1044 = vmatpush1.msra.mxu0 %v5550_v17  ;;  %1212 = vmatprep.subr.mxu1 %v4723_v49 }
 0x296   :  { %1045 = vmatprep.subr.mxu0 %v5557_v15  ;;  %1213 = vmatpush1.msra.mxu1 %v9055_v16  ;;  %v5578_v16 = vld [vmem:[%s8029_s2 + $0x1a0] sm:$0xff] }
 0x297   :  { %1046 = vmatpush1.msra.mxu0 %v5564_v38  ;;  %1214 = vmatprep.subr.mxu1 %v9056_v27  ;;  %v9058_v15 = vld [vmem:[#allocation6_spill] sm:$0xff] }
 0x298   :  { %1047 = vmatprep.subr.mxu0 %v5571_v36  ;;  %1215 = vmatpush1.msra.mxu1 %v9057_v40  ;;  %v5585_v27 = vld [vmem:[%s8029_s2 + $0x178] sm:$0xff]  ;;  %v5592_v40 = vld [vmem:[%s8029_s2 + $0x170] sm:$0xff] }
 0x299   :  { %1048 = vmatpush1.msra.mxu0 %v5578_v16  ;;  %1216 = vmatprep.subr.mxu1 %v9058_v15  ;;  %v5599_v15 = vld [vmem:[%s8029_s2 + $0x148] sm:$0xff] }
 0x29a   :  { %1049 = vmatprep.subr.mxu0 %v5585_v27  ;;  %1217 = vmatpush1.msra.mxu1 %v4758_v60  ;;  %v5606_v60 = vld [vmem:[%s8029_s2 + $0x140] sm:$0xff] }
 0x29b   :  { %1050 = vmatpush1.msra.mxu0 %v5592_v40  ;;  %1218 = vmatprep.subr.mxu1 %v4765_v61  ;;  %v5613_v61 = vld [vmem:[%s8029_s2 + $0x118] sm:$0xff] }
 0x29c   :  { %1051 = vmatprep.subr.mxu0 %v5599_v15  ;;  %1219 = vmatpush1.msra.mxu1 %v4772_v33  ;;  %v5620_v33 = vld [vmem:[%s8029_s2 + $0x110] sm:$0xff] }
 0x29d   :  { %1052 = vmatpush1.msra.mxu0 %v5606_v60  ;;  %1220 = vmatprep.subr.mxu1 %v4779_v41  ;;  %v5627_v41 = vld [vmem:[%s8029_s2 + $0xe8] sm:$0xff] }
 0x29e   :  { %1053 = vmatprep.subr.mxu0 %v5613_v61  ;;  %1221 = vmatpush1.msra.mxu1 %v4786_v23  ;;  %v5634_v23 = vld [vmem:[%s8029_s2 + $0xe0] sm:$0xff] }
 0x29f   :  { %1054 = vmatpush1.msra.mxu0 %v5620_v33  ;;  %1222 = vmatprep.subr.mxu1 %v4793_v46  ;;  %v5641_v46 = vld [vmem:[%s8029_s2 + $0xb8] sm:$0xff] }
 0x2a0   :  { %1055 = vmatprep.subr.mxu0 %v5627_v41  ;;  %1223 = vmatpush1.msra.mxu1 %v4800_v26  ;;  %v5648_v26 = vld [vmem:[%s8029_s2 + $0xb0] sm:$0xff] }
 0x2a1   :  { %1056 = vmatpush1.msra.mxu0 %v5634_v23  ;;  %1224 = vmatprep.subr.mxu1 %v4807_v50  ;;  %v5655_v50 = vld [vmem:[%s8029_s2 + $0x88] sm:$0xff] }
 0x2a2   :  { %1057 = vmatprep.subr.mxu0 %v5641_v46  ;;  %1225 = vmatpush1.msra.mxu1 %v4814_v28  ;;  %v5662_v28 = vld [vmem:[%s8029_s2 + $0x80] sm:$0xff] }
 0x2a3   :  { %1058 = vmatpush1.msra.mxu0 %v5648_v26  ;;  %1226 = vmatprep.subr.mxu1 %v4821_v35  ;;  %v5669_v35 = vld [vmem:[%s8029_s2 + $0x58] sm:$0xff] }
 0x2a4   :  { %1059 = vmatprep.subr.mxu0 %v5655_v50  ;;  %1227 = vmatpush1.msra.mxu1 %v4828_v30  ;;  %9059 = vst [vmem:[#allocation96_spill] sm:$0xff] %v5669_v35  ;;  %v5676_v30 = vld [vmem:[%s8029_s2 + $0x50] sm:$0xff] }
 0x2a5   :  { %1060 = vmatpush1.msra.mxu0 %v5662_v28  ;;  %1228 = vmatprep.subr.mxu1 %v4835_v56  ;;  %9060 = vst [vmem:[#allocation98_spill] sm:$0xff] %v5676_v30  ;;  %v5683_v56 = vld [vmem:[%s8029_s2 + $0x28] sm:$0xff] }
 0x2a6   :  { %1061 = vmatprep.subr.mxu0 %v5669_v35  ;;  %1229 = vmatpush1.msra.mxu1 %v4842_v0  ;;  %9061 = vst [vmem:[#allocation100_spill] sm:$0xff] %v5683_v56  ;;  %v5690_v0 = vld [vmem:[%s8029_s2 + $0x20] sm:$0xff] }
 0x2a7   :  { %1062 = vmatpush1.msra.mxu0 %v5676_v30  ;;  %1230 = vmatprep.subr.mxu1 %v4849_v1  ;;  %9062 = vst [vmem:[#allocation33_spill] sm:$0xff] %v5690_v0  ;;  %v5697_v1 = vld [vmem:[%s8029_s2 + $0x5f8] sm:$0xff] }
 0x2a8   :  { %1063 = vmatprep.subr.mxu0 %v5683_v56  ;;  %1231 = vmatpush1.msra.mxu1 %v4856_v2  ;;  %9063 = vst [vmem:[#allocation4_spill] sm:$0xff] %v5697_v1  ;;  %v5704_v2 = vld [vmem:[%s8029_s2 + $0x5f0] sm:$0xff] }
 0x2a9   :  { %1064 = vmatpush1.msra.mxu0 %v5690_v0  ;;  %1232 = vmatprep.subr.mxu1 %v4863_v3  ;;  %9064 = vst [vmem:[#allocation120_spill] sm:$0xff] %v5704_v2  ;;  %v5711_v3 = vld [vmem:[%s8029_s2 + $0x5c8] sm:$0xff] }
 0x2aa   :  { %1065 = vmatprep.subr.mxu0 %v5697_v1  ;;  %1233 = vmatpush1.msra.mxu1 %v4870_v4  ;;  %9065 = vst [vmem:[#allocation121_spill] sm:$0xff] %v5711_v3  ;;  %v5718_v4 = vld [vmem:[%s8029_s2 + $0x5c0] sm:$0xff] }
 0x2ab   :  { %1066 = vmatpush2.msra.mxu0 %v5704_v2  ;;  %1234 = vmatprep.subr.mxu1 %v4877_v5  ;;  %9066 = vst [vmem:[#allocation122_spill] sm:$0xff] %v5718_v4  ;;  %v5725_v5 = vld [vmem:[%s8029_s2 + $0x598] sm:$0xff] }
 0x2ac   :  { %1067 = vmatprep.subr.mxu0 %v5711_v3  ;;  %1235 = vmatpush2.msra.mxu1 %v4884_v6  ;;  %9067 = vst [vmem:[#allocation123_spill] sm:$0xff] %v5725_v5  ;;  %v5732_v6 = vld [vmem:[%s8029_s2 + $0x590] sm:$0xff] }
 0x2ad   :  { %1068 = vmatpush2.msra.mxu0 %v5718_v4  ;;  %1236 = vmatprep.subr.mxu1 %v4891_v7  ;;  %9068 = vst [vmem:[#allocation124_spill] sm:$0xff] %v5732_v6  ;;  %v5739_v7 = vld [vmem:[%s8029_s2 + $0x568] sm:$0xff] }
 0x2ae   :  { %1069 = vmatprep.subr.mxu0 %v5725_v5  ;;  %1237 = vmatpush2.msra.mxu1 %v4898_v8  ;;  %9069 = vst [vmem:[#allocation125_spill] sm:$0xff] %v5739_v7  ;;  %v5746_v8 = vld [vmem:[%s8029_s2 + $0x560] sm:$0xff]  ;;  %v9130_v5 = vld [vmem:[#allocation88_spill] sm:$0xff] }
 0x2af   :  { %1070 = vmatpush2.msra.mxu0 %v5732_v6  ;;  %1238 = vmatprep.subr.mxu1 %v4905_v9  ;;  %9070 = vst [vmem:[#allocation126_spill] sm:$0xff] %v5746_v8  ;;  %v5753_v9 = vld [vmem:[%s8029_s2 + $0x538] sm:$0xff]  ;;  %v2755_v4 = vld [vmem:[%s8032_s0 + $0x2] ss:$8 sm:$0x30] }
 0x2b0   :  { %1071 = vmatprep.subr.mxu0 %v5739_v7  ;;  %1239 = vmatpush2.msra.mxu1 %v4912_v10  ;;  %9071 = vst [vmem:[#allocation127_spill] sm:$0xff] %v5753_v9  ;;  %v5760_v10 = vld [vmem:[%s8029_s2 + $0x530] sm:$0xff]  ;;  %v9129_v6 = vld [vmem:[#allocation86_spill] sm:$0xff] }
 0x2b1   :  { %1072 = vmatpush2.msra.mxu0 %v5746_v8  ;;  %1240 = vmatprep.subr.mxu1 %v4919_v11  ;;  %9072 = vst [vmem:[#allocation128_spill] sm:$0xff] %v5760_v10  ;;  %v5767_v11 = vld [vmem:[%s8029_s2 + $0x508] sm:$0xff]  ;;  %v9125_v8 = vld [vmem:[#allocation78_spill] sm:$0xff] }
 0x2b2   :  { %1073 = vmatprep.subr.mxu0 %v5753_v9  ;;  %1241 = vmatpush2.msra.mxu1 %v4926_v12  ;;  %9073 = vst [vmem:[#allocation129_spill] sm:$0xff] %v5767_v11  ;;  %v5774_v12 = vld [vmem:[%s8029_s2 + $0x500] sm:$0xff]  ;;  %v9075_v9 = vld [vmem:[#allocation29_spill] sm:$0xff]  ;;  %v9128_v7 = vld [vmem:[#allocation84_spill] sm:$0xff] }
 0x2b3   :  { %1074 = vmatpush2.msra.mxu0 %v5760_v10  ;;  %1242 = vmatprep.subr.mxu1 %v4933_v13  ;;  %9074 = vst [vmem:[#allocation130_spill] sm:$0xff] %v5774_v12  ;;  %v5781_v13 = vld [vmem:[%s8029_s2 + $0x4d8] sm:$0xff] }
 0x2b4   :  { %1075 = vmatprep.subr.mxu0 %v5767_v11  ;;  %1243 = vmatpush2.msra.mxu1 %v4940_v14  ;;  %9076 = vst [vmem:[#allocation131_spill] sm:$0xff] %v5781_v13  ;;  %v9077_v10 = vld [vmem:[#allocation30_spill] sm:$0xff]  ;;  %v5788_v14 = vld [vmem:[%s8029_s2 + $0x4d0] sm:$0xff]  ;;  %v9079_v11 = vld [vmem:[#allocation31_spill] sm:$0xff] }
 0x2b5   :  { %1076 = vmatpush2.msra.mxu0 %v5774_v12  ;;  %1244 = vmatprep.subr.mxu1 %v9075_v9  ;;  %9078 = vst [vmem:[#allocation132_spill] sm:$0xff] %v5788_v14  ;;  %v5795_v9 = vld [vmem:[%s8029_s2 + $0x4a8] sm:$0xff] }
 0x2b6   :  { %1077 = vmatprep.subr.mxu0 %v5781_v13  ;;  %1245 = vmatpush2.msra.mxu1 %v9077_v10  ;;  %9080 = vst [vmem:[#allocation133_spill] sm:$0xff] %v5795_v9  ;;  %v9081_v12 = vld [vmem:[#allocation32_spill] sm:$0xff]  ;;  %v5802_v10 = vld [vmem:[%s8029_s2 + $0x4a0] sm:$0xff] }
 0x2b7   :  { %1078 = vmatpush2.msra.mxu0 %v5788_v14  ;;  %1246 = vmatprep.subr.mxu1 %v9079_v11  ;;  %9082 = vst [vmem:[#allocation134_spill] sm:$0xff] %v5802_v10  ;;  %v9083_v13 = vld [vmem:[#allocation34_spill] sm:$0xff]  ;;  %v9085_v14 = vld [vmem:[#allocation36_spill] sm:$0xff] }
 0x2b8   :  { %1079 = vmatprep.subr.mxu0 %v5795_v9  ;;  %1247 = vmatpush2.msra.mxu1 %v9081_v12  ;;  %v5809_v11 = vld [vmem:[%s8029_s2 + $0x478] sm:$0xff]  ;;  %v5816_v12 = vld [vmem:[%s8029_s2 + $0x470] sm:$0xff] }
 0x2b9   :  { %1080 = vmatpush2.msra.mxu0 %v5802_v10  ;;  %1248 = vmatprep.subr.mxu1 %v9083_v13  ;;  %9084 = vst [vmem:[#allocation135_spill] sm:$0xff] %v5809_v11  ;;  %9086 = vst [vmem:[#allocation136_spill] sm:$0xff] %v5816_v12  ;;  %v9087_v9 = vld [vmem:[#allocation38_spill] sm:$0xff]  ;;  %v5823_v13 = vld [vmem:[%s8029_s2 + $0x448] sm:$0xff] }
 0x2ba   :  { %1081 = vmatprep.subr.mxu0 %v5809_v11  ;;  %1249 = vmatpush2.msra.mxu1 %v9085_v14  ;;  %9088 = vst [vmem:[#allocation137_spill] sm:$0xff] %v5823_v13  ;;  %v9089_v10 = vld [vmem:[#allocation40_spill] sm:$0xff]  ;;  %v5830_v14 = vld [vmem:[%s8029_s2 + $0x440] sm:$0xff] }
 0x2bb   :  { %1082 = vmatpush2.msra.mxu0 %v5816_v12  ;;  %1250 = vmatprep.subr.mxu1 %v9087_v9  ;;  %9090 = vst [vmem:[#allocation138_spill] sm:$0xff] %v5830_v14  ;;  %v9091_v11 = vld [vmem:[#allocation42_spill] sm:$0xff]  ;;  %v9093_v12 = vld [vmem:[#allocation44_spill] sm:$0xff] }
 0x2bc   :  { %1083 = vmatprep.subr.mxu0 %v5823_v13  ;;  %1251 = vmatpush2.msra.mxu1 %v9089_v10  ;;  %v5837_v9 = vld [vmem:[%s8029_s2 + $0x418] sm:$0xff]  ;;  %v5844_v10 = vld [vmem:[%s8029_s2 + $0x410] sm:$0xff] }
 0x2bd   :  { %1084 = vmatpush2.msra.mxu0 %v5830_v14  ;;  %1252 = vmatprep.subr.mxu1 %v9091_v11  ;;  %9092 = vst [vmem:[#allocation139_spill] sm:$0xff] %v5837_v9  ;;  %9094 = vst [vmem:[#allocation140_spill] sm:$0xff] %v5844_v10  ;;  %v9095_v13 = vld [vmem:[#allocation46_spill] sm:$0xff]  ;;  %v5851_v11 = vld [vmem:[%s8029_s2 + $0x3e8] sm:$0xff] }
 0x2be   :  { %1085 = vmatprep.subr.mxu0 %v5837_v9  ;;  %1253 = vmatpush2.msra.mxu1 %v9093_v12  ;;  %9096 = vst [vmem:[#allocation141_spill] sm:$0xff] %v5851_v11  ;;  %v9097_v14 = vld [vmem:[#allocation48_spill] sm:$0xff]  ;;  %v5858_v12 = vld [vmem:[%s8029_s2 + $0x3e0] sm:$0xff] }
 0x2bf   :  { %1086 = vmatpush2.msra.mxu0 %v5844_v10  ;;  %1254 = vmatprep.subr.mxu1 %v9095_v13  ;;  %9098 = vst [vmem:[#allocation142_spill] sm:$0xff] %v5858_v12  ;;  %v9099_v9 = vld [vmem:[#allocation50_spill] sm:$0xff]  ;;  %v9101_v10 = vld [vmem:[#allocation52_spill] sm:$0xff] }
 0x2c0   :  { %1087 = vmatprep.subr.mxu0 %v5851_v11  ;;  %1255 = vmatpush2.msra.mxu1 %v9097_v14  ;;  %v5865_v13 = vld [vmem:[%s8029_s2 + $0x3b8] sm:$0xff]  ;;  %v5872_v14 = vld [vmem:[%s8029_s2 + $0x3b0] sm:$0xff] }
 0x2c1   :  { %1088 = vmatpush2.msra.mxu0 %v5858_v12  ;;  %1256 = vmatprep.subr.mxu1 %v9099_v9  ;;  %9100 = vst [vmem:[#allocation143_spill] sm:$0xff] %v5865_v13  ;;  %9102 = vst [vmem:[#allocation144_spill] sm:$0xff] %v5872_v14  ;;  %v9103_v11 = vld [vmem:[#allocation54_spill] sm:$0xff]  ;;  %v5879_v9 = vld [vmem:[%s8029_s2 + $0x388] sm:$0xff] }
 0x2c2   :  { %1089 = vmatprep.subr.mxu0 %v5865_v13  ;;  %1257 = vmatpush2.msra.mxu1 %v9101_v10  ;;  %9104 = vst [vmem:[#allocation145_spill] sm:$0xff] %v5879_v9  ;;  %v9105_v12 = vld [vmem:[#allocation56_spill] sm:$0xff]  ;;  %v5886_v10 = vld [vmem:[%s8029_s2 + $0x380] sm:$0xff] }
 0x2c3   :  { %1090 = vmatpush2.msra.mxu0 %v5872_v14  ;;  %1258 = vmatprep.subr.mxu1 %v9103_v11  ;;  %9106 = vst [vmem:[#allocation146_spill] sm:$0xff] %v5886_v10  ;;  %v9107_v13 = vld [vmem:[#allocation59_spill] sm:$0xff]  ;;  %v5893_v11 = vld [vmem:[%s8029_s2 + $0x358] sm:$0xff] }
 0x2c4   :  { %1091 = vmatprep.subr.mxu0 %v5879_v9  ;;  %1259 = vmatpush2.msra.mxu1 %v9105_v12  ;;  %9108 = vst [vmem:[#allocation147_spill] sm:$0xff] %v5893_v11  ;;  %v9109_v14 = vld [vmem:[#allocation61_spill] sm:$0xff] }
 0x2c5   :  { %1092 = vmatpush2.msra.mxu0 %v5886_v10  ;;  %1260 = vmatprep.subr.mxu1 %v9107_v13  ;;  %v5900_v12 = vld [vmem:[%s8029_s2 + $0x350] sm:$0xff]  ;;  %v5906_v13 = vld [vmem:[%s8029_s2 + $0x338] sm:$0xff] }
 0x2c6   :  { %1093 = vmatprep.subr.mxu0 %v5893_v11  ;;  %1261 = vmatpush2.msra.mxu1 %v9109_v14  ;;  %9110 = vst [vmem:[#allocation148_spill] sm:$0xff] %v5900_v12  ;;  %9111 = vst [vmem:[#allocation149_spill] sm:$0xff] %v5906_v13  ;;  %v5912_v11 = vld [vmem:[%s8029_s2 + $0x328] sm:$0xff]  ;;  %v5918_v14 = vld [vmem:[%s8029_s2 + $0x330] sm:$0xff] }
 0x2c7   :  { %1094 = vmatpush2.msra.mxu0 %v5900_v12  ;;  %1262 = vmatprep.subr.mxu1 %v5906_v13  ;;  %9112 = vst [vmem:[#allocation150_spill] sm:$0xff] %v5912_v11  ;;  %9113 = vst [vmem:[#allocation151_spill] sm:$0xff] %v5918_v14  ;;  %v5924_v12 = vld [vmem:[%s8029_s2 + $0x320] sm:$0xff]  ;;  %v5930_v13 = vld [vmem:[%s8029_s2 + $0x308] sm:$0xff] }
 0x2c8   :  { %1095 = vmatprep.subr.mxu0 %v5912_v11  ;;  %1263 = vmatpush2.msra.mxu1 %v5918_v14  ;;  %9114 = vst [vmem:[#allocation152_spill] sm:$0xff] %v5924_v12  ;;  %9115 = vst [vmem:[#allocation153_spill] sm:$0xff] %v5930_v13  ;;  %v9116_v11 = vld [vmem:[#allocation63_spill] sm:$0xff]  ;;  %v9117_v10 = vld [vmem:[#allocation65_spill] sm:$0xff] }
 0x2c9   :  { %1096 = vmatpush2.msra.mxu0 %v5924_v12  ;;  %1264 = vmatprep.subr.mxu1 %v5930_v13  ;;  %v5939_v14 = vld [vmem:[%s8029_s2 + $0x300] sm:$0xff]  ;;  %v5946_v9 = vld [vmem:[%s8029_s2 + $0x2f8] sm:$0xff]  ;;  %v9124_v13 = vld [vmem:[#allocation76_spill] sm:$0xff] }
 0x2ca   :  { %1098 = vmatmul.mubr.f32.vlgmr.msra.gmra.mxu0 %v5474_v51  ;;  %1273 = vmatprep.subr.mxu0 %v9116_v11  ;;  %9118 = vst [vmem:[#allocation154_spill] sm:$0xff] %v5939_v14  ;;  %v9119_v12 = vld [vmem:[#allocation67_spill] sm:$0xff]  ;;  %9120 = vst [vmem:[#allocation155_spill] sm:$0xff] %v5946_v9  ;;  %v9121_v51 = vld [vmem:[#allocation70_spill] sm:$0xff] }
 0x2cb   :  { %1274 = vmatpush1.msra.mxu0 %v9117_v10  ;;  %1265 = vmatpush2.msra.mxu1 %v5939_v14  ;;  %v9122_v11 = vld [vmem:[#allocation72_spill] sm:$0xff]  ;;  %v9123_v10 = vld [vmem:[#allocation74_spill] sm:$0xff] }
 0x2cc   :  { %1275 = vmatprep.subr.mxu0 %v9119_v12  ;;  %1344 = vmatprep.subr.mxu1 %v5946_v9  ;;  %v9126_v14 = vld [vmem:[#allocation80_spill] sm:$0xff]  ;;  %v9127_v12 = vld [vmem:[#allocation82_spill] sm:$0xff] }
 0x2cd   :  { %1276 = vmatpush1.msra.mxu0 %v9121_v51  ;;  %v9131_v9 = vld [vmem:[#allocation90_spill] sm:$0xff]  ;;  %v9132_v51 = vld [vmem:[#allocation92_spill] sm:$0xff] }
 0x2ce   :  { %1277 = vmatprep.subr.mxu0 %v9122_v11  ;;  %v9133_v11 = vld [vmem:[#allocation58_spill] sm:$0xff] }
 0x2cf   :  { %1278 = vmatpush1.msra.mxu0 %v9123_v10  ;;  %v9134_v10 = vld [vmem:[#allocation19_spill] sm:$0xff] }
 0x2d0   :  { %1279 = vmatprep.subr.mxu0 %v9124_v13  ;;  %v9135_v13 = vld [vmem:[#allocation15_spill] sm:$0xff] }
 0x2d1   :  { %1280 = vmatpush1.msra.mxu0 %v9125_v8  ;;  %v9136_v8 = vld [vmem:[#allocation23_spill] sm:$0xff] }
 0x2d2   :  { %1281 = vmatprep.subr.mxu0 %v9126_v14  ;;  %v9137_v14 = vld [vmem:[#allocation11_spill] sm:$0xff] }
 0x2d3   :  { %1282 = vmatpush1.msra.mxu0 %v9127_v12  ;;  %v9138_v12 = vld [vmem:[#allocation69_spill] sm:$0xff] }
 0x2d4   :  { %1283 = vmatprep.subr.mxu0 %v9128_v7  ;;  %v9139_v7 = vld [vmem:[#allocation71_spill] sm:$0xff] }
 0x2d5   :  { %1284 = vmatpush1.msra.mxu0 %v9129_v6  ;;  %v9140_v6 = vld [vmem:[#allocation73_spill] sm:$0xff] }
 0x2d6   :  { %1285 = vmatprep.subr.mxu0 %v9130_v5  ;;  %v9141_v5 = vld [vmem:[#allocation75_spill] sm:$0xff] }
 0x2d7   :  { %1286 = vmatpush1.msra.mxu0 %v9131_v9  ;;  %v9142_v9 = vld [vmem:[#allocation77_spill] sm:$0xff] }
 0x2d8   :  { %1287 = vmatprep.subr.mxu0 %v9132_v51  ;;  %v9143_v51 = vld [vmem:[#allocation79_spill] sm:$0xff] }
 0x2d9   :  { %1288 = vmatpush1.msra.mxu0 %v9133_v11  ;;  %v9144_v11 = vld [vmem:[#allocation81_spill] sm:$0xff] }
 0x2da   :  { %1289 = vmatprep.subr.mxu0 %v9134_v10  ;;  %v9145_v10 = vld [vmem:[#allocation83_spill] sm:$0xff] }
 0x2db   :  { %1290 = vmatpush1.msra.mxu0 %v9135_v13  ;;  %v9146_v13 = vld [vmem:[#allocation85_spill] sm:$0xff] }
 0x2dc   :  { %1291 = vmatprep.subr.mxu0 %v9136_v8  ;;  %v9147_v8 = vld [vmem:[#allocation87_spill] sm:$0xff] }
 0x2dd   :  { %1292 = vmatpush1.msra.mxu0 %v9137_v14  ;;  %v9148_v14 = vld [vmem:[#allocation89_spill] sm:$0xff] }
 0x2de   :  { %1293 = vmatprep.subr.mxu0 %v9138_v12  ;;  %v9149_v12 = vld [vmem:[#allocation91_spill] sm:$0xff] }
 0x2df   :  { %1294 = vmatpush1.msra.mxu0 %v9139_v7  ;;  %v9150_v7 = vld [vmem:[#allocation93_spill] sm:$0xff] }
 0x2e0   :  { %1295 = vmatprep.subr.mxu0 %v9140_v6  ;;  %v9151_v6 = vld [vmem:[#allocation95_spill] sm:$0xff] }
 0x2e1   :  { %1296 = vmatpush1.msra.mxu0 %v9141_v5  ;;  %v9152_v5 = vld [vmem:[#allocation97_spill] sm:$0xff] }
 0x2e2   :  { %1297 = vmatprep.subr.mxu0 %v9142_v9  ;;  %v9153_v9 = vld [vmem:[#allocation99_spill] sm:$0xff] }
 0x2e3   :  { %1298 = vmatpush1.msra.mxu0 %v9143_v51  ;;  %v9154_v51 = vld [vmem:[#allocation101_spill] sm:$0xff] }
 0x2e4   :  { %1299 = vmatprep.subr.mxu0 %v9144_v11  ;;  %v9155_v11 = vld [vmem:[#allocation102_spill] sm:$0xff] }
 0x2e5   :  { %1300 = vmatpush1.msra.mxu0 %v9145_v10  ;;  %v9156_v10 = vld [vmem:[#allocation103_spill] sm:$0xff] }
 0x2e6   :  { %1301 = vmatprep.subr.mxu0 %v9146_v13  ;;  %v9157_v13 = vld [vmem:[#allocation104_spill] sm:$0xff] }
 0x2e7   :  { %1302 = vmatpush1.msra.mxu0 %v9147_v8  ;;  %v9158_v8 = vld [vmem:[#allocation105_spill] sm:$0xff] }
 0x2e8   :  { %1303 = vmatprep.subr.mxu0 %v9148_v14  ;;  %v9159_v14 = vld [vmem:[#allocation106_spill] sm:$0xff] }
 0x2e9   :  { %1304 = vmatpush1.msra.mxu0 %v9149_v12  ;;  %v9160_v12 = vld [vmem:[#allocation60_spill] sm:$0xff] }
 0x2ea   :  { %1305 = vmatprep.subr.mxu0 %v9150_v7  ;;  %v9161_v7 = vld [vmem:[#allocation107_spill] sm:$0xff] }
 0x2eb   :  { %1306 = vmatpush2.msra.mxu0 %v9151_v6  ;;  %v9162_v6 = vld [vmem:[#allocation62_spill] sm:$0xff] }
 0x2ec   :  { %1307 = vmatprep.subr.mxu0 %v9152_v5  ;;  %v9163_v5 = vld [vmem:[#allocation108_spill] sm:$0xff] }
 0x2ed   :  { %1308 = vmatpush2.msra.mxu0 %v9153_v9  ;;  %v9164_v9 = vld [vmem:[#allocation64_spill] sm:$0xff] }
 0x2ee   :  { %1309 = vmatprep.subr.mxu0 %v9154_v51  ;;  %v9165_v51 = vld [vmem:[#allocation66_spill] sm:$0xff] }
 0x2ef   :  { %1310 = vmatpush2.msra.mxu0 %v9155_v11  ;;  %v9166_v11 = vld [vmem:[#allocation68_spill] sm:$0xff] }
 0x2f0   :  { %1311 = vmatprep.subr.mxu0 %v9156_v10  ;;  %v9167_v10 = vld [vmem:[#allocation109_spill] sm:$0xff] }
 0x2f1   :  { %1312 = vmatpush2.msra.mxu0 %v9157_v13  ;;  %v9168_v13 = vld [vmem:[#allocation110_spill] sm:$0xff] }
 0x2f2   :  { %1313 = vmatprep.subr.mxu0 %v9158_v8  ;;  %v9169_v8 = vld [vmem:[#allocation111_spill] sm:$0xff] }
 0x2f3   :  { %1314 = vmatpush2.msra.mxu0 %v9159_v14  ;;  %v9170_v14 = vld [vmem:[#allocation112_spill] sm:$0xff] }
 0x2f4   :  { %1315 = vmatprep.subr.mxu0 %v9160_v12  ;;  %v9171_v12 = vld [vmem:[#allocation113_spill] sm:$0xff] }
 0x2f5   :  { %1316 = vmatpush2.msra.mxu0 %v9161_v7  ;;  %v9172_v7 = vld [vmem:[#allocation114_spill] sm:$0xff] }
 0x2f6   :  { %1317 = vmatprep.subr.mxu0 %v9162_v6  ;;  %v9173_v6 = vld [vmem:[#allocation115_spill] sm:$0xff] }
 0x2f7   :  { %1318 = vmatpush2.msra.mxu0 %v9163_v5  ;;  %v9174_v5 = vld [vmem:[#allocation116_spill] sm:$0xff] }
 0x2f8   :  { %1319 = vmatprep.subr.mxu0 %v9164_v9  ;;  %v9175_v9 = vld [vmem:[#allocation117_spill] sm:$0xff] }
 0x2f9   :  { %1320 = vmatpush2.msra.mxu0 %v9165_v51  ;;  %v9176_v51 = vld [vmem:[#allocation118_spill] sm:$0xff] }
 0x2fa   :  { %1321 = vmatprep.subr.mxu0 %v9166_v11  ;;  %v9177_v11 = vld [vmem:[#allocation119_spill] sm:$0xff] }
 0x2fb   :  { %1322 = vmatpush2.msra.mxu0 %v9167_v10 }
 0x2fc   :  { %1323 = vmatprep.subr.mxu0 %v9168_v13 }
 0x2fd   :  { %1324 = vmatpush2.msra.mxu0 %v9169_v8  ;;  %v6009_v8 = vld [vmem:[%s8029_s2 + $0x348] sm:$0xff] }
 0x2fe   :  { %1325 = vmatprep.subr.mxu0 %v9170_v14  ;;  %9178 = vst [vmem:[#allocation156_spill] sm:$0xff] %v6009_v8 }
 0x2ff   :  { %1326 = vmatpush2.msra.mxu0 %v9171_v12  ;;  %v9184_v12 = vld [vmem:[#allocation3_spill] sm:$0xff] }
 0x300   :  { %1327 = vmatprep.subr.mxu0 %v9172_v7  ;;  %v6015_v7 = vld [vmem:[%s8029_s2 + $0x340] sm:$0xff] }
 0x301   :  { %1328 = vmatpush2.msra.mxu0 %v9173_v6  ;;  %9179 = vst [vmem:[#allocation157_spill] sm:$0xff] %v6015_v7 }
 0x302   :  { %1329 = vmatprep.subr.mxu0 %v9174_v5  ;;  %v9183_v5 = vld [vmem:[#allocation35_spill] sm:$0xff] }
 0x303   :  { %1330 = vmatpush2.msra.mxu0 %v9175_v9 }
 0x304   :  { %1331 = vmatprep.subr.mxu0 %v9176_v51  ;;  %v6021_v51 = vld [vmem:[%s8029_s2 + $0x318] sm:$0xff] }
 0x305   :  { %1332 = vmatpush2.msra.mxu0 %v9177_v11  ;;  %9180 = vst [vmem:[#allocation158_spill] sm:$0xff] %v6021_v51  ;;  %v6027_v11 = vld [vmem:[%s8029_s2 + $0x310] sm:$0xff] }
 0x306   :  { %1333 = vmatprep.subr.mxu0 %v6009_v8  ;;  %9181 = vst [vmem:[#allocation159_spill] sm:$0xff] %v6027_v11  ;;  %v6033_v8 = vld [vmem:[%s8029_s2 + $0x2d8] sm:$0xff] }
 0x307   :  { %1334 = vmatpush2.msra.mxu0 %v6015_v7  ;;  %9182 = vst [vmem:[#allocation160_spill] sm:$0xff] %v6033_v8 }
 0x308   :  { %1335 = vmatprep.subr.mxu0 %v6021_v51 }
 0x309   :  { %1336 = vmatpush2.msra.mxu0 %v6027_v11  ;;  %v2754_v11 = vld [vmem:[%s8032_s0 + $0x2] ss:$8 sm:$0xf] }
 0x30a   :  { %1513 = vmatprep.subr.mxu0 %v6033_v8  ;;  %v879_v2 = vor.u32 %v2755_v4, %v2754_v11 }
 0x34a   :  { %v957_v7 = vpop.f32.mrf.mxu0  ;;  %v1028_v13 = vpop.f32.mrf.mxu1 }
 0x34b   :  { %v958_v51 = vadd.f32 %v957_v7, %v9184_v12  ;;  %v1029_v7 = vadd.f32 %v1028_v13, %v4619_v42 }
 0x34c   :  { %v959_v9 = vpop.f32.mrf.mxu0  ;;  %v1030_v3 = vpop.f32.mrf.mxu1 }
 0x34d   :  { %v960_v6 = vadd.f32 %v959_v9, %v9183_v5  ;;  %v1031_v9 = vadd.f32 %v1030_v3, %v4621_v52  ;;  %v1130_v5 = vrot.slane %v879_v2, 2 }
 0x34f   :  { %v1106_v14 = vcombine.low %v958_v51, %v960_v6  ;;  %v1134_v51 = vcombine.low %v1029_v7, %v1031_v9 }
 0x351   :  { %v1113_v10 = vrot.slane %v1106_v14, %v4608_v47  ;;  %v1141_v14 = vrot.slane %v1134_v51, %v4608_v47 }
 0x353   :  { %v1120_v8 = vrot.slane %v1113_v10, %v4608_v47  ;;  %v1148_v1 = vrot.slane %v1141_v14, %v4608_v47 }
 0x355   :  { %v1122_v6 = vadd.f32 %v1120_v8, %v879_v2  ;;  %v1150_v0 = vadd.f32 %v1148_v1, %v1130_v5 }
 0x357   :  { %v2756_v12 = vmul.f32 -1.442695, %v1122_v6  ;;  %v2757_v56 = vmul.f32 -1.442695, %v1150_v0  ;;  %v1176_v6 = vrot.slane %v879_v2, 4 }
 0x359   :  { %2805 = vpow2.f32 %v2756_v12 }
 0x35a   :  { %2807 = vpow2.f32 %v2757_v56 }
 0x366   :  { %v2806_v30 = vpop.eup %2805 }
 0x367   :  { %v1126_v35 = vadd.f32 1.0, %v2806_v30  ;;  %v2808_v11 = vpop.eup %2807 }
 0x368   :  { %v1154_v9 = vadd.f32 1.0, %v2808_v11  ;;  %v9198_v11 = vld [vmem:[#allocation49_spill] sm:$0xff] }
 0x369   :  { %2809 = vrcp.f32 %v1126_v35 }
 0x36a   :  { %2811 = vrcp.f32 %v1154_v9  ;;  %v9200_v9 = vld [vmem:[#allocation51_spill] sm:$0xff] }
 0x376   :  { %v2810_v1 = vpop.eup %2809 }
 0x377   :  { %v2812_v35 = vpop.eup %2811 }
 0x378   :  { %v1180_v30 = vsub.f32 1.0, %v2812_v35  ;;  %v1182_v14 = vmul.f32 %v2812_v35, %v5462_v48  ;;  %v9195_v48 = vld [vmem:[#allocation9_spill] sm:$0xff]  ;;  %v9207_v35 = vld [vmem:[#allocation55_spill] sm:$0xff] }
 0x38a   :  { %v1099_v4 = vpop.f32.mrf.mxu0 }
 0x38b   :  { %v1100_v3 = vadd.f32 %v1099_v4, %v9053_v58 }
 0x38c   :  { %v1101_v10 = vpop.f32.mrf.mxu0 }
 0x38d   :  { %v1102_v8 = vadd.f32 %v1101_v10, %v4632_v19 }
 0x38f   :  { %v1159_v13 = vcombine.low %v1100_v3, %v1102_v8  ;;  %v9196_v3 = vld [vmem:[#allocation47_spill] sm:$0xff]  ;;  %v9197_v8 = vld [vmem:[#allocation10_spill] sm:$0xff] }
 0x391   :  { %v1166_v12 = vrot.slane %v1159_v13, %v4608_v47  ;;  %v9199_v13 = vld [vmem:[#allocation12_spill] sm:$0xff] }
 0x393   :  { %v1173_v7 = vrot.slane %v1166_v12, %v4608_v47  ;;  %v9201_v12 = vld [vmem:[#allocation13_spill] sm:$0xff] }
 0x395   :  { %v1175_v0 = vmul.f32 %v2810_v1, %v1173_v7  ;;  %v9202_v7 = vld [vmem:[#allocation96_spill] sm:$0xff]  ;;  %v9204_v1 = vld [vmem:[#allocation98_spill] sm:$0xff] }
 0x397   :  { %v1178_v56 = vadd.f32 %v1176_v6, %v1175_v0  ;;  %v9203_v6 = vld [vmem:[#allocation53_spill] sm:$0xff]  ;;  %v9205_v0 = vld [vmem:[#allocation14_spill] sm:$0xff] }
 0x399   :  { %2813 = vtanh.f32 %v1178_v56  ;;  %v9206_v56 = vld [vmem:[#allocation100_spill] sm:$0xff] }
 0x3a6   :  { %v2814_v5 = vpop.eup %2813 }
 0x3a7   :  { %v1181_v51 = vmul.f32 %v2814_v5, %v1180_v30  ;;  %v9208_v30 = vld [vmem:[#allocation33_spill] sm:$0xff]  ;;  %v9209_v5 = vld [vmem:[#allocation16_spill] sm:$0xff] }
 0x3a9   :  { %v6055_v4 = vadd.f32 %v1182_v14, %v1181_v51  ;;  %v9210_v51 = vld [vmem:[#allocation4_spill] sm:$0xff]  ;;  %v9211_v14 = vld [vmem:[#allocation57_spill] sm:$0xff] }
 0x3ab   :  { %2758 = vst.msk [vmem:[%s8033_s4 + $0x2] ss:$8 sm:$0x3] %vm3516_vm0, %v6055_v4  ;;  %v1199_v2 = vrot.slane %v6055_v4, %v8902_v54  ;;  %v6067_v10 = vrot.slane %v6055_v4, %v8900_v37 }
 0x3ad   :  { %1266 = vmatprep.mubr.f32.mxu1 %v1199_v2  ;;  %1337 = vmatprep.mubr.f32.mxu0 %v1199_v2 }
 0x3ae   :  { %1267 = vmatmul.mubr.f32.vlgmr.msra.gmra.mxu1 %v6067_v10  ;;  %1338 = vmatmul.mubr.f32.vlgmr.msra.gmra.mxu0 %v6067_v10 }
 0x3af   :  { %1345 = vmatpush1.msra.mxu1 %v5481_v32  ;;  %1408 = vmatprep.mubr.f32.mxu1 %v1199_v2  ;;  %v9212_v2 = vld [vmem:[#allocation120_spill] sm:$0xff] }
 0x3b0   :  { %1346 = vmatprep.subr.mxu1 %v5487_v25  ;;  %1514 = vmatpush1.msra.mxu0 %v4660_v57  ;;  %v9185_v57 = vld [vmem:[#allocation94_spill] sm:$0xff] }
 0x3b1   :  { %1347 = vmatpush1.msra.mxu1 %v5494_v45  ;;  %1515 = vmatprep.subr.mxu0 %v4667_v55  ;;  %v9186_v55 = vld [vmem:[#allocation37_spill] sm:$0xff] }
 0x3b2   :  { %1348 = vmatprep.subr.mxu1 %v5501_v53  ;;  %1516 = vmatpush1.msra.mxu0 %v4674_v44  ;;  %v9187_v44 = vld [vmem:[#allocation5_spill] sm:$0xff] }
 0x3b3   :  { %1349 = vmatpush1.msra.mxu1 %v5508_v43  ;;  %1517 = vmatprep.subr.mxu0 %v4681_v18  ;;  %v9188_v18 = vld [vmem:[#allocation39_spill] sm:$0xff] }
 0x3b4   :  { %1350 = vmatprep.subr.mxu1 %v5515_v31  ;;  %1518 = vmatpush1.msra.mxu0 %v4688_v24  ;;  %v9189_v24 = vld [vmem:[#allocation6_spill] sm:$0xff] }
 0x3b5   :  { %1351 = vmatpush1.msra.mxu1 %v5522_v29  ;;  %1519 = vmatprep.subr.mxu0 %v4695_v63  ;;  %v9190_v63 = vld [vmem:[#allocation41_spill] sm:$0xff] }
 0x3b6   :  { %1352 = vmatprep.subr.mxu1 %v5529_v34  ;;  %1520 = vmatpush1.msra.mxu0 %v4702_v21  ;;  %v9191_v21 = vld [vmem:[#allocation7_spill] sm:$0xff] }
 0x3b7   :  { %1353 = vmatpush1.msra.mxu1 %v5536_v22  ;;  %1521 = vmatprep.subr.mxu0 %v4709_v59  ;;  %v9192_v59 = vld [vmem:[#allocation43_spill] sm:$0xff] }
 0x3b8   :  { %1354 = vmatprep.subr.mxu1 %v5543_v20  ;;  %1522 = vmatpush1.msra.mxu0 %v4716_v39  ;;  %v9193_v39 = vld [vmem:[#allocation8_spill] sm:$0xff] }
 0x3b9   :  { %1355 = vmatpush1.msra.mxu1 %v5550_v17  ;;  %1523 = vmatprep.subr.mxu0 %v4723_v49  ;;  %v9194_v49 = vld [vmem:[#allocation45_spill] sm:$0xff] }
 0x3ba   :  { %1356 = vmatprep.subr.mxu1 %v9185_v57  ;;  %1524 = vmatpush1.msra.mxu0 %v9186_v55  ;;  %v9213_v55 = vld [vmem:[#allocation17_spill] sm:$0xff] }
 0x3bb   :  { %1357 = vmatpush1.msra.mxu1 %v5564_v38  ;;  %1525 = vmatprep.subr.mxu0 %v9187_v44  ;;  %v9214_v44 = vld [vmem:[#allocation121_spill] sm:$0xff] }
 0x3bc   :  { %1358 = vmatprep.subr.mxu1 %v5571_v36  ;;  %1526 = vmatpush1.msra.mxu0 %v9188_v18  ;;  %v9215_v18 = vld [vmem:[#allocation18_spill] sm:$0xff] }
 0x3bd   :  { %1359 = vmatpush1.msra.mxu1 %v5578_v16  ;;  %1527 = vmatprep.subr.mxu0 %v9189_v24  ;;  %v9216_v24 = vld [vmem:[#allocation122_spill] sm:$0xff] }
 0x3be   :  { %1360 = vmatprep.subr.mxu1 %v5585_v27  ;;  %1528 = vmatpush1.msra.mxu0 %v9190_v63  ;;  %v9217_v63 = vld [vmem:[#allocation20_spill] sm:$0xff] }
 0x3bf   :  { %1361 = vmatpush1.msra.mxu1 %v5592_v40  ;;  %1529 = vmatprep.subr.mxu0 %v9191_v21  ;;  %v9218_v21 = vld [vmem:[#allocation123_spill] sm:$0xff] }
 0x3c0   :  { %1362 = vmatprep.subr.mxu1 %v5599_v15  ;;  %1530 = vmatpush1.msra.mxu0 %v9192_v59  ;;  %v9219_v59 = vld [vmem:[#allocation21_spill] sm:$0xff] }
 0x3c1   :  { %1363 = vmatpush1.msra.mxu1 %v5606_v60  ;;  %1531 = vmatprep.subr.mxu0 %v9193_v39  ;;  %v9220_v39 = vld [vmem:[#allocation124_spill] sm:$0xff] }
 0x3c2   :  { %1364 = vmatprep.subr.mxu1 %v5613_v61  ;;  %1532 = vmatpush1.msra.mxu0 %v9194_v49  ;;  %v9221_v49 = vld [vmem:[#allocation22_spill] sm:$0xff] }
 0x3c3   :  { %1365 = vmatpush1.msra.mxu1 %v5620_v33  ;;  %1533 = vmatprep.subr.mxu0 %v9195_v48  ;;  %v9222_v48 = vld [vmem:[#allocation125_spill] sm:$0xff] }
 0x3c4   :  { %1366 = vmatprep.subr.mxu1 %v5627_v41  ;;  %1534 = vmatpush1.msra.mxu0 %v9196_v3  ;;  %v9223_v3 = vld [vmem:[#allocation24_spill] sm:$0xff] }
 0x3c5   :  { %1367 = vmatpush1.msra.mxu1 %v5634_v23  ;;  %1535 = vmatprep.subr.mxu0 %v9197_v8  ;;  %v9224_v8 = vld [vmem:[#allocation126_spill] sm:$0xff] }
 0x3c6   :  { %1368 = vmatprep.subr.mxu1 %v5641_v46  ;;  %1536 = vmatpush1.msra.mxu0 %v9198_v11  ;;  %v9225_v11 = vld [vmem:[#allocation25_spill] sm:$0xff] }
 0x3c7   :  { %1369 = vmatpush1.msra.mxu1 %v5648_v26  ;;  %1537 = vmatprep.subr.mxu0 %v9199_v13  ;;  %v9226_v13 = vld [vmem:[#allocation127_spill] sm:$0xff] }
 0x3c8   :  { %1370 = vmatprep.subr.mxu1 %v5655_v50  ;;  %1538 = vmatpush1.msra.mxu0 %v9200_v9  ;;  %v9227_v9 = vld [vmem:[#allocation26_spill] sm:$0xff] }
 0x3c9   :  { %1371 = vmatpush1.msra.mxu1 %v5662_v28  ;;  %1539 = vmatprep.subr.mxu0 %v9201_v12  ;;  %v9228_v12 = vld [vmem:[#allocation128_spill] sm:$0xff] }
 0x3ca   :  { %1372 = vmatprep.subr.mxu1 %v9202_v7  ;;  %1540 = vmatpush1.msra.mxu0 %v9203_v6  ;;  %v9229_v6 = vld [vmem:[#allocation27_spill] sm:$0xff] }
 0x3cb   :  { %1373 = vmatpush1.msra.mxu1 %v9204_v1  ;;  %1541 = vmatprep.subr.mxu0 %v9205_v0  ;;  %v9230_v0 = vld [vmem:[#allocation129_spill] sm:$0xff] }
 0x3cc   :  { %1374 = vmatprep.subr.mxu1 %v9206_v56  ;;  %1542 = vmatpush1.msra.mxu0 %v9207_v35  ;;  %v9231_v35 = vld [vmem:[#allocation28_spill] sm:$0xff] }
 0x3cd   :  { %1375 = vmatpush1.msra.mxu1 %v9208_v30  ;;  %1543 = vmatprep.subr.mxu0 %v9209_v5  ;;  %v9232_v5 = vld [vmem:[#allocation130_spill] sm:$0xff] }
 0x3ce   :  { %1376 = vmatprep.subr.mxu1 %v9210_v51  ;;  %1544 = vmatpush1.msra.mxu0 %v9211_v14  ;;  %v9233_v14 = vld [vmem:[#allocation29_spill] sm:$0xff] }
 0x3cf   :  { %1377 = vmatpush2.msra.mxu1 %v9212_v2  ;;  %1545 = vmatprep.subr.mxu0 %v9213_v55  ;;  %v9234_v55 = vld [vmem:[#allocation131_spill] sm:$0xff] }
 0x3d0   :  { %1378 = vmatprep.subr.mxu1 %v9214_v44  ;;  %1546 = vmatpush2.msra.mxu0 %v9215_v18  ;;  %v9235_v18 = vld [vmem:[#allocation30_spill] sm:$0xff] }
 0x3d1   :  { %1379 = vmatpush2.msra.mxu1 %v9216_v24  ;;  %1547 = vmatprep.subr.mxu0 %v9217_v63  ;;  %v9236_v63 = vld [vmem:[#allocation132_spill] sm:$0xff] }
 0x3d2   :  { %1380 = vmatprep.subr.mxu1 %v9218_v21  ;;  %1548 = vmatpush2.msra.mxu0 %v9219_v59  ;;  %v9237_v59 = vld [vmem:[#allocation31_spill] sm:$0xff] }
 0x3d3   :  { %1381 = vmatpush2.msra.mxu1 %v9220_v39  ;;  %1549 = vmatprep.subr.mxu0 %v9221_v49  ;;  %v9238_v49 = vld [vmem:[#allocation133_spill] sm:$0xff] }
 0x3d4   :  { %1382 = vmatprep.subr.mxu1 %v9222_v48  ;;  %1550 = vmatpush2.msra.mxu0 %v9223_v3  ;;  %v9239_v3 = vld [vmem:[#allocation32_spill] sm:$0xff] }
 0x3d5   :  { %1383 = vmatpush2.msra.mxu1 %v9224_v8  ;;  %1551 = vmatprep.subr.mxu0 %v9225_v11  ;;  %v9240_v11 = vld [vmem:[#allocation134_spill] sm:$0xff] }
 0x3d6   :  { %1384 = vmatprep.subr.mxu1 %v9226_v13  ;;  %1552 = vmatpush2.msra.mxu0 %v9227_v9  ;;  %v9241_v9 = vld [vmem:[#allocation34_spill] sm:$0xff] }
 0x3d7   :  { %1385 = vmatpush2.msra.mxu1 %v9228_v12  ;;  %1553 = vmatprep.subr.mxu0 %v9229_v6  ;;  %v9242_v6 = vld [vmem:[#allocation135_spill] sm:$0xff] }
 0x3d8   :  { %1386 = vmatprep.subr.mxu1 %v9230_v0  ;;  %1554 = vmatpush2.msra.mxu0 %v9231_v35  ;;  %v9243_v35 = vld [vmem:[#allocation36_spill] sm:$0xff] }
 0x3d9   :  { %1387 = vmatpush2.msra.mxu1 %v9232_v5  ;;  %1555 = vmatprep.subr.mxu0 %v9233_v14  ;;  %v9244_v14 = vld [vmem:[#allocation136_spill] sm:$0xff]  ;;  %v9342_v5 = vld [vmem:[#allocation3_spill] sm:$0xff] }
 0x3da   :  { %1388 = vmatprep.subr.mxu1 %v9234_v55  ;;  %1556 = vmatpush2.msra.mxu0 %v9235_v18  ;;  %v9245_v55 = vld [vmem:[#allocation38_spill] sm:$0xff]  ;;  %v9246_v18 = vld [vmem:[#allocation137_spill] sm:$0xff] }
 0x3db   :  { %1389 = vmatpush2.msra.mxu1 %v9236_v63  ;;  %1557 = vmatprep.subr.mxu0 %v9237_v59  ;;  %v9247_v63 = vld [vmem:[#allocation40_spill] sm:$0xff]  ;;  %v9248_v59 = vld [vmem:[#allocation138_spill] sm:$0xff] }
 0x3dc   :  { %1390 = vmatprep.subr.mxu1 %v9238_v49  ;;  %1558 = vmatpush2.msra.mxu0 %v9239_v3  ;;  %v9249_v49 = vld [vmem:[#allocation42_spill] sm:$0xff]  ;;  %v9250_v3 = vld [vmem:[#allocation139_spill] sm:$0xff] }
 0x3dd   :  { %1391 = vmatpush2.msra.mxu1 %v9240_v11  ;;  %1559 = vmatprep.subr.mxu0 %v9241_v9  ;;  %v9251_v11 = vld [vmem:[#allocation44_spill] sm:$0xff] }
 0x3de   :  { %1392 = vmatprep.subr.mxu1 %v9242_v6  ;;  %1560 = vmatpush2.msra.mxu0 %v9243_v35  ;;  %v9252_v9 = vld [vmem:[#allocation140_spill] sm:$0xff]  ;;  %v9253_v6 = vld [vmem:[#allocation46_spill] sm:$0xff]  ;;  %v9254_v35 = vld [vmem:[#allocation141_spill] sm:$0xff] }
 0x3df   :  { %1393 = vmatpush2.msra.mxu1 %v9244_v14  ;;  %1561 = vmatprep.subr.mxu0 %v9245_v55  ;;  %v9255_v14 = vld [vmem:[#allocation48_spill] sm:$0xff]  ;;  %v9256_v55 = vld [vmem:[#allocation142_spill] sm:$0xff] }
 0x3e0   :  { %1394 = vmatprep.subr.mxu1 %v9246_v18  ;;  %1562 = vmatpush2.msra.mxu0 %v9247_v63  ;;  %v9257_v18 = vld [vmem:[#allocation50_spill] sm:$0xff]  ;;  %v9258_v63 = vld [vmem:[#allocation143_spill] sm:$0xff] }
 0x3e1   :  { %1395 = vmatpush2.msra.mxu1 %v9248_v59  ;;  %1563 = vmatprep.subr.mxu0 %v9249_v49  ;;  %v9259_v59 = vld [vmem:[#allocation52_spill] sm:$0xff] }
 0x3e2   :  { %1396 = vmatprep.subr.mxu1 %v9250_v3  ;;  %1564 = vmatpush2.msra.mxu0 %v9251_v11  ;;  %v9260_v49 = vld [vmem:[#allocation144_spill] sm:$0xff]  ;;  %v9261_v3 = vld [vmem:[#allocation54_spill] sm:$0xff]  ;;  %v9262_v11 = vld [vmem:[#allocation145_spill] sm:$0xff] }
 0x3e3   :  { %1397 = vmatpush2.msra.mxu1 %v9252_v9  ;;  %1565 = vmatprep.subr.mxu0 %v9253_v6  ;;  %v9263_v9 = vld [vmem:[#allocation56_spill] sm:$0xff]  ;;  %v9264_v6 = vld [vmem:[#allocation146_spill] sm:$0xff] }
 0x3e4   :  { %1398 = vmatprep.subr.mxu1 %v9254_v35  ;;  %1566 = vmatpush2.msra.mxu0 %v9255_v14  ;;  %v9265_v35 = vld [vmem:[#allocation59_spill] sm:$0xff] }
 0x3e5   :  { %1399 = vmatpush2.msra.mxu1 %v9256_v55  ;;  %1567 = vmatprep.subr.mxu0 %v9257_v18  ;;  %v9266_v14 = vld [vmem:[#allocation147_spill] sm:$0xff]  ;;  %v9267_v55 = vld [vmem:[#allocation61_spill] sm:$0xff]  ;;  %v9268_v18 = vld [vmem:[#allocation148_spill] sm:$0xff] }
 0x3e6   :  { %1400 = vmatprep.subr.mxu1 %v9258_v63  ;;  %1568 = vmatpush2.msra.mxu0 %v9259_v59  ;;  %v9269_v63 = vld [vmem:[#allocation149_spill] sm:$0xff]  ;;  %v9270_v59 = vld [vmem:[#allocation150_spill] sm:$0xff] }
 0x3e7   :  { %1401 = vmatpush2.msra.mxu1 %v9260_v49  ;;  %1569 = vmatprep.subr.mxu0 %v9261_v3  ;;  %v9271_v49 = vld [vmem:[#allocation151_spill] sm:$0xff]  ;;  %v9272_v3 = vld [vmem:[#allocation152_spill] sm:$0xff] }
 0x3e8   :  { %1402 = vmatprep.subr.mxu1 %v9262_v11  ;;  %1570 = vmatpush2.msra.mxu0 %v9263_v9  ;;  %v9273_v11 = vld [vmem:[#allocation153_spill] sm:$0xff]  ;;  %v9274_v9 = vld [vmem:[#allocation63_spill] sm:$0xff] }
 0x3e9   :  { %1403 = vmatpush2.msra.mxu1 %v9264_v6  ;;  %1571 = vmatprep.subr.mxu0 %v9265_v35  ;;  %v9275_v35 = vld [vmem:[#allocation65_spill] sm:$0xff]  ;;  %v9341_v6 = vld [vmem:[#allocation35_spill] sm:$0xff] }
 0x3ea   :  { %1404 = vmatprep.subr.mxu1 %v9266_v14  ;;  %1572 = vmatpush2.msra.mxu0 %v9267_v55  ;;  %v9276_v14 = vld [vmem:[#allocation154_spill] sm:$0xff]  ;;  %v9277_v55 = vld [vmem:[#allocation67_spill] sm:$0xff] }
 0x3eb   :  { %1405 = vmatpush2.msra.mxu1 %v9268_v18  ;;  %1573 = vmatprep.subr.mxu0 %v9269_v63  ;;  %v9278_v18 = vld [vmem:[#allocation155_spill] sm:$0xff]  ;;  %v9279_v63 = vld [vmem:[#allocation70_spill] sm:$0xff] }
 0x3ec   :  { %1406 = vmatprep.subr.mxu1 %v9270_v59  ;;  %1574 = vmatpush2.msra.mxu0 %v9271_v49  ;;  %v9280_v59 = vld [vmem:[#allocation72_spill] sm:$0xff]  ;;  %v9281_v49 = vld [vmem:[#allocation74_spill] sm:$0xff] }
 0x3ed   :  { %1407 = vmatpush2.msra.mxu1 %v9272_v3  ;;  %1575 = vmatprep.subr.mxu0 %v9273_v11  ;;  %v9282_v3 = vld [vmem:[#allocation76_spill] sm:$0xff]  ;;  %v9283_v11 = vld [vmem:[#allocation78_spill] sm:$0xff] }
 0x3ee   :  { %1409 = vmatmul.mubr.f32.vlgmr.msra.gmra.mxu1 %v6067_v10  ;;  %1584 = vmatprep.subr.mxu1 %v9274_v9  ;;  %v9284_v10 = vld [vmem:[#allocation80_spill] sm:$0xff]  ;;  %v9285_v9 = vld [vmem:[#allocation82_spill] sm:$0xff] }
 0x3ef   :  { %1585 = vmatpush1.msra.mxu1 %v9275_v35  ;;  %1576 = vmatpush2.msra.mxu0 %v9276_v14  ;;  %v9286_v35 = vld [vmem:[#allocation84_spill] sm:$0xff]  ;;  %v9287_v14 = vld [vmem:[#allocation86_spill] sm:$0xff] }
 0x3f0   :  { %1586 = vmatprep.subr.mxu1 %v9277_v55  ;;  %1655 = vmatprep.subr.mxu0 %v9278_v18  ;;  %v9288_v55 = vld [vmem:[#allocation88_spill] sm:$0xff]  ;;  %v9289_v18 = vld [vmem:[#allocation90_spill] sm:$0xff] }
 0x3f1   :  { %1587 = vmatpush1.msra.mxu1 %v9279_v63  ;;  %v9290_v63 = vld [vmem:[#allocation92_spill] sm:$0xff] }
 0x3f2   :  { %1588 = vmatprep.subr.mxu1 %v9280_v59  ;;  %v9291_v59 = vld [vmem:[#allocation58_spill] sm:$0xff] }
 0x3f3   :  { %1589 = vmatpush1.msra.mxu1 %v9281_v49  ;;  %v9292_v49 = vld [vmem:[#allocation19_spill] sm:$0xff] }
 0x3f4   :  { %1590 = vmatprep.subr.mxu1 %v9282_v3  ;;  %v9293_v3 = vld [vmem:[#allocation15_spill] sm:$0xff] }
 0x3f5   :  { %1591 = vmatpush1.msra.mxu1 %v9283_v11  ;;  %v9294_v11 = vld [vmem:[#allocation23_spill] sm:$0xff] }
 0x3f6   :  { %1592 = vmatprep.subr.mxu1 %v9284_v10  ;;  %v9295_v10 = vld [vmem:[#allocation11_spill] sm:$0xff] }
 0x3f7   :  { %1593 = vmatpush1.msra.mxu1 %v9285_v9  ;;  %v9296_v9 = vld [vmem:[#allocation69_spill] sm:$0xff] }
 0x3f8   :  { %1594 = vmatprep.subr.mxu1 %v9286_v35  ;;  %v9297_v35 = vld [vmem:[#allocation71_spill] sm:$0xff] }
 0x3f9   :  { %1595 = vmatpush1.msra.mxu1 %v9287_v14  ;;  %v9298_v14 = vld [vmem:[#allocation73_spill] sm:$0xff] }
 0x3fa   :  { %1596 = vmatprep.subr.mxu1 %v9288_v55  ;;  %v9299_v55 = vld [vmem:[#allocation75_spill] sm:$0xff] }
 0x3fb   :  { %1597 = vmatpush1.msra.mxu1 %v9289_v18  ;;  %v9300_v18 = vld [vmem:[#allocation77_spill] sm:$0xff] }
 0x3fc   :  { %1598 = vmatprep.subr.mxu1 %v9290_v63  ;;  %v9301_v63 = vld [vmem:[#allocation79_spill] sm:$0xff] }
 0x3fd   :  { %1599 = vmatpush1.msra.mxu1 %v9291_v59  ;;  %v9302_v59 = vld [vmem:[#allocation81_spill] sm:$0xff] }
 0x3fe   :  { %1600 = vmatprep.subr.mxu1 %v9292_v49  ;;  %v9303_v49 = vld [vmem:[#allocation83_spill] sm:$0xff] }
 0x3ff   :  { %1601 = vmatpush1.msra.mxu1 %v9293_v3  ;;  %v9304_v3 = vld [vmem:[#allocation85_spill] sm:$0xff] }
 0x400   :  { %1602 = vmatprep.subr.mxu1 %v9294_v11  ;;  %v9305_v11 = vld [vmem:[#allocation87_spill] sm:$0xff] }
 0x401   :  { %1603 = vmatpush1.msra.mxu1 %v9295_v10  ;;  %v9306_v10 = vld [vmem:[#allocation89_spill] sm:$0xff] }
 0x402   :  { %1604 = vmatprep.subr.mxu1 %v9296_v9  ;;  %v9307_v9 = vld [vmem:[#allocation91_spill] sm:$0xff] }
 0x403   :  { %1605 = vmatpush1.msra.mxu1 %v9297_v35  ;;  %v9308_v35 = vld [vmem:[#allocation93_spill] sm:$0xff] }
 0x404   :  { %1606 = vmatprep.subr.mxu1 %v9298_v14  ;;  %v9309_v14 = vld [vmem:[#allocation95_spill] sm:$0xff] }
 0x405   :  { %1607 = vmatpush1.msra.mxu1 %v9299_v55  ;;  %v9310_v55 = vld [vmem:[#allocation97_spill] sm:$0xff] }
 0x406   :  { %1608 = vmatprep.subr.mxu1 %v9300_v18  ;;  %v9311_v18 = vld [vmem:[#allocation99_spill] sm:$0xff] }
 0x407   :  { %1609 = vmatpush1.msra.mxu1 %v9301_v63  ;;  %v9312_v63 = vld [vmem:[#allocation101_spill] sm:$0xff] }
 0x408   :  { %1610 = vmatprep.subr.mxu1 %v9302_v59  ;;  %v9313_v59 = vld [vmem:[#allocation102_spill] sm:$0xff] }
 0x409   :  { %1611 = vmatpush1.msra.mxu1 %v9303_v49  ;;  %v9314_v49 = vld [vmem:[#allocation103_spill] sm:$0xff] }
 0x40a   :  { %1612 = vmatprep.subr.mxu1 %v9304_v3  ;;  %v9315_v3 = vld [vmem:[#allocation104_spill] sm:$0xff] }
 0x40b   :  { %1613 = vmatpush1.msra.mxu1 %v9305_v11  ;;  %v9316_v11 = vld [vmem:[#allocation105_spill] sm:$0xff] }
 0x40c   :  { %1614 = vmatprep.subr.mxu1 %v9306_v10  ;;  %v9317_v10 = vld [vmem:[#allocation106_spill] sm:$0xff] }
 0x40d   :  { %1615 = vmatpush1.msra.mxu1 %v9307_v9  ;;  %v9318_v9 = vld [vmem:[#allocation60_spill] sm:$0xff] }
 0x40e   :  { %1616 = vmatprep.subr.mxu1 %v9308_v35  ;;  %v9319_v35 = vld [vmem:[#allocation107_spill] sm:$0xff] }
 0x40f   :  { %1617 = vmatpush2.msra.mxu1 %v9309_v14  ;;  %v9320_v14 = vld [vmem:[#allocation62_spill] sm:$0xff] }
 0x410   :  { %1618 = vmatprep.subr.mxu1 %v9310_v55  ;;  %v9321_v55 = vld [vmem:[#allocation108_spill] sm:$0xff] }
 0x411   :  { %1619 = vmatpush2.msra.mxu1 %v9311_v18  ;;  %v9322_v18 = vld [vmem:[#allocation64_spill] sm:$0xff] }
 0x412   :  { %1620 = vmatprep.subr.mxu1 %v9312_v63  ;;  %v9323_v63 = vld [vmem:[#allocation66_spill] sm:$0xff] }
 0x413   :  { %1621 = vmatpush2.msra.mxu1 %v9313_v59  ;;  %v9324_v59 = vld [vmem:[#allocation68_spill] sm:$0xff] }
 0x414   :  { %1622 = vmatprep.subr.mxu1 %v9314_v49  ;;  %v9325_v49 = vld [vmem:[#allocation109_spill] sm:$0xff] }
 0x415   :  { %1623 = vmatpush2.msra.mxu1 %v9315_v3  ;;  %v9326_v3 = vld [vmem:[#allocation110_spill] sm:$0xff] }
 0x416   :  { %1624 = vmatprep.subr.mxu1 %v9316_v11  ;;  %v9327_v11 = vld [vmem:[#allocation111_spill] sm:$0xff] }
 0x417   :  { %1625 = vmatpush2.msra.mxu1 %v9317_v10  ;;  %v9328_v10 = vld [vmem:[#allocation112_spill] sm:$0xff] }
 0x418   :  { %1626 = vmatprep.subr.mxu1 %v9318_v9  ;;  %v9329_v9 = vld [vmem:[#allocation113_spill] sm:$0xff] }
 0x419   :  { %1627 = vmatpush2.msra.mxu1 %v9319_v35  ;;  %v9330_v35 = vld [vmem:[#allocation114_spill] sm:$0xff] }
 0x41a   :  { %1628 = vmatprep.subr.mxu1 %v9320_v14  ;;  %v9331_v14 = vld [vmem:[#allocation115_spill] sm:$0xff] }
 0x41b   :  { %1629 = vmatpush2.msra.mxu1 %v9321_v55  ;;  %v9332_v55 = vld [vmem:[#allocation116_spill] sm:$0xff] }
 0x41c   :  { %1630 = vmatprep.subr.mxu1 %v9322_v18  ;;  %v9333_v18 = vld [vmem:[#allocation117_spill] sm:$0xff] }
 0x41d   :  { %1631 = vmatpush2.msra.mxu1 %v9323_v63  ;;  %v9334_v63 = vld [vmem:[#allocation118_spill] sm:$0xff] }
 0x41e   :  { %1632 = vmatprep.subr.mxu1 %v9324_v59  ;;  %v9335_v59 = vld [vmem:[#allocation119_spill] sm:$0xff] }
 0x41f   :  { %1633 = vmatpush2.msra.mxu1 %v9325_v49  ;;  %v9336_v49 = vld [vmem:[#allocation156_spill] sm:$0xff] }
 0x420   :  { %1634 = vmatprep.subr.mxu1 %v9326_v3  ;;  %v9337_v3 = vld [vmem:[#allocation157_spill] sm:$0xff] }
 0x421   :  { %1635 = vmatpush2.msra.mxu1 %v9327_v11  ;;  %v9338_v11 = vld [vmem:[#allocation158_spill] sm:$0xff] }
 0x422   :  { %1636 = vmatprep.subr.mxu1 %v9328_v10  ;;  %v9339_v10 = vld [vmem:[#allocation159_spill] sm:$0xff] }
 0x423   :  { %1637 = vmatpush2.msra.mxu1 %v9329_v9  ;;  %v9340_v9 = vld [vmem:[#allocation160_spill] sm:$0xff] }
 0x424   :  { %1638 = vmatprep.subr.mxu1 %v9330_v35 }
 0x425   :  { %1639 = vmatpush2.msra.mxu1 %v9331_v14 }
 0x426   :  { %1640 = vmatprep.subr.mxu1 %v9332_v55 }
 0x427   :  { %1641 = vmatpush2.msra.mxu1 %v9333_v18 }
 0x428   :  { %1642 = vmatprep.subr.mxu1 %v9334_v63 }
 0x429   :  { %1643 = vmatpush2.msra.mxu1 %v9335_v59 }
 0x42a   :  { %1644 = vmatprep.subr.mxu1 %v9336_v49 }
 0x42b   :  { %1645 = vmatpush2.msra.mxu1 %v9337_v3  ;;  %v2759_v3 = vld [vmem:[%s8032_s0 + $0x3] ss:$8 sm:$0xf] }
 0x42c   :  { %1646 = vmatprep.subr.mxu1 %v9338_v11 }
 0x42d   :  { %1647 = vmatpush2.msra.mxu1 %v9339_v10  ;;  %v2760_v10 = vld [vmem:[%s8032_s0 + $0x3] ss:$8 sm:$0x30] }
 0x42e   :  { %1824 = vmatprep.subr.mxu1 %v9340_v9  ;;  %v1190_v49 = vor.u32 %v2760_v10, %v2759_v3 }
 0x46e   :  { %v1268_v35 = vpop.f32.mrf.mxu1  ;;  %v1339_v63 = vpop.f32.mrf.mxu0 }
 0x46f   :  { %v1269_v18 = vadd.f32 %v1268_v35, %v9342_v5  ;;  %v1340_v35 = vadd.f32 %v1339_v63, %v4619_v42 }
 0x470   :  { %v1270_v14 = vpop.f32.mrf.mxu1  ;;  %v1341_v11 = vpop.f32.mrf.mxu0 }
 0x471   :  { %v1271_v55 = vadd.f32 %v1270_v14, %v9341_v6  ;;  %v1342_v14 = vadd.f32 %v1341_v11, %v4621_v52  ;;  %v1441_v6 = vrot.slane %v1190_v49, 2 }
 0x473   :  { %v1417_v0 = vcombine.low %v1269_v18, %v1271_v55  ;;  %v1445_v18 = vcombine.low %v1340_v35, %v1342_v14 }
 0x475   :  { %v1424_v59 = vrot.slane %v1417_v0, %v4608_v47  ;;  %v1452_v0 = vrot.slane %v1445_v18, %v4608_v47 }
 0x477   :  { %v1431_v9 = vrot.slane %v1424_v59, %v4608_v47  ;;  %v1459_v12 = vrot.slane %v1452_v0, %v4608_v47 }
 0x479   :  { %v1433_v55 = vadd.f32 %v1431_v9, %v1190_v49  ;;  %v1461_v13 = vadd.f32 %v1459_v12, %v1441_v6 }
 0x47b   :  { %v2761_v5 = vmul.f32 -1.442695, %v1433_v55  ;;  %v2762_v8 = vmul.f32 -1.442695, %v1461_v13  ;;  %v1487_v55 = vrot.slane %v1190_v49, 4 }
 0x47d   :  { %2815 = vpow2.f32 %v2761_v5 }
 0x47e   :  { %2817 = vpow2.f32 %v2762_v8 }
 0x48a   :  { %v2816_v48 = vpop.eup %2815 }
 0x48b   :  { %v1437_v39 = vadd.f32 1.0, %v2816_v48  ;;  %v2818_v63 = vpop.eup %2817 }
 0x48c   :  { %v1465_v14 = vadd.f32 1.0, %v2818_v63  ;;  %v9368_v63 = vld [vmem:[#allocation126_spill] sm:$0xff] }
 0x48d   :  { %2819 = vrcp.f32 %v1437_v39 }
 0x48e   :  { %2821 = vrcp.f32 %v1465_v14  ;;  %v9370_v14 = vld [vmem:[#allocation127_spill] sm:$0xff] }
 0x49a   :  { %v2820_v12 = vpop.eup %2819 }
 0x49b   :  { %v2822_v39 = vpop.eup %2821 }
 0x49c   :  { %v1491_v48 = vsub.f32 1.0, %v2822_v39  ;;  %v1493_v0 = vmul.f32 %v2822_v39, %v6055_v4  ;;  %v6304_v4 = vld [vmem:[%s8029_s2 + $0x2d0] sm:$0xff]  ;;  %v6591_v39 = vld [vmem:[%s8029_s2 + $0x4e8] sm:$0xff] }
 0x49d   :  { %9377 = vst [vmem:[#allocation120_spill] sm:$0xff] %v6591_v39 }
 0x4ae   :  { %v1410_v3 = vpop.f32.mrf.mxu1 }
 0x4af   :  { %v1411_v11 = vadd.f32 %v1410_v3, %v9053_v58 }
 0x4b0   :  { %v1412_v10 = vpop.f32.mrf.mxu1 }
 0x4b1   :  { %v1413_v9 = vadd.f32 %v1412_v10, %v4632_v19 }
 0x4b3   :  { %v1470_v59 = vcombine.low %v1411_v11, %v1413_v9  ;;  %v6311_v11 = vld [vmem:[%s8029_s2 + $0x2a8] sm:$0xff]  ;;  %v9366_v9 = vld [vmem:[#allocation125_spill] sm:$0xff] }
 0x4b5   :  { %v1477_v5 = vrot.slane %v1470_v59, %v4608_v47  ;;  %v6563_v59 = vld [vmem:[%s8029_s2 + $0x548] sm:$0xff] }
 0x4b6   :  { %9369 = vst [vmem:[#allocation33_spill] sm:$0xff] %v6563_v59 }
 0x4b7   :  { %v1484_v35 = vrot.slane %v1477_v5, %v4608_v47  ;;  %v6570_v5 = vld [vmem:[%s8029_s2 + $0x540] sm:$0xff] }
 0x4b8   :  { %9371 = vst [vmem:[#allocation16_spill] sm:$0xff] %v6570_v5 }
 0x4b9   :  { %v1486_v13 = vmul.f32 %v2820_v12, %v1484_v35  ;;  %v9372_v35 = vld [vmem:[#allocation128_spill] sm:$0xff]  ;;  %v9374_v12 = vld [vmem:[#allocation129_spill] sm:$0xff] }
 0x4bb   :  { %v1489_v8 = vadd.f32 %v1487_v55, %v1486_v13  ;;  %v6577_v55 = vld [vmem:[%s8029_s2 + $0x518] sm:$0xff]  ;;  %v6584_v13 = vld [vmem:[%s8029_s2 + $0x510] sm:$0xff] }
 0x4bc   :  { %9373 = vst [vmem:[#allocation4_spill] sm:$0xff] %v6577_v55  ;;  %9375 = vst [vmem:[#allocation57_spill] sm:$0xff] %v6584_v13 }
 0x4bd   :  { %2823 = vtanh.f32 %v1489_v8  ;;  %v9376_v8 = vld [vmem:[#allocation130_spill] sm:$0xff] }
 0x4ca   :  { %v2824_v6 = vpop.eup %2823 }
 0x4cb   :  { %v1492_v18 = vmul.f32 %v2824_v6, %v1491_v48  ;;  %v9378_v48 = vld [vmem:[#allocation131_spill] sm:$0xff] }
 0x4cc   :  { %v6598_v6 = vld [vmem:[%s8029_s2 + $0x4e0] sm:$0xff] }
 0x4cd   :  { %v6283_v3 = vadd.f32 %v1493_v0, %v1492_v18  ;;  %9379 = vst [vmem:[#allocation17_spill] sm:$0xff] %v6598_v6  ;;  %v9380_v18 = vld [vmem:[#allocation132_spill] sm:$0xff]  ;;  %v6605_v0 = vld [vmem:[%s8029_s2 + $0x4b8] sm:$0xff] }
 0x4ce   :  { %9381 = vst [vmem:[#allocation121_spill] sm:$0xff] %v6605_v0 }
 0x4cf   :  { %2763 = vst.msk [vmem:[%s8033_s4 + $0x3] ss:$8 sm:$0x3] %vm3516_vm0, %v6283_v3  ;;  %v1510_v49 = vrot.slane %v6283_v3, %v8902_v54  ;;  %v6295_v10 = vrot.slane %v6283_v3, %v8900_v37 }
 0x4d1   :  { %1577 = vmatprep.mubr.f32.mxu0 %v1510_v49  ;;  %1648 = vmatprep.mubr.f32.mxu1 %v1510_v49 }
 0x4d2   :  { %1578 = vmatmul.mubr.f32.vlgmr.msra.gmra.mxu0 %v6295_v10  ;;  %1649 = vmatmul.mubr.f32.vlgmr.msra.gmra.mxu1 %v6295_v10 }
 0x4d3   :  { %1656 = vmatpush1.msra.mxu0 %v5481_v32  ;;  %1719 = vmatprep.mubr.f32.mxu0 %v1510_v49  ;;  %v6318_v32 = vld [vmem:[%s8029_s2 + $0x2a0] sm:$0xff]  ;;  %v9382_v49 = vld [vmem:[#allocation133_spill] sm:$0xff] }
 0x4d4   :  { %1657 = vmatprep.subr.mxu0 %v5487_v25  ;;  %1825 = vmatpush1.msra.mxu1 %v6304_v4  ;;  %v6325_v25 = vld [vmem:[%s8029_s2 + $0x278] sm:$0xff] }
 0x4d5   :  { %1658 = vmatpush1.msra.mxu0 %v5494_v45  ;;  %1826 = vmatprep.subr.mxu1 %v6311_v11  ;;  %v6332_v45 = vld [vmem:[%s8029_s2 + $0x270] sm:$0xff] }
 0x4d6   :  { %1659 = vmatprep.subr.mxu0 %v5501_v53  ;;  %1827 = vmatpush1.msra.mxu1 %v6318_v32  ;;  %v6339_v53 = vld [vmem:[%s8029_s2 + $0x248] sm:$0xff] }
 0x4d7   :  { %1660 = vmatpush1.msra.mxu0 %v5508_v43  ;;  %1828 = vmatprep.subr.mxu1 %v6325_v25  ;;  %v6346_v43 = vld [vmem:[%s8029_s2 + $0x240] sm:$0xff] }
 0x4d8   :  { %1661 = vmatprep.subr.mxu0 %v5515_v31  ;;  %1829 = vmatpush1.msra.mxu1 %v6332_v45  ;;  %v6353_v31 = vld [vmem:[%s8029_s2 + $0x218] sm:$0xff] }
 0x4d9   :  { %1662 = vmatpush1.msra.mxu0 %v5522_v29  ;;  %1830 = vmatprep.subr.mxu1 %v6339_v53  ;;  %v6360_v29 = vld [vmem:[%s8029_s2 + $0x210] sm:$0xff] }
 0x4da   :  { %1663 = vmatprep.subr.mxu0 %v5529_v34  ;;  %1831 = vmatpush1.msra.mxu1 %v6346_v43  ;;  %v6367_v34 = vld [vmem:[%s8029_s2 + $0x1e8] sm:$0xff] }
 0x4db   :  { %1664 = vmatpush1.msra.mxu0 %v5536_v22  ;;  %1832 = vmatprep.subr.mxu1 %v6353_v31  ;;  %v6374_v22 = vld [vmem:[%s8029_s2 + $0x1e0] sm:$0xff] }
 0x4dc   :  { %1665 = vmatprep.subr.mxu0 %v5543_v20  ;;  %1833 = vmatpush1.msra.mxu1 %v6360_v29  ;;  %v6381_v20 = vld [vmem:[%s8029_s2 + $0x1b8] sm:$0xff] }
 0x4dd   :  { %1666 = vmatpush1.msra.mxu0 %v5550_v17  ;;  %1834 = vmatprep.subr.mxu1 %v6367_v34  ;;  %v6388_v17 = vld [vmem:[%s8029_s2 + $0x1b0] sm:$0xff] }
 0x4de   :  { %1667 = vmatprep.subr.mxu0 %v9185_v57  ;;  %1835 = vmatpush1.msra.mxu1 %v6374_v22  ;;  %v6500_v57 = vld [vmem:[%s8029_s2 + $0x30] sm:$0xff] }
 0x4df   :  { %1668 = vmatpush1.msra.mxu0 %v5564_v38  ;;  %1836 = vmatprep.subr.mxu1 %v6381_v20  ;;  %v6395_v38 = vld [vmem:[%s8029_s2 + $0x188] sm:$0xff]  ;;  %9357 = vst [vmem:[#allocation12_spill] sm:$0xff] %v6500_v57 }
 0x4e0   :  { %1669 = vmatprep.subr.mxu0 %v5571_v36  ;;  %1837 = vmatpush1.msra.mxu1 %v6388_v17  ;;  %v6402_v36 = vld [vmem:[%s8029_s2 + $0x180] sm:$0xff] }
 0x4e1   :  { %1670 = vmatpush1.msra.mxu0 %v5578_v16  ;;  %1838 = vmatprep.subr.mxu1 %v6395_v38  ;;  %9343 = vst [vmem:[#allocation94_spill] sm:$0xff] %v6402_v36  ;;  %v6409_v16 = vld [vmem:[%s8029_s2 + $0x158] sm:$0xff] }
 0x4e2   :  { %1671 = vmatprep.subr.mxu0 %v5585_v27  ;;  %1839 = vmatpush1.msra.mxu1 %v6402_v36  ;;  %9344 = vst [vmem:[#allocation37_spill] sm:$0xff] %v6409_v16  ;;  %v6416_v27 = vld [vmem:[%s8029_s2 + $0x150] sm:$0xff] }
 0x4e3   :  { %1672 = vmatpush1.msra.mxu0 %v5592_v40  ;;  %1840 = vmatprep.subr.mxu1 %v6409_v16  ;;  %9345 = vst [vmem:[#allocation5_spill] sm:$0xff] %v6416_v27  ;;  %v6423_v40 = vld [vmem:[%s8029_s2 + $0x128] sm:$0xff] }
 0x4e4   :  { %1673 = vmatprep.subr.mxu0 %v5599_v15  ;;  %1841 = vmatpush1.msra.mxu1 %v6416_v27  ;;  %9346 = vst [vmem:[#allocation39_spill] sm:$0xff] %v6423_v40  ;;  %v6430_v15 = vld [vmem:[%s8029_s2 + $0x120] sm:$0xff] }
 0x4e5   :  { %1674 = vmatpush1.msra.mxu0 %v5606_v60  ;;  %1842 = vmatprep.subr.mxu1 %v6423_v40  ;;  %9347 = vst [vmem:[#allocation6_spill] sm:$0xff] %v6430_v15  ;;  %v6437_v60 = vld [vmem:[%s8029_s2 + $0xf8] sm:$0xff] }
 0x4e6   :  { %1675 = vmatprep.subr.mxu0 %v5613_v61  ;;  %1843 = vmatpush1.msra.mxu1 %v6430_v15  ;;  %9348 = vst [vmem:[#allocation41_spill] sm:$0xff] %v6437_v60  ;;  %v6444_v61 = vld [vmem:[%s8029_s2 + $0xf0] sm:$0xff] }
 0x4e7   :  { %1676 = vmatpush1.msra.mxu0 %v5620_v33  ;;  %1844 = vmatprep.subr.mxu1 %v6437_v60  ;;  %9349 = vst [vmem:[#allocation7_spill] sm:$0xff] %v6444_v61  ;;  %v6451_v33 = vld [vmem:[%s8029_s2 + $0xc8] sm:$0xff] }
 0x4e8   :  { %1677 = vmatprep.subr.mxu0 %v5627_v41  ;;  %1845 = vmatpush1.msra.mxu1 %v6444_v61  ;;  %9350 = vst [vmem:[#allocation43_spill] sm:$0xff] %v6451_v33  ;;  %v6458_v41 = vld [vmem:[%s8029_s2 + $0xc0] sm:$0xff] }
 0x4e9   :  { %1678 = vmatpush1.msra.mxu0 %v5634_v23  ;;  %1846 = vmatprep.subr.mxu1 %v6451_v33  ;;  %9351 = vst [vmem:[#allocation8_spill] sm:$0xff] %v6458_v41  ;;  %v6465_v23 = vld [vmem:[%s8029_s2 + $0x98] sm:$0xff] }
 0x4ea   :  { %1679 = vmatprep.subr.mxu0 %v5641_v46  ;;  %1847 = vmatpush1.msra.mxu1 %v6458_v41  ;;  %9352 = vst [vmem:[#allocation45_spill] sm:$0xff] %v6465_v23  ;;  %v6472_v46 = vld [vmem:[%s8029_s2 + $0x90] sm:$0xff] }
 0x4eb   :  { %1680 = vmatpush1.msra.mxu0 %v5648_v26  ;;  %1848 = vmatprep.subr.mxu1 %v6465_v23  ;;  %9353 = vst [vmem:[#allocation9_spill] sm:$0xff] %v6472_v46  ;;  %v6479_v26 = vld [vmem:[%s8029_s2 + $0x68] sm:$0xff] }
 0x4ec   :  { %1681 = vmatprep.subr.mxu0 %v5655_v50  ;;  %1849 = vmatpush1.msra.mxu1 %v6472_v46  ;;  %9354 = vst [vmem:[#allocation47_spill] sm:$0xff] %v6479_v26  ;;  %v6486_v50 = vld [vmem:[%s8029_s2 + $0x60] sm:$0xff] }
 0x4ed   :  { %1682 = vmatpush1.msra.mxu0 %v5662_v28  ;;  %1850 = vmatprep.subr.mxu1 %v6479_v26  ;;  %9355 = vst [vmem:[#allocation10_spill] sm:$0xff] %v6486_v50  ;;  %v6493_v28 = vld [vmem:[%s8029_s2 + $0x38] sm:$0xff] }
 0x4ee   :  { %1683 = vmatprep.subr.mxu0 %v9202_v7  ;;  %1851 = vmatpush1.msra.mxu1 %v6486_v50  ;;  %9356 = vst [vmem:[#allocation49_spill] sm:$0xff] %v6493_v28  ;;  %v6507_v7 = vld [vmem:[%s8029_s2 + $0x8] sm:$0xff] }
 0x4ef   :  { %1684 = vmatpush1.msra.mxu0 %v9204_v1  ;;  %1852 = vmatprep.subr.mxu1 %v6493_v28  ;;  %9358 = vst [vmem:[#allocation51_spill] sm:$0xff] %v6507_v7  ;;  %v6514_v1 = vld [vmem:[%s8029_s2] sm:$0xff] }
 0x4f0   :  { %1685 = vmatprep.subr.mxu0 %v9206_v56  ;;  %1853 = vmatpush1.msra.mxu1 %v6500_v57  ;;  %9359 = vst [vmem:[#allocation13_spill] sm:$0xff] %v6514_v1  ;;  %v6521_v56 = vld [vmem:[%s8029_s2 + $0x5d8] sm:$0xff] }
 0x4f1   :  { %1686 = vmatpush1.msra.mxu0 %v9208_v30  ;;  %1854 = vmatprep.subr.mxu1 %v6507_v7  ;;  %9360 = vst [vmem:[#allocation96_spill] sm:$0xff] %v6521_v56  ;;  %v6528_v30 = vld [vmem:[%s8029_s2 + $0x5d0] sm:$0xff] }
 0x4f2   :  { %1687 = vmatprep.subr.mxu0 %v9210_v51  ;;  %1855 = vmatpush1.msra.mxu1 %v6514_v1  ;;  %9361 = vst [vmem:[#allocation53_spill] sm:$0xff] %v6528_v30  ;;  %v6535_v51 = vld [vmem:[%s8029_s2 + $0x5a8] sm:$0xff] }
 0x4f3   :  { %1688 = vmatpush2.msra.mxu0 %v9212_v2  ;;  %1856 = vmatprep.subr.mxu1 %v6521_v56  ;;  %9362 = vst [vmem:[#allocation98_spill] sm:$0xff] %v6535_v51  ;;  %v6542_v2 = vld [vmem:[%s8029_s2 + $0x5a0] sm:$0xff] }
 0x4f4   :  { %1689 = vmatprep.subr.mxu0 %v9214_v44  ;;  %1857 = vmatpush2.msra.mxu1 %v6528_v30  ;;  %9363 = vst [vmem:[#allocation14_spill] sm:$0xff] %v6542_v2  ;;  %v9364_v44 = vld [vmem:[#allocation124_spill] sm:$0xff] }
 0x4f5   :  { %1690 = vmatpush2.msra.mxu0 %v9216_v24  ;;  %1858 = vmatprep.subr.mxu1 %v6535_v51  ;;  %v6549_v24 = vld [vmem:[%s8029_s2 + $0x578] sm:$0xff] }
 0x4f6   :  { %1691 = vmatprep.subr.mxu0 %v9218_v21  ;;  %1859 = vmatpush2.msra.mxu1 %v6542_v2  ;;  %9365 = vst [vmem:[#allocation100_spill] sm:$0xff] %v6549_v24  ;;  %v6556_v21 = vld [vmem:[%s8029_s2 + $0x570] sm:$0xff] }
 0x4f7   :  { %1692 = vmatpush2.msra.mxu0 %v9364_v44  ;;  %1860 = vmatprep.subr.mxu1 %v6549_v24  ;;  %9367 = vst [vmem:[#allocation55_spill] sm:$0xff] %v6556_v21  ;;  %v6612_v44 = vld [vmem:[%s8029_s2 + $0x4b0] sm:$0xff] }
 0x4f8   :  { %1693 = vmatprep.subr.mxu0 %v9366_v9  ;;  %1861 = vmatpush2.msra.mxu1 %v6556_v21  ;;  %9383 = vst [vmem:[#allocation18_spill] sm:$0xff] %v6612_v44  ;;  %v9384_v9 = vld [vmem:[#allocation134_spill] sm:$0xff] }
 0x4f9   :  { %1694 = vmatpush2.msra.mxu0 %v9368_v63  ;;  %1862 = vmatprep.subr.mxu1 %v6563_v59  ;;  %v6619_v63 = vld [vmem:[%s8029_s2 + $0x488] sm:$0xff] }
 0x4fa   :  { %1695 = vmatprep.subr.mxu0 %v9370_v14  ;;  %1863 = vmatpush2.msra.mxu1 %v6570_v5  ;;  %9385 = vst [vmem:[#allocation122_spill] sm:$0xff] %v6619_v63  ;;  %v9386_v14 = vld [vmem:[#allocation135_spill] sm:$0xff] }
 0x4fb   :  { %1696 = vmatpush2.msra.mxu0 %v9372_v35  ;;  %1864 = vmatprep.subr.mxu1 %v6577_v55  ;;  %v6626_v35 = vld [vmem:[%s8029_s2 + $0x480] sm:$0xff] }
 0x4fc   :  { %1697 = vmatprep.subr.mxu0 %v9374_v12  ;;  %1865 = vmatpush2.msra.mxu1 %v6584_v13  ;;  %9387 = vst [vmem:[#allocation20_spill] sm:$0xff] %v6626_v35  ;;  %v9388_v12 = vld [vmem:[#allocation136_spill] sm:$0xff] }
 0x4fd   :  { %1698 = vmatpush2.msra.mxu0 %v9376_v8  ;;  %1866 = vmatprep.subr.mxu1 %v6591_v39  ;;  %v6633_v8 = vld [vmem:[%s8029_s2 + $0x458] sm:$0xff] }
 0x4fe   :  { %1699 = vmatprep.subr.mxu0 %v9378_v48  ;;  %1867 = vmatpush2.msra.mxu1 %v6598_v6  ;;  %9389 = vst [vmem:[#allocation123_spill] sm:$0xff] %v6633_v8  ;;  %v9390_v48 = vld [vmem:[#allocation137_spill] sm:$0xff] }
 0x4ff   :  { %1700 = vmatpush2.msra.mxu0 %v9380_v18  ;;  %1868 = vmatprep.subr.mxu1 %v6605_v0  ;;  %v6640_v18 = vld [vmem:[%s8029_s2 + $0x450] sm:$0xff] }
 0x500   :  { %1701 = vmatprep.subr.mxu0 %v9382_v49  ;;  %1869 = vmatpush2.msra.mxu1 %v6612_v44  ;;  %9391 = vst [vmem:[#allocation21_spill] sm:$0xff] %v6640_v18  ;;  %v9392_v49 = vld [vmem:[#allocation138_spill] sm:$0xff]  ;;  %v9486_v44 = vld [vmem:[#allocation3_spill] sm:$0xff] }
 0x501   :  { %1702 = vmatpush2.msra.mxu0 %v9384_v9  ;;  %1870 = vmatprep.subr.mxu1 %v6619_v63  ;;  %v6647_v9 = vld [vmem:[%s8029_s2 + $0x428] sm:$0xff] }
 0x502   :  { %1703 = vmatprep.subr.mxu0 %v9386_v14  ;;  %1871 = vmatpush2.msra.mxu1 %v6626_v35  ;;  %9393 = vst [vmem:[#allocation22_spill] sm:$0xff] %v6647_v9  ;;  %v9394_v14 = vld [vmem:[#allocation139_spill] sm:$0xff]  ;;  %v9416_v35 = vld [vmem:[#allocation152_spill] sm:$0xff] }
 0x503   :  { %1704 = vmatpush2.msra.mxu0 %v9388_v12  ;;  %1872 = vmatprep.subr.mxu1 %v6633_v8  ;;  %v6654_v12 = vld [vmem:[%s8029_s2 + $0x420] sm:$0xff] }
 0x504   :  { %1705 = vmatprep.subr.mxu0 %v9390_v48  ;;  %1873 = vmatpush2.msra.mxu1 %v6640_v18  ;;  %9395 = vst [vmem:[#allocation24_spill] sm:$0xff] %v6654_v12  ;;  %v9396_v48 = vld [vmem:[#allocation140_spill] sm:$0xff]  ;;  %v9398_v18 = vld [vmem:[#allocation141_spill] sm:$0xff]  ;;  %v9415_v8 = vld [vmem:[#allocation151_spill] sm:$0xff] }
 0x505   :  { %1706 = vmatpush2.msra.mxu0 %v9392_v49  ;;  %1874 = vmatprep.subr.mxu1 %v6647_v9  ;;  %v6661_v49 = vld [vmem:[%s8029_s2 + $0x3f8] sm:$0xff] }
 0x506   :  { %1707 = vmatprep.subr.mxu0 %v9394_v14  ;;  %1875 = vmatpush2.msra.mxu1 %v6654_v12  ;;  %9397 = vst [vmem:[#allocation25_spill] sm:$0xff] %v6661_v49  ;;  %v6668_v14 = vld [vmem:[%s8029_s2 + $0x3f0] sm:$0xff]  ;;  %v9400_v9 = vld [vmem:[#allocation142_spill] sm:$0xff]  ;;  %v9402_v12 = vld [vmem:[#allocation143_spill] sm:$0xff] }
 0x507   :  { %1708 = vmatpush2.msra.mxu0 %v9396_v48  ;;  %1876 = vmatprep.subr.mxu1 %v6661_v49  ;;  %9399 = vst [vmem:[#allocation26_spill] sm:$0xff] %v6668_v14  ;;  %v6675_v48 = vld [vmem:[%s8029_s2 + $0x3c8] sm:$0xff] }
 0x508   :  { %1709 = vmatprep.subr.mxu0 %v9398_v18  ;;  %1877 = vmatpush2.msra.mxu1 %v6668_v14  ;;  %9401 = vst [vmem:[#allocation27_spill] sm:$0xff] %v6675_v48  ;;  %v6682_v18 = vld [vmem:[%s8029_s2 + $0x3c0] sm:$0xff]  ;;  %v9404_v49 = vld [vmem:[#allocation144_spill] sm:$0xff]  ;;  %v9406_v14 = vld [vmem:[#allocation145_spill] sm:$0xff] }
 0x509   :  { %1710 = vmatpush2.msra.mxu0 %v9400_v9  ;;  %1878 = vmatprep.subr.mxu1 %v6675_v48  ;;  %9403 = vst [vmem:[#allocation28_spill] sm:$0xff] %v6682_v18  ;;  %v6689_v9 = vld [vmem:[%s8029_s2 + $0x398] sm:$0xff] }
 0x50a   :  { %1711 = vmatprep.subr.mxu0 %v9402_v12  ;;  %1879 = vmatpush2.msra.mxu1 %v6682_v18  ;;  %9405 = vst [vmem:[#allocation29_spill] sm:$0xff] %v6689_v9  ;;  %v6696_v12 = vld [vmem:[%s8029_s2 + $0x390] sm:$0xff]  ;;  %v9408_v48 = vld [vmem:[#allocation146_spill] sm:$0xff]  ;;  %v9410_v18 = vld [vmem:[#allocation147_spill] sm:$0xff] }
 0x50b   :  { %1712 = vmatpush2.msra.mxu0 %v9404_v49  ;;  %1880 = vmatprep.subr.mxu1 %v6689_v9  ;;  %9407 = vst [vmem:[#allocation30_spill] sm:$0xff] %v6696_v12  ;;  %v6703_v49 = vld [vmem:[%s8029_s2 + $0x368] sm:$0xff] }
 0x50c   :  { %1713 = vmatprep.subr.mxu0 %v9406_v14  ;;  %1881 = vmatpush2.msra.mxu1 %v6696_v12  ;;  %9409 = vst [vmem:[#allocation31_spill] sm:$0xff] %v6703_v49  ;;  %v6710_v14 = vld [vmem:[%s8029_s2 + $0x360] sm:$0xff]  ;;  %v9412_v9 = vld [vmem:[#allocation148_spill] sm:$0xff]  ;;  %v9413_v12 = vld [vmem:[#allocation149_spill] sm:$0xff] }
 0x50d   :  { %1714 = vmatpush2.msra.mxu0 %v9408_v48  ;;  %1882 = vmatprep.subr.mxu1 %v6703_v49  ;;  %9411 = vst [vmem:[#allocation32_spill] sm:$0xff] %v6710_v14  ;;  %v9414_v48 = vld [vmem:[#allocation150_spill] sm:$0xff]  ;;  %v9417_v49 = vld [vmem:[#allocation153_spill] sm:$0xff] }
 0x50e   :  { %1715 = vmatprep.subr.mxu0 %v9410_v18  ;;  %1883 = vmatpush2.msra.mxu1 %v6710_v14  ;;  %v6723_v18 = vld [vmem:[%s8029_s2 + $0x2e8] sm:$0xff] }
 0x50f   :  { %1716 = vmatpush2.msra.mxu0 %v9412_v9  ;;  %1884 = vmatprep.subr.mxu1 %v9413_v12  ;;  %9418 = vst [vmem:[#allocation34_spill] sm:$0xff] %v6723_v18  ;;  %v6729_v9 = vld [vmem:[%s8029_s2 + $0x2e0] sm:$0xff]  ;;  %v6743_v12 = vld [vmem:[%s8029_s2 + $0x2b0] sm:$0xff] }
 0x510   :  { %1717 = vmatprep.subr.mxu0 %v9414_v48  ;;  %1885 = vmatpush2.msra.mxu1 %v9415_v8  ;;  %9419 = vst [vmem:[#allocation36_spill] sm:$0xff] %v6729_v9  ;;  %v9420_v8 = vld [vmem:[#allocation154_spill] sm:$0xff]  ;;  %9423 = vst [vmem:[#allocation40_spill] sm:$0xff] %v6743_v12 }
 0x511   :  { %1718 = vmatpush2.msra.mxu0 %v9416_v35  ;;  %1886 = vmatprep.subr.mxu1 %v9417_v49  ;;  %v9422_v35 = vld [vmem:[#allocation155_spill] sm:$0xff] }
 0x512   :  { %1720 = vmatmul.mubr.f32.vlgmr.msra.gmra.mxu0 %v6295_v10  ;;  %1895 = vmatprep.subr.mxu0 %v6723_v18  ;;  %v6736_v10 = vld [vmem:[%s8029_s2 + $0x2b8] sm:$0xff]  ;;  %v6749_v49 = vld [vmem:[%s8029_s2 + $0x288] sm:$0xff]  ;;  %v6755_v48 = vld [vmem:[%s8029_s2 + $0x280] sm:$0xff] }
 0x513   :  { %1896 = vmatpush1.msra.mxu0 %v6729_v9  ;;  %1887 = vmatpush2.msra.mxu1 %v9420_v8  ;;  %9421 = vst [vmem:[#allocation38_spill] sm:$0xff] %v6736_v10  ;;  %9424 = vst [vmem:[#allocation42_spill] sm:$0xff] %v6749_v49  ;;  %v6761_v8 = vld [vmem:[%s8029_s2 + $0x258] sm:$0xff]  ;;  %v9484_v9 = vld [vmem:[#allocation160_spill] sm:$0xff] }
 0x514   :  { %1897 = vmatprep.subr.mxu0 %v6736_v10  ;;  %1966 = vmatprep.subr.mxu1 %v9422_v35  ;;  %9425 = vst [vmem:[#allocation44_spill] sm:$0xff] %v6755_v48  ;;  %9426 = vst [vmem:[#allocation46_spill] sm:$0xff] %v6761_v8  ;;  %v6767_v35 = vld [vmem:[%s8029_s2 + $0x250] sm:$0xff]  ;;  %v9482_v10 = vld [vmem:[#allocation158_spill] sm:$0xff] }
 0x515   :  { %1898 = vmatpush1.msra.mxu0 %v6743_v12  ;;  %9427 = vst [vmem:[#allocation48_spill] sm:$0xff] %v6767_v35  ;;  %v9481_v12 = vld [vmem:[#allocation157_spill] sm:$0xff] }
 0x516   :  { %1899 = vmatprep.subr.mxu0 %v6749_v49  ;;  %v6773_v49 = vld [vmem:[%s8029_s2 + $0x228] sm:$0xff] }
 0x517   :  { %1900 = vmatpush1.msra.mxu0 %v6755_v48  ;;  %9428 = vst [vmem:[#allocation50_spill] sm:$0xff] %v6773_v49  ;;  %v6779_v48 = vld [vmem:[%s8029_s2 + $0x220] sm:$0xff] }
 0x518   :  { %1901 = vmatprep.subr.mxu0 %v6761_v8  ;;  %9429 = vst [vmem:[#allocation52_spill] sm:$0xff] %v6779_v48  ;;  %v6785_v8 = vld [vmem:[%s8029_s2 + $0x1f8] sm:$0xff] }
 0x519   :  { %1902 = vmatpush1.msra.mxu0 %v6767_v35  ;;  %9430 = vst [vmem:[#allocation54_spill] sm:$0xff] %v6785_v8  ;;  %v6791_v35 = vld [vmem:[%s8029_s2 + $0x1f0] sm:$0xff] }
 0x51a   :  { %1903 = vmatprep.subr.mxu0 %v6773_v49  ;;  %9431 = vst [vmem:[#allocation56_spill] sm:$0xff] %v6791_v35  ;;  %v6797_v49 = vld [vmem:[%s8029_s2 + $0x1c8] sm:$0xff] }
 0x51b   :  { %1904 = vmatpush1.msra.mxu0 %v6779_v48  ;;  %9432 = vst [vmem:[#allocation59_spill] sm:$0xff] %v6797_v49  ;;  %v6803_v48 = vld [vmem:[%s8029_s2 + $0x1c0] sm:$0xff] }
 0x51c   :  { %1905 = vmatprep.subr.mxu0 %v6785_v8  ;;  %9433 = vst [vmem:[#allocation61_spill] sm:$0xff] %v6803_v48  ;;  %v6809_v8 = vld [vmem:[%s8029_s2 + $0x198] sm:$0xff] }
 0x51d   :  { %1906 = vmatpush1.msra.mxu0 %v6791_v35  ;;  %9434 = vst [vmem:[#allocation63_spill] sm:$0xff] %v6809_v8  ;;  %v6815_v35 = vld [vmem:[%s8029_s2 + $0x190] sm:$0xff] }
 0x51e   :  { %1907 = vmatprep.subr.mxu0 %v6797_v49  ;;  %9435 = vst [vmem:[#allocation65_spill] sm:$0xff] %v6815_v35  ;;  %v6821_v49 = vld [vmem:[%s8029_s2 + $0x168] sm:$0xff] }
 0x51f   :  { %1908 = vmatpush1.msra.mxu0 %v6803_v48  ;;  %9436 = vst [vmem:[#allocation67_spill] sm:$0xff] %v6821_v49  ;;  %v6827_v48 = vld [vmem:[%s8029_s2 + $0x160] sm:$0xff] }
 0x520   :  { %1909 = vmatprep.subr.mxu0 %v6809_v8  ;;  %9437 = vst [vmem:[#allocation70_spill] sm:$0xff] %v6827_v48  ;;  %v6833_v8 = vld [vmem:[%s8029_s2 + $0x138] sm:$0xff] }
 0x521   :  { %1910 = vmatpush1.msra.mxu0 %v6815_v35  ;;  %9438 = vst [vmem:[#allocation72_spill] sm:$0xff] %v6833_v8  ;;  %v6839_v35 = vld [vmem:[%s8029_s2 + $0x130] sm:$0xff] }
 0x522   :  { %1911 = vmatprep.subr.mxu0 %v6821_v49  ;;  %9439 = vst [vmem:[#allocation74_spill] sm:$0xff] %v6839_v35  ;;  %v6845_v49 = vld [vmem:[%s8029_s2 + $0x108] sm:$0xff] }
 0x523   :  { %1912 = vmatpush1.msra.mxu0 %v6827_v48  ;;  %9440 = vst [vmem:[#allocation76_spill] sm:$0xff] %v6845_v49  ;;  %v6851_v48 = vld [vmem:[%s8029_s2 + $0x100] sm:$0xff] }
 0x524   :  { %1913 = vmatprep.subr.mxu0 %v6833_v8  ;;  %9441 = vst [vmem:[#allocation78_spill] sm:$0xff] %v6851_v48  ;;  %v6857_v8 = vld [vmem:[%s8029_s2 + $0xd8] sm:$0xff] }
 0x525   :  { %1914 = vmatpush1.msra.mxu0 %v6839_v35  ;;  %9442 = vst [vmem:[#allocation80_spill] sm:$0xff] %v6857_v8  ;;  %v6863_v35 = vld [vmem:[%s8029_s2 + $0xd0] sm:$0xff] }
 0x526   :  { %1915 = vmatprep.subr.mxu0 %v6845_v49  ;;  %9443 = vst [vmem:[#allocation82_spill] sm:$0xff] %v6863_v35  ;;  %v6869_v49 = vld [vmem:[%s8029_s2 + $0xa8] sm:$0xff] }
 0x527   :  { %1916 = vmatpush1.msra.mxu0 %v6851_v48  ;;  %9444 = vst [vmem:[#allocation84_spill] sm:$0xff] %v6869_v49  ;;  %v6875_v48 = vld [vmem:[%s8029_s2 + $0xa0] sm:$0xff] }
 0x528   :  { %1917 = vmatprep.subr.mxu0 %v6857_v8  ;;  %9445 = vst [vmem:[#allocation86_spill] sm:$0xff] %v6875_v48  ;;  %v6881_v8 = vld [vmem:[%s8029_s2 + $0x78] sm:$0xff] }
 0x529   :  { %1918 = vmatpush1.msra.mxu0 %v6863_v35  ;;  %9446 = vst [vmem:[#allocation88_spill] sm:$0xff] %v6881_v8  ;;  %v6887_v35 = vld [vmem:[%s8029_s2 + $0x70] sm:$0xff] }
 0x52a   :  { %1919 = vmatprep.subr.mxu0 %v6869_v49  ;;  %9447 = vst [vmem:[#allocation90_spill] sm:$0xff] %v6887_v35  ;;  %v6893_v49 = vld [vmem:[%s8029_s2 + $0x48] sm:$0xff] }
 0x52b   :  { %1920 = vmatpush1.msra.mxu0 %v6875_v48  ;;  %9448 = vst [vmem:[#allocation92_spill] sm:$0xff] %v6893_v49  ;;  %v6899_v48 = vld [vmem:[%s8029_s2 + $0x40] sm:$0xff] }
 0x52c   :  { %1921 = vmatprep.subr.mxu0 %v6881_v8  ;;  %9449 = vst [vmem:[#allocation58_spill] sm:$0xff] %v6899_v48  ;;  %v6905_v8 = vld [vmem:[%s8029_s2 + $0x18] sm:$0xff] }
 0x52d   :  { %1922 = vmatpush1.msra.mxu0 %v6887_v35  ;;  %9450 = vst [vmem:[#allocation19_spill] sm:$0xff] %v6905_v8  ;;  %v6911_v35 = vld [vmem:[%s8029_s2 + $0x10] sm:$0xff] }
 0x52e   :  { %1923 = vmatprep.subr.mxu0 %v6893_v49  ;;  %9451 = vst [vmem:[#allocation15_spill] sm:$0xff] %v6911_v35  ;;  %v6917_v49 = vld [vmem:[%s8029_s2 + $0x5e8] sm:$0xff] }
 0x52f   :  { %1924 = vmatpush1.msra.mxu0 %v6899_v48  ;;  %9452 = vst [vmem:[#allocation23_spill] sm:$0xff] %v6917_v49  ;;  %v6923_v48 = vld [vmem:[%s8029_s2 + $0x5e0] sm:$0xff] }
 0x530   :  { %1925 = vmatprep.subr.mxu0 %v6905_v8  ;;  %9453 = vst [vmem:[#allocation11_spill] sm:$0xff] %v6923_v48  ;;  %v6929_v8 = vld [vmem:[%s8029_s2 + $0x5b8] sm:$0xff] }
 0x531   :  { %1926 = vmatpush1.msra.mxu0 %v6911_v35  ;;  %9454 = vst [vmem:[#allocation69_spill] sm:$0xff] %v6929_v8  ;;  %v6935_v35 = vld [vmem:[%s8029_s2 + $0x5b0] sm:$0xff] }
 0x532   :  { %1927 = vmatprep.subr.mxu0 %v6917_v49  ;;  %9455 = vst [vmem:[#allocation71_spill] sm:$0xff] %v6935_v35  ;;  %v6941_v49 = vld [vmem:[%s8029_s2 + $0x588] sm:$0xff] }
 0x533   :  { %1928 = vmatpush2.msra.mxu0 %v6923_v48  ;;  %9456 = vst [vmem:[#allocation73_spill] sm:$0xff] %v6941_v49  ;;  %v6947_v48 = vld [vmem:[%s8029_s2 + $0x580] sm:$0xff] }
 0x534   :  { %1929 = vmatprep.subr.mxu0 %v6929_v8  ;;  %9457 = vst [vmem:[#allocation75_spill] sm:$0xff] %v6947_v48  ;;  %v6953_v8 = vld [vmem:[%s8029_s2 + $0x558] sm:$0xff] }
 0x535   :  { %1930 = vmatpush2.msra.mxu0 %v6935_v35  ;;  %9458 = vst [vmem:[#allocation77_spill] sm:$0xff] %v6953_v8  ;;  %v6959_v35 = vld [vmem:[%s8029_s2 + $0x550] sm:$0xff] }
 0x536   :  { %1931 = vmatprep.subr.mxu0 %v6941_v49  ;;  %9459 = vst [vmem:[#allocation79_spill] sm:$0xff] %v6959_v35  ;;  %v6965_v49 = vld [vmem:[%s8029_s2 + $0x528] sm:$0xff] }
 0x537   :  { %1932 = vmatpush2.msra.mxu0 %v6947_v48  ;;  %9460 = vst [vmem:[#allocation81_spill] sm:$0xff] %v6965_v49  ;;  %v6971_v48 = vld [vmem:[%s8029_s2 + $0x520] sm:$0xff] }
 0x538   :  { %1933 = vmatprep.subr.mxu0 %v6953_v8  ;;  %9461 = vst [vmem:[#allocation83_spill] sm:$0xff] %v6971_v48  ;;  %v6977_v8 = vld [vmem:[%s8029_s2 + $0x4f8] sm:$0xff] }
 0x539   :  { %1934 = vmatpush2.msra.mxu0 %v6959_v35  ;;  %9462 = vst [vmem:[#allocation85_spill] sm:$0xff] %v6977_v8  ;;  %v6983_v35 = vld [vmem:[%s8029_s2 + $0x4f0] sm:$0xff] }
 0x53a   :  { %1935 = vmatprep.subr.mxu0 %v6965_v49  ;;  %9463 = vst [vmem:[#allocation87_spill] sm:$0xff] %v6983_v35  ;;  %v6989_v49 = vld [vmem:[%s8029_s2 + $0x4c8] sm:$0xff] }
 0x53b   :  { %1936 = vmatpush2.msra.mxu0 %v6971_v48  ;;  %9464 = vst [vmem:[#allocation89_spill] sm:$0xff] %v6989_v49  ;;  %v6995_v48 = vld [vmem:[%s8029_s2 + $0x4c0] sm:$0xff] }
 0x53c   :  { %1937 = vmatprep.subr.mxu0 %v6977_v8  ;;  %9465 = vst [vmem:[#allocation91_spill] sm:$0xff] %v6995_v48  ;;  %v7001_v8 = vld [vmem:[%s8029_s2 + $0x498] sm:$0xff] }
 0x53d   :  { %1938 = vmatpush2.msra.mxu0 %v6983_v35  ;;  %9466 = vst [vmem:[#allocation93_spill] sm:$0xff] %v7001_v8  ;;  %v7007_v35 = vld [vmem:[%s8029_s2 + $0x490] sm:$0xff] }
 0x53e   :  { %1939 = vmatprep.subr.mxu0 %v6989_v49  ;;  %9467 = vst [vmem:[#allocation95_spill] sm:$0xff] %v7007_v35  ;;  %v7013_v49 = vld [vmem:[%s8029_s2 + $0x468] sm:$0xff] }
 0x53f   :  { %1940 = vmatpush2.msra.mxu0 %v6995_v48  ;;  %9468 = vst [vmem:[#allocation97_spill] sm:$0xff] %v7013_v49  ;;  %v7019_v48 = vld [vmem:[%s8029_s2 + $0x460] sm:$0xff] }
 0x540   :  { %1941 = vmatprep.subr.mxu0 %v7001_v8  ;;  %9469 = vst [vmem:[#allocation99_spill] sm:$0xff] %v7019_v48  ;;  %v7025_v8 = vld [vmem:[%s8029_s2 + $0x438] sm:$0xff] }
 0x541   :  { %1942 = vmatpush2.msra.mxu0 %v7007_v35  ;;  %9470 = vst [vmem:[#allocation101_spill] sm:$0xff] %v7025_v8  ;;  %v7031_v35 = vld [vmem:[%s8029_s2 + $0x430] sm:$0xff] }
 0x542   :  { %1943 = vmatprep.subr.mxu0 %v7013_v49  ;;  %9471 = vst [vmem:[#allocation102_spill] sm:$0xff] %v7031_v35  ;;  %v7037_v49 = vld [vmem:[%s8029_s2 + $0x408] sm:$0xff] }
 0x543   :  { %1944 = vmatpush2.msra.mxu0 %v7019_v48  ;;  %9472 = vst [vmem:[#allocation103_spill] sm:$0xff] %v7037_v49  ;;  %v7043_v48 = vld [vmem:[%s8029_s2 + $0x400] sm:$0xff] }
 0x544   :  { %1945 = vmatprep.subr.mxu0 %v7025_v8  ;;  %9473 = vst [vmem:[#allocation104_spill] sm:$0xff] %v7043_v48  ;;  %v7049_v8 = vld [vmem:[%s8029_s2 + $0x3d8] sm:$0xff] }
 0x545   :  { %1946 = vmatpush2.msra.mxu0 %v7031_v35  ;;  %9474 = vst [vmem:[#allocation105_spill] sm:$0xff] %v7049_v8  ;;  %v7055_v35 = vld [vmem:[%s8029_s2 + $0x3d0] sm:$0xff] }
 0x546   :  { %1947 = vmatprep.subr.mxu0 %v7037_v49  ;;  %9475 = vst [vmem:[#allocation106_spill] sm:$0xff] %v7055_v35  ;;  %v7061_v49 = vld [vmem:[%s8029_s2 + $0x3a8] sm:$0xff] }
 0x547   :  { %1948 = vmatpush2.msra.mxu0 %v7043_v48  ;;  %9476 = vst [vmem:[#allocation60_spill] sm:$0xff] %v7061_v49  ;;  %v7067_v48 = vld [vmem:[%s8029_s2 + $0x3a0] sm:$0xff] }
 0x548   :  { %1949 = vmatprep.subr.mxu0 %v7049_v8  ;;  %9477 = vst [vmem:[#allocation107_spill] sm:$0xff] %v7067_v48  ;;  %v7073_v8 = vld [vmem:[%s8029_s2 + $0x378] sm:$0xff] }
 0x549   :  { %1950 = vmatpush2.msra.mxu0 %v7055_v35  ;;  %9478 = vst [vmem:[#allocation62_spill] sm:$0xff] %v7073_v8  ;;  %v7079_v35 = vld [vmem:[%s8029_s2 + $0x370] sm:$0xff] }
 0x54a   :  { %1951 = vmatprep.subr.mxu0 %v7061_v49  ;;  %9479 = vst [vmem:[#allocation108_spill] sm:$0xff] %v7079_v35  ;;  %v9480_v49 = vld [vmem:[#allocation156_spill] sm:$0xff] }
 0x54b   :  { %1952 = vmatpush2.msra.mxu0 %v7067_v48  ;;  %v9483_v48 = vld [vmem:[#allocation159_spill] sm:$0xff] }
 0x54c   :  { %1953 = vmatprep.subr.mxu0 %v7073_v8  ;;  %v9485_v8 = vld [vmem:[#allocation35_spill] sm:$0xff] }
 0x54d   :  { %1954 = vmatpush2.msra.mxu0 %v7079_v35 }
 0x54e   :  { %1955 = vmatprep.subr.mxu0 %v9480_v49 }
 0x54f   :  { %1956 = vmatpush2.msra.mxu0 %v9481_v12  ;;  %v2764_v12 = vld [vmem:[%s8032_s0 + $0x4] ss:$8 sm:$0xf] }
 0x550   :  { %1957 = vmatprep.subr.mxu0 %v9482_v10  ;;  %v2765_v10 = vld [vmem:[%s8032_s0 + $0x4] ss:$8 sm:$0x30] }
 0x551   :  { %1958 = vmatpush2.msra.mxu0 %v9483_v48  ;;  %v1501_v48 = vor.u32 %v2765_v10, %v2764_v12 }
 0x552   :  { %2135 = vmatprep.subr.mxu0 %v9484_v9 }
 0x592   :  { %v1579_v18 = vpop.f32.mrf.mxu0  ;;  %v1650_v39 = vpop.f32.mrf.mxu1 }
 0x593   :  { %v1580_v0 = vadd.f32 %v1579_v18, %v9486_v44  ;;  %v1651_v18 = vadd.f32 %v1650_v39, %v4619_v42 }
 0x594   :  { %v1581_v14 = vpop.f32.mrf.mxu0  ;;  %v1652_v49 = vpop.f32.mrf.mxu1 }
 0x595   :  { %v1582_v63 = vadd.f32 %v1581_v14, %v9485_v8  ;;  %v1653_v14 = vadd.f32 %v1652_v49, %v4621_v52  ;;  %v1752_v8 = vrot.slane %v1501_v48, 2 }
 0x597   :  { %v1728_v6 = vcombine.low %v1580_v0, %v1582_v63  ;;  %v1756_v63 = vcombine.low %v1651_v18, %v1653_v14 }
 0x599   :  { %v1735_v35 = vrot.slane %v1728_v6, %v4608_v47  ;;  %v1763_v6 = vrot.slane %v1756_v63, %v4608_v47 }
 0x59b   :  { %v1742_v9 = vrot.slane %v1735_v35, %v4608_v47  ;;  %v1770_v13 = vrot.slane %v1763_v6, %v4608_v47 }
 0x59d   :  { %v1744_v0 = vadd.f32 %v1742_v9, %v1501_v48  ;;  %v1772_v55 = vadd.f32 %v1770_v13, %v1752_v8 }
 0x59f   :  { %v2766_v44 = vmul.f32 -1.442695, %v1744_v0  ;;  %v2767_v5 = vmul.f32 -1.442695, %v1772_v55  ;;  %v1798_v0 = vrot.slane %v1501_v48, 4 }
 0x5a1   :  { %2825 = vpow2.f32 %v2766_v44 }
 0x5a2   :  { %2827 = vpow2.f32 %v2767_v5 }
 0x5ae   :  { %v2826_v59 = vpop.eup %2825 }
 0x5af   :  { %v1748_v21 = vadd.f32 1.0, %v2826_v59  ;;  %v2828_v49 = vpop.eup %2827 }
 0x5b0   :  { %v1776_v14 = vadd.f32 1.0, %v2828_v49  ;;  %v7145_v49 = vld [vmem:[%s8029_s2 + $0x298] sm:$0xff] }
 0x5b1   :  { %2829 = vrcp.f32 %v1748_v21 }
 0x5b2   :  { %2831 = vrcp.f32 %v1776_v14  ;;  %v7159_v14 = vld [vmem:[%s8029_s2 + $0x268] sm:$0xff] }
 0x5be   :  { %v2830_v13 = vpop.eup %2829 }
 0x5bf   :  { %v2832_v21 = vpop.eup %2831 }
 0x5c0   :  { %v1802_v59 = vsub.f32 1.0, %v2832_v21  ;;  %v1804_v6 = vmul.f32 %v2832_v21, %v6283_v3  ;;  %v7125_v3 = vld [vmem:[%s8029_s2 + $0x2f0] sm:$0xff] }
 0x5c1   :  { %v7208_v21 = vld [vmem:[%s8029_s2 + $0x1d0] sm:$0xff] }
 0x5d2   :  { %v1721_v35 = vpop.f32.mrf.mxu0 }
 0x5d3   :  { %v1722_v10 = vadd.f32 %v1721_v35, %v9053_v58 }
 0x5d4   :  { %v1723_v12 = vpop.f32.mrf.mxu0 }
 0x5d5   :  { %v1724_v39 = vadd.f32 %v1723_v12, %v4632_v19 }
 0x5d7   :  { %v1781_v9 = vcombine.low %v1722_v10, %v1724_v39  ;;  %v7131_v10 = vld [vmem:[%s8029_s2 + $0x2c8] sm:$0xff]  ;;  %v7138_v39 = vld [vmem:[%s8029_s2 + $0x2c0] sm:$0xff] }
 0x5d9   :  { %v1788_v44 = vrot.slane %v1781_v9, %v4608_v47  ;;  %v7152_v9 = vld [vmem:[%s8029_s2 + $0x290] sm:$0xff] }
 0x5db   :  { %v1795_v18 = vrot.slane %v1788_v44, %v4608_v47  ;;  %v7166_v44 = vld [vmem:[%s8029_s2 + $0x260] sm:$0xff] }
 0x5dd   :  { %v1797_v55 = vmul.f32 %v2830_v13, %v1795_v18  ;;  %v7173_v18 = vld [vmem:[%s8029_s2 + $0x238] sm:$0xff]  ;;  %v7187_v13 = vld [vmem:[%s8029_s2 + $0x208] sm:$0xff] }
 0x5df   :  { %v1800_v5 = vadd.f32 %v1798_v0, %v1797_v55  ;;  %v7180_v0 = vld [vmem:[%s8029_s2 + $0x230] sm:$0xff]  ;;  %v7194_v55 = vld [vmem:[%s8029_s2 + $0x200] sm:$0xff] }
 0x5e1   :  { %2833 = vtanh.f32 %v1800_v5  ;;  %v7201_v5 = vld [vmem:[%s8029_s2 + $0x1d8] sm:$0xff] }
 0x5ee   :  { %v2834_v8 = vpop.eup %2833 }
 0x5ef   :  { %v1803_v63 = vmul.f32 %v2834_v8, %v1802_v59  ;;  %v7215_v59 = vld [vmem:[%s8029_s2 + $0x1a8] sm:$0xff]  ;;  %v7222_v8 = vld [vmem:[%s8029_s2 + $0x1a0] sm:$0xff] }
 0x5f1   :  { %v7106_v35 = vadd.f32 %v1804_v6, %v1803_v63  ;;  %v7229_v63 = vld [vmem:[%s8029_s2 + $0x178] sm:$0xff]  ;;  %v7236_v6 = vld [vmem:[%s8029_s2 + $0x170] sm:$0xff] }
 0x5f3   :  { %2768 = vst.msk [vmem:[%s8033_s4 + $0x4] ss:$8 sm:$0x3] %vm3516_vm0, %v7106_v35  ;;  %v1821_v48 = vrot.slane %v7106_v35, %v8902_v54  ;;  %v7118_v12 = vrot.slane %v7106_v35, %v8900_v37 }
 0x5f5   :  { %1888 = vmatprep.mubr.f32.mxu1 %v1821_v48  ;;  %1959 = vmatprep.mubr.f32.mxu0 %v1821_v48 }
 0x5f6   :  { %1889 = vmatmul.mubr.f32.vlgmr.msra.gmra.mxu1 %v7118_v12  ;;  %1960 = vmatmul.mubr.f32.vlgmr.msra.gmra.mxu0 %v7118_v12 }
 0x5f7   :  { %1967 = vmatpush1.msra.mxu1 %v7125_v3  ;;  %2030 = vmatprep.mubr.f32.mxu1 %v1821_v48  ;;  %v7243_v48 = vld [vmem:[%s8029_s2 + $0x148] sm:$0xff] }
 0x5f8   :  { %1968 = vmatprep.subr.mxu1 %v7131_v10  ;;  %2136 = vmatpush1.msra.mxu0 %v6304_v4 }
 0x5f9   :  { %1969 = vmatpush1.msra.mxu1 %v7138_v39  ;;  %2137 = vmatprep.subr.mxu0 %v6311_v11 }
 0x5fa   :  { %1970 = vmatprep.subr.mxu1 %v7145_v49  ;;  %2138 = vmatpush1.msra.mxu0 %v6318_v32 }
 0x5fb   :  { %1971 = vmatpush1.msra.mxu1 %v7152_v9  ;;  %2139 = vmatprep.subr.mxu0 %v6325_v25 }
 0x5fc   :  { %1972 = vmatprep.subr.mxu1 %v7159_v14  ;;  %2140 = vmatpush1.msra.mxu0 %v6332_v45 }
 0x5fd   :  { %1973 = vmatpush1.msra.mxu1 %v7166_v44  ;;  %2141 = vmatprep.subr.mxu0 %v6339_v53 }
 0x5fe   :  { %1974 = vmatprep.subr.mxu1 %v7173_v18  ;;  %2142 = vmatpush1.msra.mxu0 %v6346_v43 }
 0x5ff   :  { %1975 = vmatpush1.msra.mxu1 %v7180_v0  ;;  %2143 = vmatprep.subr.mxu0 %v6353_v31 }
 0x600   :  { %1976 = vmatprep.subr.mxu1 %v7187_v13  ;;  %2144 = vmatpush1.msra.mxu0 %v6360_v29 }
 0x601   :  { %1977 = vmatpush1.msra.mxu1 %v7194_v55  ;;  %2145 = vmatprep.subr.mxu0 %v6367_v34 }
 0x602   :  { %1978 = vmatprep.subr.mxu1 %v7201_v5  ;;  %2146 = vmatpush1.msra.mxu0 %v6374_v22 }
 0x603   :  { %1979 = vmatpush1.msra.mxu1 %v7208_v21  ;;  %2147 = vmatprep.subr.mxu0 %v6381_v20 }
 0x604   :  { %1980 = vmatprep.subr.mxu1 %v7215_v59  ;;  %2148 = vmatpush1.msra.mxu0 %v6388_v17 }
 0x605   :  { %1981 = vmatpush1.msra.mxu1 %v7222_v8  ;;  %2149 = vmatprep.subr.mxu0 %v6395_v38 }
 0x606   :  { %1982 = vmatprep.subr.mxu1 %v7229_v63  ;;  %2150 = vmatpush1.msra.mxu0 %v6402_v36  ;;  %v7250_v36 = vld [vmem:[%s8029_s2 + $0x140] sm:$0xff] }
 0x607   :  { %1983 = vmatpush1.msra.mxu1 %v7236_v6  ;;  %2151 = vmatprep.subr.mxu0 %v6409_v16  ;;  %v7257_v16 = vld [vmem:[%s8029_s2 + $0x118] sm:$0xff] }
 0x608   :  { %1984 = vmatprep.subr.mxu1 %v7243_v48  ;;  %2152 = vmatpush1.msra.mxu0 %v6416_v27  ;;  %v7264_v27 = vld [vmem:[%s8029_s2 + $0x110] sm:$0xff] }
 0x609   :  { %1985 = vmatpush1.msra.mxu1 %v7250_v36  ;;  %2153 = vmatprep.subr.mxu0 %v6423_v40  ;;  %v7271_v40 = vld [vmem:[%s8029_s2 + $0xe8] sm:$0xff] }
 0x60a   :  { %1986 = vmatprep.subr.mxu1 %v7257_v16  ;;  %2154 = vmatpush1.msra.mxu0 %v6430_v15  ;;  %v7278_v15 = vld [vmem:[%s8029_s2 + $0xe0] sm:$0xff] }
 0x60b   :  { %1987 = vmatpush1.msra.mxu1 %v7264_v27  ;;  %2155 = vmatprep.subr.mxu0 %v6437_v60  ;;  %9487 = vst [vmem:[#allocation64_spill] sm:$0xff] %v7278_v15  ;;  %v7285_v60 = vld [vmem:[%s8029_s2 + $0xb8] sm:$0xff] }
 0x60c   :  { %1988 = vmatprep.subr.mxu1 %v7271_v40  ;;  %2156 = vmatpush1.msra.mxu0 %v6444_v61  ;;  %9488 = vst [vmem:[#allocation66_spill] sm:$0xff] %v7285_v60  ;;  %v7292_v61 = vld [vmem:[%s8029_s2 + $0xb0] sm:$0xff] }
 0x60d   :  { %1989 = vmatpush1.msra.mxu1 %v7278_v15  ;;  %2157 = vmatprep.subr.mxu0 %v6451_v33  ;;  %9489 = vst [vmem:[#allocation68_spill] sm:$0xff] %v7292_v61  ;;  %v7299_v33 = vld [vmem:[%s8029_s2 + $0x88] sm:$0xff] }
 0x60e   :  { %1990 = vmatprep.subr.mxu1 %v7285_v60  ;;  %2158 = vmatpush1.msra.mxu0 %v6458_v41  ;;  %9490 = vst [vmem:[#allocation109_spill] sm:$0xff] %v7299_v33  ;;  %v7306_v41 = vld [vmem:[%s8029_s2 + $0x80] sm:$0xff] }
 0x60f   :  { %1991 = vmatpush1.msra.mxu1 %v7292_v61  ;;  %2159 = vmatprep.subr.mxu0 %v6465_v23  ;;  %9491 = vst [vmem:[#allocation110_spill] sm:$0xff] %v7306_v41  ;;  %v7313_v23 = vld [vmem:[%s8029_s2 + $0x58] sm:$0xff] }
 0x610   :  { %1992 = vmatprep.subr.mxu1 %v7299_v33  ;;  %2160 = vmatpush1.msra.mxu0 %v6472_v46  ;;  %9492 = vst [vmem:[#allocation111_spill] sm:$0xff] %v7313_v23  ;;  %v7320_v46 = vld [vmem:[%s8029_s2 + $0x50] sm:$0xff] }
 0x611   :  { %1993 = vmatpush1.msra.mxu1 %v7306_v41  ;;  %2161 = vmatprep.subr.mxu0 %v6479_v26  ;;  %9493 = vst [vmem:[#allocation112_spill] sm:$0xff] %v7320_v46  ;;  %v7327_v26 = vld [vmem:[%s8029_s2 + $0x28] sm:$0xff] }
 0x612   :  { %1994 = vmatprep.subr.mxu1 %v7313_v23  ;;  %2162 = vmatpush1.msra.mxu0 %v6486_v50  ;;  %9494 = vst [vmem:[#allocation113_spill] sm:$0xff] %v7327_v26  ;;  %v7334_v50 = vld [vmem:[%s8029_s2 + $0x20] sm:$0xff] }
 0x613   :  { %1995 = vmatpush1.msra.mxu1 %v7320_v46  ;;  %2163 = vmatprep.subr.mxu0 %v6493_v28  ;;  %9495 = vst [vmem:[#allocation114_spill] sm:$0xff] %v7334_v50  ;;  %v7341_v28 = vld [vmem:[%s8029_s2 + $0x5f8] sm:$0xff] }
 0x614   :  { %1996 = vmatprep.subr.mxu1 %v7327_v26  ;;  %2164 = vmatpush1.msra.mxu0 %v6500_v57  ;;  %9496 = vst [vmem:[#allocation115_spill] sm:$0xff] %v7341_v28  ;;  %v7348_v57 = vld [vmem:[%s8029_s2 + $0x5f0] sm:$0xff] }
 0x615   :  { %1997 = vmatpush1.msra.mxu1 %v7334_v50  ;;  %2165 = vmatprep.subr.mxu0 %v6507_v7  ;;  %9497 = vst [vmem:[#allocation116_spill] sm:$0xff] %v7348_v57  ;;  %v7355_v7 = vld [vmem:[%s8029_s2 + $0x5c8] sm:$0xff] }
 0x616   :  { %1998 = vmatprep.subr.mxu1 %v7341_v28  ;;  %2166 = vmatpush1.msra.mxu0 %v6514_v1  ;;  %9498 = vst [vmem:[#allocation117_spill] sm:$0xff] %v7355_v7  ;;  %v7362_v1 = vld [vmem:[%s8029_s2 + $0x5c0] sm:$0xff]  ;;  %v9567_v28 = vld [vmem:[#allocation56_spill] sm:$0xff] }
 0x617   :  { %1999 = vmatpush2.msra.mxu1 %v7348_v57  ;;  %2167 = vmatprep.subr.mxu0 %v6521_v56  ;;  %9499 = vst [vmem:[#allocation118_spill] sm:$0xff] %v7362_v1  ;;  %v7369_v56 = vld [vmem:[%s8029_s2 + $0x598] sm:$0xff]  ;;  %v9568_v50 = vld [vmem:[#allocation59_spill] sm:$0xff] }
 0x618   :  { %2000 = vmatprep.subr.mxu1 %v7355_v7  ;;  %2168 = vmatpush2.msra.mxu0 %v6528_v30  ;;  %9500 = vst [vmem:[#allocation119_spill] sm:$0xff] %v7369_v56  ;;  %v7376_v30 = vld [vmem:[%s8029_s2 + $0x590] sm:$0xff]  ;;  %v9566_v57 = vld [vmem:[#allocation54_spill] sm:$0xff] }
 0x619   :  { %2001 = vmatpush2.msra.mxu1 %v7362_v1  ;;  %2169 = vmatprep.subr.mxu0 %v6535_v51  ;;  %9501 = vst [vmem:[#allocation124_spill] sm:$0xff] %v7376_v30  ;;  %v7383_v51 = vld [vmem:[%s8029_s2 + $0x568] sm:$0xff] }
 0x61a   :  { %2002 = vmatprep.subr.mxu1 %v7369_v56  ;;  %2170 = vmatpush2.msra.mxu0 %v6542_v2  ;;  %9502 = vst [vmem:[#allocation125_spill] sm:$0xff] %v7383_v51  ;;  %v9503_v1 = vld [vmem:[#allocation55_spill] sm:$0xff]  ;;  %v9505_v56 = vld [vmem:[#allocation33_spill] sm:$0xff]  ;;  %v9563_v7 = vld [vmem:[#allocation48_spill] sm:$0xff] }
 0x61b   :  { %2003 = vmatpush2.msra.mxu1 %v7376_v30  ;;  %2171 = vmatprep.subr.mxu0 %v6549_v24  ;;  %v7390_v2 = vld [vmem:[%s8029_s2 + $0x560] sm:$0xff]  ;;  %v7397_v24 = vld [vmem:[%s8029_s2 + $0x538] sm:$0xff]  ;;  %v9507_v30 = vld [vmem:[#allocation16_spill] sm:$0xff] }
 0x61c   :  { %2004 = vmatprep.subr.mxu1 %v7383_v51  ;;  %2172 = vmatpush2.msra.mxu0 %v9503_v1  ;;  %9504 = vst [vmem:[#allocation126_spill] sm:$0xff] %v7390_v2  ;;  %9506 = vst [vmem:[#allocation127_spill] sm:$0xff] %v7397_v24  ;;  %v7404_v1 = vld [vmem:[%s8029_s2 + $0x530] sm:$0xff] }
 0x61d   :  { %2005 = vmatpush2.msra.mxu1 %v7390_v2  ;;  %2173 = vmatprep.subr.mxu0 %v9505_v56  ;;  %9508 = vst [vmem:[#allocation128_spill] sm:$0xff] %v7404_v1  ;;  %v9509_v51 = vld [vmem:[#allocation4_spill] sm:$0xff]  ;;  %v9511_v2 = vld [vmem:[#allocation57_spill] sm:$0xff] }
 0x61e   :  { %2006 = vmatprep.subr.mxu1 %v7397_v24  ;;  %2174 = vmatpush2.msra.mxu0 %v9507_v30  ;;  %v7411_v56 = vld [vmem:[%s8029_s2 + $0x508] sm:$0xff]  ;;  %v7418_v30 = vld [vmem:[%s8029_s2 + $0x500] sm:$0xff] }
 0x61f   :  { %2007 = vmatpush2.msra.mxu1 %v7404_v1  ;;  %2175 = vmatprep.subr.mxu0 %v9509_v51  ;;  %9510 = vst [vmem:[#allocation129_spill] sm:$0xff] %v7411_v56  ;;  %9512 = vst [vmem:[#allocation130_spill] sm:$0xff] %v7418_v30  ;;  %v9513_v24 = vld [vmem:[#allocation120_spill] sm:$0xff]  ;;  %v7425_v51 = vld [vmem:[%s8029_s2 + $0x4d8] sm:$0xff] }
 0x620   :  { %2008 = vmatprep.subr.mxu1 %v7411_v56  ;;  %2176 = vmatpush2.msra.mxu0 %v9511_v2  ;;  %9514 = vst [vmem:[#allocation131_spill] sm:$0xff] %v7425_v51  ;;  %v9515_v1 = vld [vmem:[#allocation17_spill] sm:$0xff] }
 0x621   :  { %2009 = vmatpush2.msra.mxu1 %v7418_v30  ;;  %2177 = vmatprep.subr.mxu0 %v9513_v24  ;;  %v7432_v2 = vld [vmem:[%s8029_s2 + $0x4d0] sm:$0xff]  ;;  %v7439_v24 = vld [vmem:[%s8029_s2 + $0x4a8] sm:$0xff]  ;;  %v9519_v30 = vld [vmem:[#allocation18_spill] sm:$0xff] }
 0x622   :  { %2010 = vmatprep.subr.mxu1 %v7425_v51  ;;  %2178 = vmatpush2.msra.mxu0 %v9515_v1  ;;  %9516 = vst [vmem:[#allocation132_spill] sm:$0xff] %v7432_v2  ;;  %v9517_v56 = vld [vmem:[#allocation121_spill] sm:$0xff]  ;;  %9518 = vst [vmem:[#allocation133_spill] sm:$0xff] %v7439_v24  ;;  %v7446_v1 = vld [vmem:[%s8029_s2 + $0x4a0] sm:$0xff] }
 0x623   :  { %2011 = vmatpush2.msra.mxu1 %v7432_v2  ;;  %2179 = vmatprep.subr.mxu0 %v9517_v56  ;;  %9520 = vst [vmem:[#allocation134_spill] sm:$0xff] %v7446_v1  ;;  %v9521_v51 = vld [vmem:[#allocation122_spill] sm:$0xff]  ;;  %v9523_v2 = vld [vmem:[#allocation20_spill] sm:$0xff] }
 0x624   :  { %2012 = vmatprep.subr.mxu1 %v7439_v24  ;;  %2180 = vmatpush2.msra.mxu0 %v9519_v30  ;;  %v7453_v56 = vld [vmem:[%s8029_s2 + $0x478] sm:$0xff]  ;;  %v7460_v30 = vld [vmem:[%s8029_s2 + $0x470] sm:$0xff]  ;;  %v9525_v24 = vld [vmem:[#allocation123_spill] sm:$0xff] }
 0x625   :  { %2013 = vmatpush2.msra.mxu1 %v7446_v1  ;;  %2181 = vmatprep.subr.mxu0 %v9521_v51  ;;  %9522 = vst [vmem:[#allocation135_spill] sm:$0xff] %v7453_v56  ;;  %9524 = vst [vmem:[#allocation136_spill] sm:$0xff] %v7460_v30  ;;  %v7467_v51 = vld [vmem:[%s8029_s2 + $0x448] sm:$0xff]  ;;  %v9527_v1 = vld [vmem:[#allocation21_spill] sm:$0xff] }
 0x626   :  { %2014 = vmatprep.subr.mxu1 %v7453_v56  ;;  %2182 = vmatpush2.msra.mxu0 %v9523_v2  ;;  %9526 = vst [vmem:[#allocation137_spill] sm:$0xff] %v7467_v51  ;;  %v7474_v2 = vld [vmem:[%s8029_s2 + $0x440] sm:$0xff] }
 0x627   :  { %2015 = vmatpush2.msra.mxu1 %v7460_v30  ;;  %2183 = vmatprep.subr.mxu0 %v9525_v24  ;;  %9528 = vst [vmem:[#allocation138_spill] sm:$0xff] %v7474_v2  ;;  %v9529_v56 = vld [vmem:[#allocation22_spill] sm:$0xff]  ;;  %v9531_v30 = vld [vmem:[#allocation24_spill] sm:$0xff] }
 0x628   :  { %2016 = vmatprep.subr.mxu1 %v7467_v51  ;;  %2184 = vmatpush2.msra.mxu0 %v9527_v1  ;;  %v7481_v24 = vld [vmem:[%s8029_s2 + $0x418] sm:$0xff]  ;;  %v7488_v1 = vld [vmem:[%s8029_s2 + $0x410] sm:$0xff] }
 0x629   :  { %2017 = vmatpush2.msra.mxu1 %v7474_v2  ;;  %2185 = vmatprep.subr.mxu0 %v9529_v56  ;;  %9530 = vst [vmem:[#allocation139_spill] sm:$0xff] %v7481_v24  ;;  %9532 = vst [vmem:[#allocation140_spill] sm:$0xff] %v7488_v1  ;;  %v9533_v51 = vld [vmem:[#allocation25_spill] sm:$0xff]  ;;  %v7495_v56 = vld [vmem:[%s8029_s2 + $0x3e8] sm:$0xff] }
 0x62a   :  { %2018 = vmatprep.subr.mxu1 %v7481_v24  ;;  %2186 = vmatpush2.msra.mxu0 %v9531_v30  ;;  %9534 = vst [vmem:[#allocation141_spill] sm:$0xff] %v7495_v56  ;;  %v9535_v2 = vld [vmem:[#allocation26_spill] sm:$0xff]  ;;  %v9537_v24 = vld [vmem:[#allocation27_spill] sm:$0xff] }
 0x62b   :  { %2019 = vmatpush2.msra.mxu1 %v7488_v1  ;;  %2187 = vmatprep.subr.mxu0 %v9533_v51  ;;  %v7502_v30 = vld [vmem:[%s8029_s2 + $0x3e0] sm:$0xff]  ;;  %v7509_v51 = vld [vmem:[%s8029_s2 + $0x3b8] sm:$0xff]  ;;  %v9539_v1 = vld [vmem:[#allocation28_spill] sm:$0xff] }
 0x62c   :  { %2020 = vmatprep.subr.mxu1 %v7495_v56  ;;  %2188 = vmatpush2.msra.mxu0 %v9535_v2  ;;  %9536 = vst [vmem:[#allocation142_spill] sm:$0xff] %v7502_v30  ;;  %9538 = vst [vmem:[#allocation143_spill] sm:$0xff] %v7509_v51  ;;  %v7516_v2 = vld [vmem:[%s8029_s2 + $0x3b0] sm:$0xff] }
 0x62d   :  { %2021 = vmatpush2.msra.mxu1 %v7502_v30  ;;  %2189 = vmatprep.subr.mxu0 %v9537_v24  ;;  %9540 = vst [vmem:[#allocation144_spill] sm:$0xff] %v7516_v2  ;;  %v9541_v56 = vld [vmem:[#allocation29_spill] sm:$0xff]  ;;  %v7523_v24 = vld [vmem:[%s8029_s2 + $0x388] sm:$0xff]  ;;  %v9543_v30 = vld [vmem:[#allocation30_spill] sm:$0xff] }
 0x62e   :  { %2022 = vmatprep.subr.mxu1 %v7509_v51  ;;  %2190 = vmatpush2.msra.mxu0 %v9539_v1  ;;  %9542 = vst [vmem:[#allocation145_spill] sm:$0xff] %v7523_v24  ;;  %v7530_v1 = vld [vmem:[%s8029_s2 + $0x380] sm:$0xff] }
 0x62f   :  { %2023 = vmatpush2.msra.mxu1 %v7516_v2  ;;  %2191 = vmatprep.subr.mxu0 %v9541_v56  ;;  %9544 = vst [vmem:[#allocation146_spill] sm:$0xff] %v7530_v1  ;;  %v9545_v51 = vld [vmem:[#allocation31_spill] sm:$0xff]  ;;  %v7537_v56 = vld [vmem:[%s8029_s2 + $0x358] sm:$0xff]  ;;  %v9547_v2 = vld [vmem:[#allocation32_spill] sm:$0xff] }
 0x630   :  { %2024 = vmatprep.subr.mxu1 %v7523_v24  ;;  %2192 = vmatpush2.msra.mxu0 %v9543_v30  ;;  %9546 = vst [vmem:[#allocation147_spill] sm:$0xff] %v7537_v56  ;;  %v7544_v30 = vld [vmem:[%s8029_s2 + $0x350] sm:$0xff]  ;;  %v7590_v24 = vld [vmem:[%s8029_s2 + $0x2f8] sm:$0xff] }
 0x631   :  { %2025 = vmatpush2.msra.mxu1 %v7530_v1  ;;  %2193 = vmatprep.subr.mxu0 %v9545_v51  ;;  %9548 = vst [vmem:[#allocation148_spill] sm:$0xff] %v7544_v30  ;;  %v7550_v51 = vld [vmem:[%s8029_s2 + $0x338] sm:$0xff]  ;;  %v9555_v1 = vld [vmem:[#allocation36_spill] sm:$0xff]  ;;  %9558 = vst [vmem:[#allocation155_spill] sm:$0xff] %v7590_v24 }
 0x632   :  { %2026 = vmatprep.subr.mxu1 %v7537_v56  ;;  %2194 = vmatpush2.msra.mxu0 %v9547_v2  ;;  %9549 = vst [vmem:[#allocation149_spill] sm:$0xff] %v7550_v51  ;;  %v7556_v56 = vld [vmem:[%s8029_s2 + $0x328] sm:$0xff]  ;;  %v7562_v2 = vld [vmem:[%s8029_s2 + $0x330] sm:$0xff] }
 0x633   :  { %2027 = vmatpush2.msra.mxu1 %v7544_v30  ;;  %2195 = vmatprep.subr.mxu0 %v7550_v51  ;;  %9550 = vst [vmem:[#allocation150_spill] sm:$0xff] %v7556_v56  ;;  %9551 = vst [vmem:[#allocation151_spill] sm:$0xff] %v7562_v2  ;;  %v7568_v30 = vld [vmem:[%s8029_s2 + $0x320] sm:$0xff]  ;;  %v7574_v51 = vld [vmem:[%s8029_s2 + $0x308] sm:$0xff] }
 0x634   :  { %2028 = vmatprep.subr.mxu1 %v7556_v56  ;;  %2196 = vmatpush2.msra.mxu0 %v7562_v2  ;;  %9552 = vst [vmem:[#allocation152_spill] sm:$0xff] %v7568_v30  ;;  %9553 = vst [vmem:[#allocation153_spill] sm:$0xff] %v7574_v51  ;;  %v9554_v56 = vld [vmem:[#allocation34_spill] sm:$0xff] }
 0x635   :  { %2029 = vmatpush2.msra.mxu1 %v7568_v30  ;;  %2197 = vmatprep.subr.mxu0 %v7574_v51  ;;  %v7583_v2 = vld [vmem:[%s8029_s2 + $0x300] sm:$0xff] }
 0x636   :  { %2031 = vmatmul.mubr.f32.vlgmr.msra.gmra.mxu1 %v7118_v12  ;;  %2206 = vmatprep.subr.mxu1 %v9554_v56  ;;  %9556 = vst [vmem:[#allocation154_spill] sm:$0xff] %v7583_v2  ;;  %v9557_v30 = vld [vmem:[#allocation38_spill] sm:$0xff]  ;;  %v9559_v12 = vld [vmem:[#allocation40_spill] sm:$0xff] }
 0x637   :  { %2207 = vmatpush1.msra.mxu1 %v9555_v1  ;;  %2198 = vmatpush2.msra.mxu0 %v7583_v2  ;;  %v9560_v56 = vld [vmem:[#allocation42_spill] sm:$0xff]  ;;  %v9561_v1 = vld [vmem:[#allocation44_spill] sm:$0xff] }
 0x638   :  { %2208 = vmatprep.subr.mxu1 %v9557_v30  ;;  %2277 = vmatprep.subr.mxu0 %v7590_v24  ;;  %v9562_v51 = vld [vmem:[#allocation46_spill] sm:$0xff]  ;;  %v9565_v30 = vld [vmem:[#allocation52_spill] sm:$0xff]  ;;  %v9569_v24 = vld [vmem:[#allocation61_spill] sm:$0xff] }
 0x639   :  { %2209 = vmatpush1.msra.mxu1 %v9559_v12  ;;  %v9564_v2 = vld [vmem:[#allocation50_spill] sm:$0xff]  ;;  %v9570_v12 = vld [vmem:[#allocation63_spill] sm:$0xff] }
 0x63a   :  { %2210 = vmatprep.subr.mxu1 %v9560_v56  ;;  %v9571_v56 = vld [vmem:[#allocation65_spill] sm:$0xff] }
 0x63b   :  { %2211 = vmatpush1.msra.mxu1 %v9561_v1  ;;  %v9572_v1 = vld [vmem:[#allocation67_spill] sm:$0xff] }
 0x63c   :  { %2212 = vmatprep.subr.mxu1 %v9562_v51  ;;  %v9573_v51 = vld [vmem:[#allocation70_spill] sm:$0xff] }
 0x63d   :  { %2213 = vmatpush1.msra.mxu1 %v9563_v7  ;;  %v9574_v7 = vld [vmem:[#allocation72_spill] sm:$0xff] }
 0x63e   :  { %2214 = vmatprep.subr.mxu1 %v9564_v2  ;;  %v9575_v2 = vld [vmem:[#allocation74_spill] sm:$0xff] }
 0x63f   :  { %2215 = vmatpush1.msra.mxu1 %v9565_v30  ;;  %v9576_v30 = vld [vmem:[#allocation76_spill] sm:$0xff] }
 0x640   :  { %2216 = vmatprep.subr.mxu1 %v9566_v57  ;;  %v9577_v57 = vld [vmem:[#allocation78_spill] sm:$0xff] }
 0x641   :  { %2217 = vmatpush1.msra.mxu1 %v9567_v28  ;;  %v9578_v28 = vld [vmem:[#allocation80_spill] sm:$0xff] }
 0x642   :  { %2218 = vmatprep.subr.mxu1 %v9568_v50  ;;  %v9579_v50 = vld [vmem:[#allocation82_spill] sm:$0xff] }
 0x643   :  { %2219 = vmatpush1.msra.mxu1 %v9569_v24  ;;  %v9580_v24 = vld [vmem:[#allocation84_spill] sm:$0xff] }
 0x644   :  { %2220 = vmatprep.subr.mxu1 %v9570_v12  ;;  %v9581_v12 = vld [vmem:[#allocation86_spill] sm:$0xff] }
 0x645   :  { %2221 = vmatpush1.msra.mxu1 %v9571_v56  ;;  %v9582_v56 = vld [vmem:[#allocation88_spill] sm:$0xff] }
 0x646   :  { %2222 = vmatprep.subr.mxu1 %v9572_v1  ;;  %v9583_v1 = vld [vmem:[#allocation90_spill] sm:$0xff] }
 0x647   :  { %2223 = vmatpush1.msra.mxu1 %v9573_v51  ;;  %v9584_v51 = vld [vmem:[#allocation92_spill] sm:$0xff] }
 0x648   :  { %2224 = vmatprep.subr.mxu1 %v9574_v7  ;;  %v9585_v7 = vld [vmem:[#allocation58_spill] sm:$0xff] }
 0x649   :  { %2225 = vmatpush1.msra.mxu1 %v9575_v2  ;;  %v9586_v2 = vld [vmem:[#allocation19_spill] sm:$0xff] }
 0x64a   :  { %2226 = vmatprep.subr.mxu1 %v9576_v30  ;;  %v9587_v30 = vld [vmem:[#allocation15_spill] sm:$0xff] }
 0x64b   :  { %2227 = vmatpush1.msra.mxu1 %v9577_v57  ;;  %v9588_v57 = vld [vmem:[#allocation23_spill] sm:$0xff] }
 0x64c   :  { %2228 = vmatprep.subr.mxu1 %v9578_v28  ;;  %v9589_v28 = vld [vmem:[#allocation11_spill] sm:$0xff] }
 0x64d   :  { %2229 = vmatpush1.msra.mxu1 %v9579_v50  ;;  %v9590_v50 = vld [vmem:[#allocation69_spill] sm:$0xff] }
 0x64e   :  { %2230 = vmatprep.subr.mxu1 %v9580_v24  ;;  %v9591_v24 = vld [vmem:[#allocation71_spill] sm:$0xff] }
 0x64f   :  { %2231 = vmatpush1.msra.mxu1 %v9581_v12  ;;  %v9592_v12 = vld [vmem:[#allocation73_spill] sm:$0xff] }
 0x650   :  { %2232 = vmatprep.subr.mxu1 %v9582_v56  ;;  %v9593_v56 = vld [vmem:[#allocation75_spill] sm:$0xff] }
 0x651   :  { %2233 = vmatpush1.msra.mxu1 %v9583_v1  ;;  %v9594_v1 = vld [vmem:[#allocation77_spill] sm:$0xff] }
 0x652   :  { %2234 = vmatprep.subr.mxu1 %v9584_v51  ;;  %v9595_v51 = vld [vmem:[#allocation79_spill] sm:$0xff] }
 0x653   :  { %2235 = vmatpush1.msra.mxu1 %v9585_v7  ;;  %v9596_v7 = vld [vmem:[#allocation81_spill] sm:$0xff] }
 0x654   :  { %2236 = vmatprep.subr.mxu1 %v9586_v2  ;;  %v9597_v2 = vld [vmem:[#allocation83_spill] sm:$0xff] }
 0x655   :  { %2237 = vmatpush1.msra.mxu1 %v9587_v30  ;;  %v9598_v30 = vld [vmem:[#allocation85_spill] sm:$0xff] }
 0x656   :  { %2238 = vmatprep.subr.mxu1 %v9588_v57  ;;  %v9599_v57 = vld [vmem:[#allocation87_spill] sm:$0xff] }
 0x657   :  { %2239 = vmatpush2.msra.mxu1 %v9589_v28  ;;  %v9600_v28 = vld [vmem:[#allocation89_spill] sm:$0xff] }
 0x658   :  { %2240 = vmatprep.subr.mxu1 %v9590_v50  ;;  %v9601_v50 = vld [vmem:[#allocation91_spill] sm:$0xff] }
 0x659   :  { %2241 = vmatpush2.msra.mxu1 %v9591_v24  ;;  %v9602_v24 = vld [vmem:[#allocation93_spill] sm:$0xff] }
 0x65a   :  { %2242 = vmatprep.subr.mxu1 %v9592_v12  ;;  %v9603_v12 = vld [vmem:[#allocation95_spill] sm:$0xff] }
 0x65b   :  { %2243 = vmatpush2.msra.mxu1 %v9593_v56  ;;  %v9604_v56 = vld [vmem:[#allocation97_spill] sm:$0xff] }
 0x65c   :  { %2244 = vmatprep.subr.mxu1 %v9594_v1  ;;  %v9605_v1 = vld [vmem:[#allocation99_spill] sm:$0xff] }
 0x65d   :  { %2245 = vmatpush2.msra.mxu1 %v9595_v51  ;;  %v9606_v51 = vld [vmem:[#allocation101_spill] sm:$0xff] }
 0x65e   :  { %2246 = vmatprep.subr.mxu1 %v9596_v7  ;;  %v9607_v7 = vld [vmem:[#allocation102_spill] sm:$0xff] }
 0x65f   :  { %2247 = vmatpush2.msra.mxu1 %v9597_v2  ;;  %v9608_v2 = vld [vmem:[#allocation103_spill] sm:$0xff] }
 0x660   :  { %2248 = vmatprep.subr.mxu1 %v9598_v30  ;;  %v9609_v30 = vld [vmem:[#allocation104_spill] sm:$0xff] }
 0x661   :  { %2249 = vmatpush2.msra.mxu1 %v9599_v57  ;;  %v9610_v57 = vld [vmem:[#allocation105_spill] sm:$0xff] }
 0x662   :  { %2250 = vmatprep.subr.mxu1 %v9600_v28  ;;  %v9611_v28 = vld [vmem:[#allocation106_spill] sm:$0xff] }
 0x663   :  { %2251 = vmatpush2.msra.mxu1 %v9601_v50  ;;  %v9612_v50 = vld [vmem:[#allocation60_spill] sm:$0xff] }
 0x664   :  { %2252 = vmatprep.subr.mxu1 %v9602_v24  ;;  %v9613_v24 = vld [vmem:[#allocation107_spill] sm:$0xff] }
 0x665   :  { %2253 = vmatpush2.msra.mxu1 %v9603_v12  ;;  %v9614_v12 = vld [vmem:[#allocation62_spill] sm:$0xff] }
 0x666   :  { %2254 = vmatprep.subr.mxu1 %v9604_v56  ;;  %v9615_v56 = vld [vmem:[#allocation108_spill] sm:$0xff] }
 0x667   :  { %2255 = vmatpush2.msra.mxu1 %v9605_v1  ;;  %v2769_v26 = vld [vmem:[%s8032_s0 + $0x5] ss:$8 sm:$0xf] }
 0x668   :  { %2256 = vmatprep.subr.mxu1 %v9606_v51 }
 0x669   :  { %2257 = vmatpush2.msra.mxu1 %v9607_v7  ;;  %v7653_v7 = vld [vmem:[%s8029_s2 + $0x348] sm:$0xff] }
 0x66a   :  { %2258 = vmatprep.subr.mxu1 %v9608_v2  ;;  %9616 = vst [vmem:[#allocation156_spill] sm:$0xff] %v7653_v7 }
 0x66b   :  { %2259 = vmatpush2.msra.mxu1 %v9609_v30  ;;  %v9621_v30 = vld [vmem:[#allocation3_spill] sm:$0xff] }
 0x66c   :  { %2260 = vmatprep.subr.mxu1 %v9610_v57  ;;  %v7659_v57 = vld [vmem:[%s8029_s2 + $0x340] sm:$0xff] }
 0x66d   :  { %2261 = vmatpush2.msra.mxu1 %v9611_v28  ;;  %9617 = vst [vmem:[#allocation157_spill] sm:$0xff] %v7659_v57 }
 0x66e   :  { %2262 = vmatprep.subr.mxu1 %v9612_v50  ;;  %v9620_v50 = vld [vmem:[#allocation35_spill] sm:$0xff] }
 0x66f   :  { %2263 = vmatpush2.msra.mxu1 %v9613_v24 }
 0x670   :  { %2264 = vmatprep.subr.mxu1 %v9614_v12  ;;  %v7665_v12 = vld [vmem:[%s8029_s2 + $0x318] sm:$0xff] }
 0x671   :  { %2265 = vmatpush2.msra.mxu1 %v9615_v56  ;;  %9618 = vst [vmem:[#allocation158_spill] sm:$0xff] %v7665_v12  ;;  %v7671_v56 = vld [vmem:[%s8029_s2 + $0x310] sm:$0xff] }
 0x672   :  { %2266 = vmatprep.subr.mxu1 %v7653_v7  ;;  %9619 = vst [vmem:[#allocation159_spill] sm:$0xff] %v7671_v56  ;;  %v3249_v7 = vld [vmem:[%s8029_s2 + $0x2d8] sm:$0xff] }
 0x673   :  { %2267 = vmatpush2.msra.mxu1 %v7659_v57 }
 0x674   :  { %2268 = vmatprep.subr.mxu1 %v7665_v12 }
 0x675   :  { %2269 = vmatpush2.msra.mxu1 %v7671_v56  ;;  %v2770_v56 = vld [vmem:[%s8032_s0 + $0x5] ss:$8 sm:$0x30] }
 0x676   :  { %2446 = vmatprep.subr.mxu1 %v3249_v7  ;;  %v1812_v23 = vor.u32 %v2770_v56, %v2769_v26 }
 0x6b6   :  { %v1890_v57 = vpop.f32.mrf.mxu1  ;;  %v1961_v12 = vpop.f32.mrf.mxu0 }
 0x6b7   :  { %v1891_v2 = vadd.f32 %v1890_v57, %v9621_v30  ;;  %v1962_v57 = vadd.f32 %v1961_v12, %v4619_v42 }
 0x6b8   :  { %v1892_v24 = vpop.f32.mrf.mxu1  ;;  %v1963_v46 = vpop.f32.mrf.mxu0 }
 0x6b9   :  { %v1893_v28 = vadd.f32 %v1892_v24, %v9620_v50  ;;  %v1964_v24 = vadd.f32 %v1963_v46, %v4621_v52  ;;  %v2063_v50 = vrot.slane %v1812_v23, 2 }
 0x6bb   :  { %v2039_v51 = vcombine.low %v1891_v2, %v1893_v28  ;;  %v2067_v2 = vcombine.low %v1962_v57, %v1964_v24 }
 0x6bd   :  { %v2046_v1 = vrot.slane %v2039_v51, %v4608_v47  ;;  %v2074_v51 = vrot.slane %v2067_v2, %v4608_v47 }
 0x6bf   :  { %v2053_v7 = vrot.slane %v2046_v1, %v4608_v47  ;;  %v2081_v41 = vrot.slane %v2074_v51, %v4608_v47 }
 0x6c1   :  { %v2055_v28 = vadd.f32 %v2053_v7, %v1812_v23  ;;  %v2083_v33 = vadd.f32 %v2081_v41, %v2063_v50 }
 0x6c3   :  { %v2771_v30 = vmul.f32 -1.442695, %v2055_v28  ;;  %v2772_v61 = vmul.f32 -1.442695, %v2083_v33  ;;  %v2109_v28 = vrot.slane %v1812_v23, 4 }
 0x6c5   :  { %2835 = vpow2.f32 %v2771_v30 }
 0x6c6   :  { %2837 = vpow2.f32 %v2772_v61 }
 0x6d2   :  { %v2836_v60 = vpop.eup %2835 }
 0x6d3   :  { %v2059_v15 = vadd.f32 1.0, %v2836_v60  ;;  %v2838_v12 = vpop.eup %2837 }
 0x6d4   :  { %v2087_v24 = vadd.f32 1.0, %v2838_v12  ;;  %v9639_v12 = vld [vmem:[#allocation111_spill] sm:$0xff] }
 0x6d5   :  { %2839 = vrcp.f32 %v2059_v15 }
 0x6d6   :  { %2841 = vrcp.f32 %v2087_v24  ;;  %v9641_v24 = vld [vmem:[#allocation112_spill] sm:$0xff] }
 0x6e2   :  { %v2840_v41 = vpop.eup %2839 }
 0x6e3   :  { %v2842_v15 = vpop.eup %2841 }
 0x6e4   :  { %v2113_v60 = vsub.f32 1.0, %v2842_v15  ;;  %v2115_v51 = vmul.f32 %v2842_v15, %v7106_v35  ;;  %v9636_v35 = vld [vmem:[#allocation9_spill] sm:$0xff] }
 0x6e5   :  { %v9648_v15 = vld [vmem:[#allocation13_spill] sm:$0xff] }
 0x6f6   :  { %v2032_v26 = vpop.f32.mrf.mxu1 }
 0x6f7   :  { %v2033_v46 = vadd.f32 %v2032_v26, %v9053_v58 }
 0x6f8   :  { %v2034_v1 = vpop.f32.mrf.mxu1 }
 0x6f9   :  { %v2035_v56 = vadd.f32 %v2034_v1, %v4632_v19 }
 0x6fb   :  { %v2092_v7 = vcombine.low %v2033_v46, %v2035_v56  ;;  %v9637_v46 = vld [vmem:[#allocation110_spill] sm:$0xff]  ;;  %v9638_v56 = vld [vmem:[#allocation47_spill] sm:$0xff] }
 0x6fd   :  { %v2099_v30 = vrot.slane %v2092_v7, %v4608_v47  ;;  %v9640_v7 = vld [vmem:[#allocation10_spill] sm:$0xff] }
 0x6ff   :  { %v2106_v57 = vrot.slane %v2099_v30, %v4608_v47  ;;  %v9642_v30 = vld [vmem:[#allocation49_spill] sm:$0xff] }
 0x701   :  { %v2108_v33 = vmul.f32 %v2840_v41, %v2106_v57  ;;  %v9643_v57 = vld [vmem:[#allocation113_spill] sm:$0xff]  ;;  %v9645_v41 = vld [vmem:[#allocation114_spill] sm:$0xff] }
 0x703   :  { %v2111_v61 = vadd.f32 %v2109_v28, %v2108_v33  ;;  %v9644_v28 = vld [vmem:[#allocation12_spill] sm:$0xff]  ;;  %v9646_v33 = vld [vmem:[#allocation51_spill] sm:$0xff] }
 0x705   :  { %2843 = vtanh.f32 %v2111_v61  ;;  %v9647_v61 = vld [vmem:[#allocation115_spill] sm:$0xff] }
 0x712   :  { %v2844_v50 = vpop.eup %2843 }
 0x713   :  { %v2114_v2 = vmul.f32 %v2844_v50, %v2113_v60  ;;  %v9649_v60 = vld [vmem:[#allocation116_spill] sm:$0xff] }
 0x714   :  { %v9650_v50 = vld [vmem:[#allocation96_spill] sm:$0xff] }
 0x715   :  { %v7696_v26 = vadd.f32 %v2115_v51, %v2114_v2  ;;  %v9651_v2 = vld [vmem:[#allocation117_spill] sm:$0xff] }
 0x716   :  { %v9652_v51 = vld [vmem:[#allocation53_spill] sm:$0xff] }
 0x717   :  { %2773 = vst.msk [vmem:[%s8033_s4 + $0x5] ss:$8 sm:$0x3] %vm3516_vm0, %v7696_v26  ;;  %v2132_v23 = vrot.slane %v7696_v26, %v8902_v54  ;;  %v7708_v1 = vrot.slane %v7696_v26, %v8900_v37 }
 0x719   :  { %2199 = vmatprep.mubr.f32.mxu0 %v2132_v23  ;;  %2270 = vmatprep.mubr.f32.mxu1 %v2132_v23 }
 0x71a   :  { %2200 = vmatmul.mubr.f32.vlgmr.msra.gmra.mxu0 %v7708_v1  ;;  %2271 = vmatmul.mubr.f32.vlgmr.msra.gmra.mxu1 %v7708_v1 }
 0x71b   :  { %2278 = vmatpush1.msra.mxu0 %v7125_v3  ;;  %2341 = vmatprep.mubr.f32.mxu0 %v2132_v23  ;;  %v9653_v23 = vld [vmem:[#allocation118_spill] sm:$0xff] }
 0x71c   :  { %2279 = vmatprep.subr.mxu0 %v7131_v10  ;;  %2447 = vmatpush1.msra.mxu1 %v6304_v4  ;;  %v9622_v4 = vld [vmem:[#allocation94_spill] sm:$0xff] }
 0x71d   :  { %2280 = vmatpush1.msra.mxu0 %v7138_v39  ;;  %2448 = vmatprep.subr.mxu1 %v6311_v11  ;;  %v9623_v11 = vld [vmem:[#allocation37_spill] sm:$0xff] }
 0x71e   :  { %2281 = vmatprep.subr.mxu0 %v7145_v49  ;;  %2449 = vmatpush1.msra.mxu1 %v6318_v32  ;;  %v9624_v32 = vld [vmem:[#allocation5_spill] sm:$0xff] }
 0x71f   :  { %2282 = vmatpush1.msra.mxu0 %v7152_v9  ;;  %2450 = vmatprep.subr.mxu1 %v6325_v25  ;;  %v9625_v25 = vld [vmem:[#allocation39_spill] sm:$0xff] }
 0x720   :  { %2283 = vmatprep.subr.mxu0 %v7159_v14  ;;  %2451 = vmatpush1.msra.mxu1 %v6332_v45  ;;  %v9626_v45 = vld [vmem:[#allocation6_spill] sm:$0xff] }
 0x721   :  { %2284 = vmatpush1.msra.mxu0 %v7166_v44  ;;  %2452 = vmatprep.subr.mxu1 %v6339_v53  ;;  %v9627_v53 = vld [vmem:[#allocation41_spill] sm:$0xff] }
 0x722   :  { %2285 = vmatprep.subr.mxu0 %v7173_v18  ;;  %2453 = vmatpush1.msra.mxu1 %v6346_v43  ;;  %v9628_v43 = vld [vmem:[#allocation7_spill] sm:$0xff] }
 0x723   :  { %2286 = vmatpush1.msra.mxu0 %v7180_v0  ;;  %2454 = vmatprep.subr.mxu1 %v6353_v31  ;;  %v9629_v31 = vld [vmem:[#allocation64_spill] sm:$0xff] }
 0x724   :  { %2287 = vmatprep.subr.mxu0 %v7187_v13  ;;  %2455 = vmatpush1.msra.mxu1 %v6360_v29  ;;  %v9630_v29 = vld [vmem:[#allocation43_spill] sm:$0xff] }
 0x725   :  { %2288 = vmatpush1.msra.mxu0 %v7194_v55  ;;  %2456 = vmatprep.subr.mxu1 %v6367_v34  ;;  %v9631_v34 = vld [vmem:[#allocation66_spill] sm:$0xff] }
 0x726   :  { %2289 = vmatprep.subr.mxu0 %v7201_v5  ;;  %2457 = vmatpush1.msra.mxu1 %v6374_v22  ;;  %v9632_v22 = vld [vmem:[#allocation8_spill] sm:$0xff] }
 0x727   :  { %2290 = vmatpush1.msra.mxu0 %v7208_v21  ;;  %2458 = vmatprep.subr.mxu1 %v6381_v20  ;;  %v9633_v20 = vld [vmem:[#allocation68_spill] sm:$0xff] }
 0x728   :  { %2291 = vmatprep.subr.mxu0 %v7215_v59  ;;  %2459 = vmatpush1.msra.mxu1 %v6388_v17  ;;  %v9634_v17 = vld [vmem:[#allocation45_spill] sm:$0xff] }
 0x729   :  { %2292 = vmatpush1.msra.mxu0 %v7222_v8  ;;  %2460 = vmatprep.subr.mxu1 %v6395_v38  ;;  %v9635_v38 = vld [vmem:[#allocation109_spill] sm:$0xff] }
 0x72a   :  { %2293 = vmatprep.subr.mxu0 %v7229_v63  ;;  %2461 = vmatpush1.msra.mxu1 %v9622_v4  ;;  %v9654_v4 = vld [vmem:[#allocation98_spill] sm:$0xff] }
 0x72b   :  { %2294 = vmatpush1.msra.mxu0 %v7236_v6  ;;  %2462 = vmatprep.subr.mxu1 %v9623_v11  ;;  %v9655_v11 = vld [vmem:[#allocation119_spill] sm:$0xff] }
 0x72c   :  { %2295 = vmatprep.subr.mxu0 %v7243_v48  ;;  %2463 = vmatpush1.msra.mxu1 %v9624_v32  ;;  %v9656_v32 = vld [vmem:[#allocation14_spill] sm:$0xff] }
 0x72d   :  { %2296 = vmatpush1.msra.mxu0 %v7250_v36  ;;  %2464 = vmatprep.subr.mxu1 %v9625_v25  ;;  %v9657_v25 = vld [vmem:[#allocation124_spill] sm:$0xff] }
 0x72e   :  { %2297 = vmatprep.subr.mxu0 %v7257_v16  ;;  %2465 = vmatpush1.msra.mxu1 %v9626_v45  ;;  %v9658_v45 = vld [vmem:[#allocation100_spill] sm:$0xff] }
 0x72f   :  { %2298 = vmatpush1.msra.mxu0 %v7264_v27  ;;  %2466 = vmatprep.subr.mxu1 %v9627_v53  ;;  %v9659_v53 = vld [vmem:[#allocation125_spill] sm:$0xff] }
 0x730   :  { %2299 = vmatprep.subr.mxu0 %v7271_v40  ;;  %2467 = vmatpush1.msra.mxu1 %v9628_v43  ;;  %v9660_v43 = vld [vmem:[#allocation55_spill] sm:$0xff] }
 0x731   :  { %2300 = vmatpush1.msra.mxu0 %v9629_v31  ;;  %2468 = vmatprep.subr.mxu1 %v9630_v29  ;;  %v9661_v29 = vld [vmem:[#allocation126_spill] sm:$0xff] }
 0x732   :  { %2301 = vmatprep.subr.mxu0 %v9631_v34  ;;  %2469 = vmatpush1.msra.mxu1 %v9632_v22  ;;  %v9662_v22 = vld [vmem:[#allocation33_spill] sm:$0xff] }
 0x733   :  { %2302 = vmatpush1.msra.mxu0 %v9633_v20  ;;  %2470 = vmatprep.subr.mxu1 %v9634_v17  ;;  %v9663_v17 = vld [vmem:[#allocation127_spill] sm:$0xff] }
 0x734   :  { %2303 = vmatprep.subr.mxu0 %v9635_v38  ;;  %2471 = vmatpush1.msra.mxu1 %v9636_v35  ;;  %v9664_v35 = vld [vmem:[#allocation16_spill] sm:$0xff] }
 0x735   :  { %2304 = vmatpush1.msra.mxu0 %v9637_v46  ;;  %2472 = vmatprep.subr.mxu1 %v9638_v56  ;;  %v9665_v56 = vld [vmem:[#allocation128_spill] sm:$0xff] }
 0x736   :  { %2305 = vmatprep.subr.mxu0 %v9639_v12  ;;  %2473 = vmatpush1.msra.mxu1 %v9640_v7  ;;  %v9666_v7 = vld [vmem:[#allocation4_spill] sm:$0xff] }
 0x737   :  { %2306 = vmatpush1.msra.mxu0 %v9641_v24  ;;  %2474 = vmatprep.subr.mxu1 %v9642_v30  ;;  %v9667_v30 = vld [vmem:[#allocation129_spill] sm:$0xff] }
 0x738   :  { %2307 = vmatprep.subr.mxu0 %v9643_v57  ;;  %2475 = vmatpush1.msra.mxu1 %v9644_v28  ;;  %v9668_v28 = vld [vmem:[#allocation57_spill] sm:$0xff] }
 0x739   :  { %2308 = vmatpush1.msra.mxu0 %v9645_v41  ;;  %2476 = vmatprep.subr.mxu1 %v9646_v33  ;;  %v9669_v33 = vld [vmem:[#allocation130_spill] sm:$0xff] }
 0x73a   :  { %2309 = vmatprep.subr.mxu0 %v9647_v61  ;;  %2477 = vmatpush1.msra.mxu1 %v9648_v15  ;;  %v9670_v15 = vld [vmem:[#allocation120_spill] sm:$0xff] }
 0x73b   :  { %2310 = vmatpush2.msra.mxu0 %v9649_v60  ;;  %2478 = vmatprep.subr.mxu1 %v9650_v50  ;;  %v9671_v50 = vld [vmem:[#allocation131_spill] sm:$0xff] }
 0x73c   :  { %2311 = vmatprep.subr.mxu0 %v9651_v2  ;;  %2479 = vmatpush2.msra.mxu1 %v9652_v51  ;;  %v9672_v51 = vld [vmem:[#allocation17_spill] sm:$0xff] }
 0x73d   :  { %2312 = vmatpush2.msra.mxu0 %v9653_v23  ;;  %2480 = vmatprep.subr.mxu1 %v9654_v4  ;;  %v9673_v4 = vld [vmem:[#allocation132_spill] sm:$0xff] }
 0x73e   :  { %2313 = vmatprep.subr.mxu0 %v9655_v11  ;;  %2481 = vmatpush2.msra.mxu1 %v9656_v32  ;;  %v9674_v32 = vld [vmem:[#allocation121_spill] sm:$0xff] }
 0x73f   :  { %2314 = vmatpush2.msra.mxu0 %v9657_v25  ;;  %2482 = vmatprep.subr.mxu1 %v9658_v45  ;;  %v9675_v45 = vld [vmem:[#allocation133_spill] sm:$0xff] }
 0x740   :  { %2315 = vmatprep.subr.mxu0 %v9659_v53  ;;  %2483 = vmatpush2.msra.mxu1 %v9660_v43  ;;  %v9676_v43 = vld [vmem:[#allocation18_spill] sm:$0xff] }
 0x741   :  { %2316 = vmatpush2.msra.mxu0 %v9661_v29  ;;  %2484 = vmatprep.subr.mxu1 %v9662_v22  ;;  %v9677_v22 = vld [vmem:[#allocation134_spill] sm:$0xff] }
 0x742   :  { %2317 = vmatprep.subr.mxu0 %v9663_v17  ;;  %2485 = vmatpush2.msra.mxu1 %v9664_v35  ;;  %v9678_v35 = vld [vmem:[#allocation122_spill] sm:$0xff] }
 0x743   :  { %2318 = vmatpush2.msra.mxu0 %v9665_v56  ;;  %2486 = vmatprep.subr.mxu1 %v9666_v7  ;;  %v9679_v7 = vld [vmem:[#allocation135_spill] sm:$0xff] }
 0x744   :  { %2319 = vmatprep.subr.mxu0 %v9667_v30  ;;  %2487 = vmatpush2.msra.mxu1 %v9668_v28  ;;  %v9680_v28 = vld [vmem:[#allocation20_spill] sm:$0xff] }
 0x745   :  { %2320 = vmatpush2.msra.mxu0 %v9669_v33  ;;  %2488 = vmatprep.subr.mxu1 %v9670_v15  ;;  %v9681_v15 = vld [vmem:[#allocation136_spill] sm:$0xff]  ;;  %v9778_v33 = vld [vmem:[#allocation3_spill] sm:$0xff] }
 0x746   :  { %2321 = vmatprep.subr.mxu0 %v9671_v50  ;;  %2489 = vmatpush2.msra.mxu1 %v9672_v51  ;;  %v9682_v50 = vld [vmem:[#allocation123_spill] sm:$0xff]  ;;  %v9683_v51 = vld [vmem:[#allocation137_spill] sm:$0xff] }
 0x747   :  { %2322 = vmatpush2.msra.mxu0 %v9673_v4  ;;  %2490 = vmatprep.subr.mxu1 %v9674_v32  ;;  %v9684_v4 = vld [vmem:[#allocation21_spill] sm:$0xff]  ;;  %v9685_v32 = vld [vmem:[#allocation138_spill] sm:$0xff] }
 0x748   :  { %2323 = vmatprep.subr.mxu0 %v9675_v45  ;;  %2491 = vmatpush2.msra.mxu1 %v9676_v43  ;;  %v9686_v45 = vld [vmem:[#allocation22_spill] sm:$0xff]  ;;  %v9687_v43 = vld [vmem:[#allocation139_spill] sm:$0xff] }
 0x749   :  { %2324 = vmatpush2.msra.mxu0 %v9677_v22  ;;  %2492 = vmatprep.subr.mxu1 %v9678_v35  ;;  %v9688_v22 = vld [vmem:[#allocation24_spill] sm:$0xff] }
 0x74a   :  { %2325 = vmatprep.subr.mxu0 %v9679_v7  ;;  %2493 = vmatpush2.msra.mxu1 %v9680_v28  ;;  %v9689_v35 = vld [vmem:[#allocation140_spill] sm:$0xff]  ;;  %v9690_v7 = vld [vmem:[#allocation25_spill] sm:$0xff] }
 0x74b   :  { %2326 = vmatpush2.msra.mxu0 %v9681_v15  ;;  %2494 = vmatprep.subr.mxu1 %v9682_v50  ;;  %v9691_v28 = vld [vmem:[#allocation141_spill] sm:$0xff]  ;;  %v9692_v15 = vld [vmem:[#allocation26_spill] sm:$0xff] }
 0x74c   :  { %2327 = vmatprep.subr.mxu0 %v9683_v51  ;;  %2495 = vmatpush2.msra.mxu1 %v9684_v4  ;;  %v9693_v50 = vld [vmem:[#allocation142_spill] sm:$0xff]  ;;  %v9694_v51 = vld [vmem:[#allocation27_spill] sm:$0xff] }
 0x74d   :  { %2328 = vmatpush2.msra.mxu0 %v9685_v32  ;;  %2496 = vmatprep.subr.mxu1 %v9686_v45  ;;  %v9695_v4 = vld [vmem:[#allocation143_spill] sm:$0xff]  ;;  %v9696_v32 = vld [vmem:[#allocation28_spill] sm:$0xff] }
 0x74e   :  { %2329 = vmatprep.subr.mxu0 %v9687_v43  ;;  %2497 = vmatpush2.msra.mxu1 %v9688_v22  ;;  %v9697_v45 = vld [vmem:[#allocation144_spill] sm:$0xff]  ;;  %v9698_v43 = vld [vmem:[#allocation29_spill] sm:$0xff] }
 0x74f   :  { %2330 = vmatpush2.msra.mxu0 %v9689_v35  ;;  %2498 = vmatprep.subr.mxu1 %v9690_v7  ;;  %v9699_v22 = vld [vmem:[#allocation145_spill] sm:$0xff]  ;;  %v9700_v35 = vld [vmem:[#allocation30_spill] sm:$0xff] }
 0x750   :  { %2331 = vmatprep.subr.mxu0 %v9691_v28  ;;  %2499 = vmatpush2.msra.mxu1 %v9692_v15  ;;  %v9701_v7 = vld [vmem:[#allocation146_spill] sm:$0xff]  ;;  %v9702_v28 = vld [vmem:[#allocation31_spill] sm:$0xff] }
 0x751   :  { %2332 = vmatpush2.msra.mxu0 %v9693_v50  ;;  %2500 = vmatprep.subr.mxu1 %v9694_v51  ;;  %v9703_v15 = vld [vmem:[#allocation147_spill] sm:$0xff]  ;;  %v9704_v50 = vld [vmem:[#allocation32_spill] sm:$0xff] }
 0x752   :  { %2333 = vmatprep.subr.mxu0 %v9695_v4  ;;  %2501 = vmatpush2.msra.mxu1 %v9696_v32  ;;  %v9705_v51 = vld [vmem:[#allocation148_spill] sm:$0xff]  ;;  %v9706_v4 = vld [vmem:[#allocation149_spill] sm:$0xff]  ;;  %v9707_v32 = vld [vmem:[#allocation150_spill] sm:$0xff] }
 0x753   :  { %2334 = vmatpush2.msra.mxu0 %v9697_v45  ;;  %2502 = vmatprep.subr.mxu1 %v9698_v43  ;;  %v9708_v45 = vld [vmem:[#allocation151_spill] sm:$0xff]  ;;  %v9709_v43 = vld [vmem:[#allocation152_spill] sm:$0xff] }
 0x754   :  { %2335 = vmatprep.subr.mxu0 %v9699_v22  ;;  %2503 = vmatpush2.msra.mxu1 %v9700_v35  ;;  %v9710_v22 = vld [vmem:[#allocation153_spill] sm:$0xff]  ;;  %v9711_v35 = vld [vmem:[#allocation34_spill] sm:$0xff] }
 0x755   :  { %2336 = vmatpush2.msra.mxu0 %v9701_v7  ;;  %2504 = vmatprep.subr.mxu1 %v9702_v28  ;;  %v9712_v28 = vld [vmem:[#allocation36_spill] sm:$0xff]  ;;  %v9777_v7 = vld [vmem:[#allocation35_spill] sm:$0xff] }
 0x756   :  { %2337 = vmatprep.subr.mxu0 %v9703_v15  ;;  %2505 = vmatpush2.msra.mxu1 %v9704_v50  ;;  %v9713_v15 = vld [vmem:[#allocation154_spill] sm:$0xff] }
 0x757   :  { %2338 = vmatpush2.msra.mxu0 %v9705_v51  ;;  %2506 = vmatprep.subr.mxu1 %v9706_v4  ;;  %v9714_v50 = vld [vmem:[#allocation38_spill] sm:$0xff]  ;;  %v9715_v51 = vld [vmem:[#allocation155_spill] sm:$0xff]  ;;  %v9716_v4 = vld [vmem:[#allocation40_spill] sm:$0xff] }
 0x758   :  { %2339 = vmatprep.subr.mxu0 %v9707_v32  ;;  %2507 = vmatpush2.msra.mxu1 %v9708_v45  ;;  %v9717_v32 = vld [vmem:[#allocation42_spill] sm:$0xff]  ;;  %v9718_v45 = vld [vmem:[#allocation44_spill] sm:$0xff] }
 0x759   :  { %2340 = vmatpush2.msra.mxu0 %v9709_v43  ;;  %2508 = vmatprep.subr.mxu1 %v9710_v22  ;;  %v9719_v43 = vld [vmem:[#allocation46_spill] sm:$0xff]  ;;  %v9720_v22 = vld [vmem:[#allocation48_spill] sm:$0xff] }
 0x75a   :  { %2342 = vmatmul.mubr.f32.vlgmr.msra.gmra.mxu0 %v7708_v1  ;;  %2517 = vmatprep.subr.mxu0 %v9711_v35  ;;  %v9721_v1 = vld [vmem:[#allocation50_spill] sm:$0xff]  ;;  %v9722_v35 = vld [vmem:[#allocation52_spill] sm:$0xff] }
 0x75b   :  { %2518 = vmatpush1.msra.mxu0 %v9712_v28  ;;  %2509 = vmatpush2.msra.mxu1 %v9713_v15  ;;  %v9723_v28 = vld [vmem:[#allocation54_spill] sm:$0xff]  ;;  %v9724_v15 = vld [vmem:[#allocation56_spill] sm:$0xff] }
 0x75c   :  { %2519 = vmatprep.subr.mxu0 %v9714_v50  ;;  %2588 = vmatprep.subr.mxu1 %v9715_v51  ;;  %v9725_v50 = vld [vmem:[#allocation59_spill] sm:$0xff]  ;;  %v9726_v51 = vld [vmem:[#allocation61_spill] sm:$0xff] }
 0x75d   :  { %2520 = vmatpush1.msra.mxu0 %v9716_v4  ;;  %v9727_v4 = vld [vmem:[#allocation63_spill] sm:$0xff] }
 0x75e   :  { %2521 = vmatprep.subr.mxu0 %v9717_v32  ;;  %v9728_v32 = vld [vmem:[#allocation65_spill] sm:$0xff] }
 0x75f   :  { %2522 = vmatpush1.msra.mxu0 %v9718_v45  ;;  %v9729_v45 = vld [vmem:[#allocation67_spill] sm:$0xff] }
 0x760   :  { %2523 = vmatprep.subr.mxu0 %v9719_v43  ;;  %v9730_v43 = vld [vmem:[#allocation70_spill] sm:$0xff] }
 0x761   :  { %2524 = vmatpush1.msra.mxu0 %v9720_v22  ;;  %v9731_v22 = vld [vmem:[#allocation72_spill] sm:$0xff] }
 0x762   :  { %2525 = vmatprep.subr.mxu0 %v9721_v1  ;;  %v9732_v1 = vld [vmem:[#allocation74_spill] sm:$0xff] }
 0x763   :  { %2526 = vmatpush1.msra.mxu0 %v9722_v35  ;;  %v9733_v35 = vld [vmem:[#allocation76_spill] sm:$0xff] }
 0x764   :  { %2527 = vmatprep.subr.mxu0 %v9723_v28  ;;  %v9734_v28 = vld [vmem:[#allocation78_spill] sm:$0xff] }
 0x765   :  { %2528 = vmatpush1.msra.mxu0 %v9724_v15  ;;  %v9735_v15 = vld [vmem:[#allocation80_spill] sm:$0xff] }
 0x766   :  { %2529 = vmatprep.subr.mxu0 %v9725_v50  ;;  %v9736_v50 = vld [vmem:[#allocation82_spill] sm:$0xff] }
 0x767   :  { %2530 = vmatpush1.msra.mxu0 %v9726_v51  ;;  %v9737_v51 = vld [vmem:[#allocation84_spill] sm:$0xff] }
 0x768   :  { %2531 = vmatprep.subr.mxu0 %v9727_v4  ;;  %v9738_v4 = vld [vmem:[#allocation86_spill] sm:$0xff] }
 0x769   :  { %2532 = vmatpush1.msra.mxu0 %v9728_v32  ;;  %v9739_v32 = vld [vmem:[#allocation88_spill] sm:$0xff] }
 0x76a   :  { %2533 = vmatprep.subr.mxu0 %v9729_v45  ;;  %v9740_v45 = vld [vmem:[#allocation90_spill] sm:$0xff] }
 0x76b   :  { %2534 = vmatpush1.msra.mxu0 %v9730_v43  ;;  %v9741_v43 = vld [vmem:[#allocation92_spill] sm:$0xff] }
 0x76c   :  { %2535 = vmatprep.subr.mxu0 %v9731_v22  ;;  %v9742_v22 = vld [vmem:[#allocation58_spill] sm:$0xff] }
 0x76d   :  { %2536 = vmatpush1.msra.mxu0 %v9732_v1  ;;  %v9743_v1 = vld [vmem:[#allocation19_spill] sm:$0xff] }
 0x76e   :  { %2537 = vmatprep.subr.mxu0 %v9733_v35  ;;  %v9744_v35 = vld [vmem:[#allocation15_spill] sm:$0xff] }
 0x76f   :  { %2538 = vmatpush1.msra.mxu0 %v9734_v28  ;;  %v9745_v28 = vld [vmem:[#allocation23_spill] sm:$0xff] }
 0x770   :  { %2539 = vmatprep.subr.mxu0 %v9735_v15  ;;  %v9746_v15 = vld [vmem:[#allocation11_spill] sm:$0xff] }
 0x771   :  { %2540 = vmatpush1.msra.mxu0 %v9736_v50  ;;  %v9747_v50 = vld [vmem:[#allocation69_spill] sm:$0xff] }
 0x772   :  { %2541 = vmatprep.subr.mxu0 %v9737_v51  ;;  %v9748_v51 = vld [vmem:[#allocation71_spill] sm:$0xff] }
 0x773   :  { %2542 = vmatpush1.msra.mxu0 %v9738_v4  ;;  %v9749_v4 = vld [vmem:[#allocation73_spill] sm:$0xff] }
 0x774   :  { %2543 = vmatprep.subr.mxu0 %v9739_v32  ;;  %v9750_v32 = vld [vmem:[#allocation75_spill] sm:$0xff] }
 0x775   :  { %2544 = vmatpush1.msra.mxu0 %v9740_v45  ;;  %v9751_v45 = vld [vmem:[#allocation77_spill] sm:$0xff] }
 0x776   :  { %2545 = vmatprep.subr.mxu0 %v9741_v43  ;;  %v9752_v43 = vld [vmem:[#allocation79_spill] sm:$0xff] }
 0x777   :  { %2546 = vmatpush1.msra.mxu0 %v9742_v22  ;;  %v9753_v22 = vld [vmem:[#allocation81_spill] sm:$0xff] }
 0x778   :  { %2547 = vmatprep.subr.mxu0 %v9743_v1  ;;  %v9754_v1 = vld [vmem:[#allocation83_spill] sm:$0xff] }
 0x779   :  { %2548 = vmatpush1.msra.mxu0 %v9744_v35  ;;  %v9755_v35 = vld [vmem:[#allocation85_spill] sm:$0xff] }
 0x77a   :  { %2549 = vmatprep.subr.mxu0 %v9745_v28  ;;  %v9756_v28 = vld [vmem:[#allocation87_spill] sm:$0xff] }
 0x77b   :  { %2550 = vmatpush2.msra.mxu0 %v9746_v15  ;;  %v9757_v15 = vld [vmem:[#allocation89_spill] sm:$0xff] }
 0x77c   :  { %2551 = vmatprep.subr.mxu0 %v9747_v50  ;;  %v9758_v50 = vld [vmem:[#allocation91_spill] sm:$0xff] }
 0x77d   :  { %2552 = vmatpush2.msra.mxu0 %v9748_v51  ;;  %v9759_v51 = vld [vmem:[#allocation93_spill] sm:$0xff] }
 0x77e   :  { %2553 = vmatprep.subr.mxu0 %v9749_v4  ;;  %v9760_v4 = vld [vmem:[#allocation95_spill] sm:$0xff] }
 0x77f   :  { %2554 = vmatpush2.msra.mxu0 %v9750_v32  ;;  %v9761_v32 = vld [vmem:[#allocation97_spill] sm:$0xff] }
 0x780   :  { %2555 = vmatprep.subr.mxu0 %v9751_v45  ;;  %v9762_v45 = vld [vmem:[#allocation99_spill] sm:$0xff] }
 0x781   :  { %2556 = vmatpush2.msra.mxu0 %v9752_v43  ;;  %v9763_v43 = vld [vmem:[#allocation101_spill] sm:$0xff] }
 0x782   :  { %2557 = vmatprep.subr.mxu0 %v9753_v22  ;;  %v9764_v22 = vld [vmem:[#allocation102_spill] sm:$0xff] }
 0x783   :  { %2558 = vmatpush2.msra.mxu0 %v9754_v1  ;;  %v9765_v1 = vld [vmem:[#allocation103_spill] sm:$0xff] }
 0x784   :  { %2559 = vmatprep.subr.mxu0 %v9755_v35  ;;  %v9766_v35 = vld [vmem:[#allocation104_spill] sm:$0xff] }
 0x785   :  { %2560 = vmatpush2.msra.mxu0 %v9756_v28  ;;  %v9767_v28 = vld [vmem:[#allocation105_spill] sm:$0xff] }
 0x786   :  { %2561 = vmatprep.subr.mxu0 %v9757_v15  ;;  %v9768_v15 = vld [vmem:[#allocation106_spill] sm:$0xff] }
 0x787   :  { %2562 = vmatpush2.msra.mxu0 %v9758_v50  ;;  %v9769_v50 = vld [vmem:[#allocation60_spill] sm:$0xff] }
 0x788   :  { %2563 = vmatprep.subr.mxu0 %v9759_v51  ;;  %v9770_v51 = vld [vmem:[#allocation107_spill] sm:$0xff] }
 0x789   :  { %2564 = vmatpush2.msra.mxu0 %v9760_v4  ;;  %v9771_v4 = vld [vmem:[#allocation62_spill] sm:$0xff] }
 0x78a   :  { %2565 = vmatprep.subr.mxu0 %v9761_v32  ;;  %v9772_v32 = vld [vmem:[#allocation108_spill] sm:$0xff] }
 0x78b   :  { %2566 = vmatpush2.msra.mxu0 %v9762_v45  ;;  %v9773_v45 = vld [vmem:[#allocation156_spill] sm:$0xff] }
 0x78c   :  { %2567 = vmatprep.subr.mxu0 %v9763_v43  ;;  %v9774_v43 = vld [vmem:[#allocation157_spill] sm:$0xff] }
 0x78d   :  { %2568 = vmatpush2.msra.mxu0 %v9764_v22  ;;  %v9775_v22 = vld [vmem:[#allocation158_spill] sm:$0xff] }
 0x78e   :  { %2569 = vmatprep.subr.mxu0 %v9765_v1  ;;  %v9776_v1 = vld [vmem:[#allocation159_spill] sm:$0xff] }
 0x78f   :  { %2570 = vmatpush2.msra.mxu0 %v9766_v35 }
 0x790   :  { %2571 = vmatprep.subr.mxu0 %v9767_v28 }
 0x791   :  { %2572 = vmatpush2.msra.mxu0 %v9768_v15 }
 0x792   :  { %2573 = vmatprep.subr.mxu0 %v9769_v50 }
 0x793   :  { %2574 = vmatpush2.msra.mxu0 %v9770_v51 }
 0x794   :  { %2575 = vmatprep.subr.mxu0 %v9771_v4 }
 0x795   :  { %2576 = vmatpush2.msra.mxu0 %v9772_v32  ;;  %v2774_v32 = vld [vmem:[%s8032_s0 + $0x6] ss:$8 sm:$0xf] }
 0x796   :  { %2577 = vmatprep.subr.mxu0 %v9773_v45  ;;  %v2775_v45 = vld [vmem:[%s8032_s0 + $0x6] ss:$8 sm:$0x30] }
 0x797   :  { %2578 = vmatpush2.msra.mxu0 %v9774_v43 }
 0x798   :  { %2579 = vmatprep.subr.mxu0 %v9775_v22 }
 0x799   :  { %2580 = vmatpush2.msra.mxu0 %v9776_v1  ;;  %v2123_v1 = vor.u32 %v2775_v45, %v2774_v32 }
 0x7da   :  { %v2201_v35 = vpop.f32.mrf.mxu0  ;;  %v2272_v51 = vpop.f32.mrf.mxu1 }
 0x7db   :  { %v2202_v50 = vadd.f32 %v2201_v35, %v9778_v33  ;;  %v2273_v35 = vadd.f32 %v2272_v51, %v4619_v42 }
 0x7dc   :  { %v2203_v28 = vpop.f32.mrf.mxu0  ;;  %v2274_v43 = vpop.f32.mrf.mxu1 }
 0x7dd   :  { %v2204_v15 = vadd.f32 %v2203_v28, %v9777_v7  ;;  %v2275_v28 = vadd.f32 %v2274_v43, %v4621_v52  ;;  %v2374_v7 = vrot.slane %v2123_v1, 2 }
 0x7df   :  { %v2350_v30 = vcombine.low %v2202_v50, %v2204_v15  ;;  %v2378_v50 = vcombine.low %v2273_v35, %v2275_v28 }
 0x7e1   :  { %v2357_v4 = vrot.slane %v2350_v30, %v4608_v47  ;;  %v2385_v30 = vrot.slane %v2378_v50, %v4608_v47 }
 0x7e3   :  { %v2364_v22 = vrot.slane %v2357_v4, %v4608_v47  ;;  %v2392_v56 = vrot.slane %v2385_v30, %v4608_v47 }
 0x7e5   :  { %v2366_v15 = vadd.f32 %v2364_v22, %v2123_v1  ;;  %v2394_v17 = vadd.f32 %v2392_v56, %v2374_v7 }
 0x7e7   :  { %v2776_v33 = vmul.f32 -1.442695, %v2366_v15  ;;  %v2777_v29 = vmul.f32 -1.442695, %v2394_v17  ;;  %v2420_v15 = vrot.slane %v2123_v1, 4 }
 0x7e9   :  { %2845 = vpow2.f32 %v2776_v33 }
 0x7ea   :  { %2847 = vpow2.f32 %v2777_v29 }
 0x7f6   :  { %v2846_v53 = vpop.eup %2845 }
 0x7f7   :  { %v2370_v25 = vadd.f32 1.0, %v2846_v53  ;;  %v2848_v43 = vpop.eup %2847 }
 0x7f8   :  { %v2398_v28 = vadd.f32 1.0, %v2848_v43 }
 0x7f9   :  { %2849 = vrcp.f32 %v2370_v25 }
 0x7fa   :  { %2851 = vrcp.f32 %v2398_v28 }
 0x806   :  { %v2850_v56 = vpop.eup %2849 }
 0x807   :  { %v2852_v25 = vpop.eup %2851 }
 0x808   :  { %v2424_v53 = vsub.f32 1.0, %v2852_v25  ;;  %v2426_v30 = vmul.f32 %v2852_v25, %v7696_v26  ;;  %v9803_v26 = vld [vmem:[#allocation148_spill] sm:$0xff] }
 0x81a   :  { %v2343_v4 = vpop.f32.mrf.mxu0 }
 0x81b   :  { %v2344_v45 = vadd.f32 %v2343_v4, %v9053_v58 }
 0x81c   :  { %v2345_v32 = vpop.f32.mrf.mxu0 }
 0x81d   :  { %v2346_v51 = vadd.f32 %v2345_v32, %v4632_v19 }
 0x81f   :  { %v2403_v22 = vcombine.low %v2344_v45, %v2346_v51 }
 0x821   :  { %v2410_v33 = vrot.slane %v2403_v22, %v4608_v47 }
 0x823   :  { %v2417_v35 = vrot.slane %v2410_v33, %v4608_v47 }
 0x825   :  { %v2419_v17 = vmul.f32 %v2850_v56, %v2417_v35 }
 0x827   :  { %v2422_v29 = vadd.f32 %v2420_v15, %v2419_v17 }
 0x829   :  { %2853 = vtanh.f32 %v2422_v29 }
 0x836   :  { %v2854_v7 = vpop.eup %2853 }
 0x837   :  { %v2425_v50 = vmul.f32 %v2854_v7, %v2424_v53 }
 0x839   :  { %v7923_v4 = vadd.f32 %v2426_v30, %v2425_v50 }
 0x83b   :  { %2778 = vst.msk [vmem:[%s8033_s4 + $0x6] ss:$8 sm:$0x3] %vm3516_vm0, %v7923_v4  ;;  %v2443_v1 = vrot.slane %v7923_v4, %v8902_v54  ;;  %v7935_v32 = vrot.slane %v7923_v4, %v8900_v37  ;;  %v9779_v37 = vld [vmem:[#allocation124_spill] sm:$0xff]  ;;  %v9780_v54 = vld [vmem:[#allocation125_spill] sm:$0xff] }
 0x83d   :  { %2510 = vmatprep.mubr.f32.mxu1 %v2443_v1  ;;  %2581 = vmatprep.mubr.f32.mxu0 %v2443_v1 }
 0x83e   :  { %2511 = vmatmul.mubr.f32.vlgmr.msra.gmra.mxu1 %v7935_v32  ;;  %2582 = vmatmul.mubr.f32.vlgmr.msra.gmra.mxu0 %v7935_v32 }
 0x83f   :  { %2589 = vmatpush1.msra.mxu1 %v7125_v3  ;;  %2652 = vmatprep.mubr.f32.mxu1 %v2443_v1  ;;  %v9785_v3 = vld [vmem:[#allocation130_spill] sm:$0xff] }
 0x840   :  { %2590 = vmatprep.subr.mxu1 %v7131_v10  ;;  %v9786_v10 = vld [vmem:[#allocation131_spill] sm:$0xff] }
 0x841   :  { %2591 = vmatpush1.msra.mxu1 %v7138_v39  ;;  %v9787_v39 = vld [vmem:[#allocation132_spill] sm:$0xff] }
 0x842   :  { %2592 = vmatprep.subr.mxu1 %v7145_v49  ;;  %v9788_v49 = vld [vmem:[#allocation133_spill] sm:$0xff] }
 0x843   :  { %2593 = vmatpush1.msra.mxu1 %v7152_v9  ;;  %v9789_v9 = vld [vmem:[#allocation134_spill] sm:$0xff] }
 0x844   :  { %2594 = vmatprep.subr.mxu1 %v7159_v14  ;;  %v9790_v14 = vld [vmem:[#allocation135_spill] sm:$0xff] }
 0x845   :  { %2595 = vmatpush1.msra.mxu1 %v7166_v44  ;;  %v9791_v44 = vld [vmem:[#allocation136_spill] sm:$0xff] }
 0x846   :  { %2596 = vmatprep.subr.mxu1 %v7173_v18  ;;  %v9792_v18 = vld [vmem:[#allocation137_spill] sm:$0xff] }
 0x847   :  { %2597 = vmatpush1.msra.mxu1 %v7180_v0  ;;  %v9793_v0 = vld [vmem:[#allocation138_spill] sm:$0xff] }
 0x848   :  { %2598 = vmatprep.subr.mxu1 %v7187_v13  ;;  %v9794_v13 = vld [vmem:[#allocation139_spill] sm:$0xff] }
 0x849   :  { %2599 = vmatpush1.msra.mxu1 %v7194_v55  ;;  %v9795_v55 = vld [vmem:[#allocation140_spill] sm:$0xff] }
 0x84a   :  { %2600 = vmatprep.subr.mxu1 %v7201_v5  ;;  %v9796_v5 = vld [vmem:[#allocation141_spill] sm:$0xff] }
 0x84b   :  { %2601 = vmatpush1.msra.mxu1 %v7208_v21  ;;  %v9797_v21 = vld [vmem:[#allocation142_spill] sm:$0xff] }
 0x84c   :  { %2602 = vmatprep.subr.mxu1 %v7215_v59  ;;  %v9798_v59 = vld [vmem:[#allocation143_spill] sm:$0xff] }
 0x84d   :  { %2603 = vmatpush1.msra.mxu1 %v7222_v8  ;;  %v9799_v8 = vld [vmem:[#allocation144_spill] sm:$0xff] }
 0x84e   :  { %2604 = vmatprep.subr.mxu1 %v7229_v63  ;;  %v9800_v63 = vld [vmem:[#allocation145_spill] sm:$0xff] }
 0x84f   :  { %2605 = vmatpush1.msra.mxu1 %v7236_v6  ;;  %v9801_v6 = vld [vmem:[#allocation146_spill] sm:$0xff] }
 0x850   :  { %2606 = vmatprep.subr.mxu1 %v7243_v48  ;;  %v9802_v48 = vld [vmem:[#allocation147_spill] sm:$0xff] }
 0x851   :  { %2607 = vmatpush1.msra.mxu1 %v7250_v36  ;;  %v9781_v36 = vld [vmem:[#allocation126_spill] sm:$0xff] }
 0x852   :  { %2608 = vmatprep.subr.mxu1 %v7257_v16  ;;  %v9782_v16 = vld [vmem:[#allocation127_spill] sm:$0xff] }
 0x853   :  { %2609 = vmatpush1.msra.mxu1 %v7264_v27  ;;  %v9783_v27 = vld [vmem:[#allocation128_spill] sm:$0xff] }
 0x854   :  { %2610 = vmatprep.subr.mxu1 %v7271_v40  ;;  %v9784_v40 = vld [vmem:[#allocation129_spill] sm:$0xff] }
 0x855   :  { %2611 = vmatpush1.msra.mxu1 %v9629_v31  ;;  %v9804_v31 = vld [vmem:[#allocation150_spill] sm:$0xff] }
 0x856   :  { %2612 = vmatprep.subr.mxu1 %v9631_v34  ;;  %v9805_v34 = vld [vmem:[#allocation152_spill] sm:$0xff] }
 0x857   :  { %2613 = vmatpush1.msra.mxu1 %v9633_v20 }
 0x858   :  { %2614 = vmatprep.subr.mxu1 %v9635_v38 }
 0x859   :  { %2615 = vmatpush1.msra.mxu1 %v9637_v46  ;;  %v9806_v46 = vld [vmem:[#allocation35_spill] sm:$0xff] }
 0x85a   :  { %2616 = vmatprep.subr.mxu1 %v9639_v12 }
 0x85b   :  { %2617 = vmatpush1.msra.mxu1 %v9641_v24  ;;  %v9807_v24 = vld [vmem:[#allocation3_spill] sm:$0xff] }
 0x85c   :  { %2618 = vmatprep.subr.mxu1 %v9643_v57 }
 0x85d   :  { %2619 = vmatpush1.msra.mxu1 %v9645_v41 }
 0x85e   :  { %2620 = vmatprep.subr.mxu1 %v9647_v61 }
 0x85f   :  { %2621 = vmatpush2.msra.mxu1 %v9649_v60 }
 0x860   :  { %2622 = vmatprep.subr.mxu1 %v9651_v2  ;;  %v2779_v2 = vld [vmem:[%s8032_s0 + $0x7] ss:$8 sm:$0xf] }
 0x861   :  { %2623 = vmatpush2.msra.mxu1 %v9653_v23  ;;  %v2780_v23 = vld [vmem:[%s8032_s0 + $0x7] ss:$8 sm:$0x30] }
 0x862   :  { %2624 = vmatprep.subr.mxu1 %v9655_v11  ;;  %v2434_v51 = vor.u32 %v2780_v23, %v2779_v2 }
 0x863   :  { %2625 = vmatpush2.msra.mxu1 %v9779_v37 }
 0x864   :  { %2626 = vmatprep.subr.mxu1 %v9780_v54  ;;  %v2685_v56 = vrot.slane %v2434_v51, 2 }
 0x865   :  { %2627 = vmatpush2.msra.mxu1 %v9781_v36 }
 0x866   :  { %2628 = vmatprep.subr.mxu1 %v9782_v16  ;;  %v2731_v16 = vrot.slane %v2434_v51, 4 }
 0x867   :  { %2629 = vmatpush2.msra.mxu1 %v9783_v27 }
 0x868   :  { %2630 = vmatprep.subr.mxu1 %v9784_v40 }
 0x869   :  { %2631 = vmatpush2.msra.mxu1 %v9785_v3 }
 0x86a   :  { %2632 = vmatprep.subr.mxu1 %v9786_v10 }
 0x86b   :  { %2633 = vmatpush2.msra.mxu1 %v9787_v39 }
 0x86c   :  { %2634 = vmatprep.subr.mxu1 %v9788_v49 }
 0x86d   :  { %2635 = vmatpush2.msra.mxu1 %v9789_v9 }
 0x86e   :  { %2636 = vmatprep.subr.mxu1 %v9790_v14 }
 0x86f   :  { %2637 = vmatpush2.msra.mxu1 %v9791_v44 }
 0x870   :  { %2638 = vmatprep.subr.mxu1 %v9792_v18 }
 0x871   :  { %2639 = vmatpush2.msra.mxu1 %v9793_v0 }
 0x872   :  { %2640 = vmatprep.subr.mxu1 %v9794_v13 }
 0x873   :  { %2641 = vmatpush2.msra.mxu1 %v9795_v55 }
 0x874   :  { %2642 = vmatprep.subr.mxu1 %v9796_v5 }
 0x875   :  { %2643 = vmatpush2.msra.mxu1 %v9797_v21 }
 0x876   :  { %2644 = vmatprep.subr.mxu1 %v9798_v59 }
 0x877   :  { %2645 = vmatpush2.msra.mxu1 %v9799_v8 }
 0x878   :  { %2646 = vmatprep.subr.mxu1 %v9800_v63 }
 0x879   :  { %2647 = vmatpush2.msra.mxu1 %v9801_v6 }
 0x87a   :  { %2648 = vmatprep.subr.mxu1 %v9802_v48 }
 0x87b   :  { %2649 = vmatpush2.msra.mxu1 %v9803_v26 }
 0x87c   :  { %2650 = vmatprep.subr.mxu1 %v9804_v31 }
 0x87d   :  { %2651 = vmatpush2.msra.mxu1 %v9805_v34 }
 0x87e   :  { %2653 = vmatmul.mubr.f32.vlgmr.msra.gmra.mxu1 %v7935_v32 }
 0x8fe   :  { %v2512_v20 = vpop.f32.mrf.mxu1  ;;  %v2583_v61 = vpop.f32.mrf.mxu0 }
 0x8ff   :  { %v2513_v57 = vadd.f32 %v2512_v20, %v9807_v24  ;;  %v2584_v22 = vadd.f32 %v2583_v61, %v4619_v42 }
 0x900   :  { %v2514_v38 = vpop.f32.mrf.mxu1  ;;  %v2585_v11 = vpop.f32.mrf.mxu0 }
 0x901   :  { %v2515_v12 = vadd.f32 %v2514_v38, %v9806_v46  ;;  %v2586_v43 = vadd.f32 %v2585_v11, %v4621_v52 }
 0x903   :  { %v2661_v41 = vcombine.low %v2513_v57, %v2515_v12  ;;  %v2689_v33 = vcombine.low %v2584_v22, %v2586_v43 }
 0x905   :  { %v2668_v60 = vrot.slane %v2661_v41, %v4608_v47  ;;  %v2696_v15 = vrot.slane %v2689_v33, %v4608_v47 }
 0x907   :  { %v2675_v45 = vrot.slane %v2668_v60, %v4608_v47  ;;  %v2703_v17 = vrot.slane %v2696_v15, %v4608_v47 }
 0x909   :  { %v2677_v28 = vadd.f32 %v2675_v45, %v2434_v51  ;;  %v2705_v29 = vadd.f32 %v2703_v17, %v2685_v56 }
 0x90b   :  { %v2781_v35 = vmul.f32 -1.442695, %v2677_v28  ;;  %v2782_v25 = vmul.f32 -1.442695, %v2705_v29 }
 0x90d   :  { %2855 = vpow2.f32 %v2781_v35 }
 0x90e   :  { %2857 = vpow2.f32 %v2782_v25 }
 0x91a   :  { %v2856_v53 = vpop.eup %2855 }
 0x91b   :  { %v2681_v7 = vadd.f32 1.0, %v2856_v53  ;;  %v2858_v1 = vpop.eup %2857 }
 0x91c   :  { %v2709_v37 = vadd.f32 1.0, %v2858_v1 }
 0x91d   :  { %2859 = vrcp.f32 %v2681_v7 }
 0x91e   :  { %2861 = vrcp.f32 %v2709_v37 }
 0x92a   :  { %v2860_v27 = vpop.eup %2859 }
 0x92b   :  { %v2862_v10 = vpop.eup %2861 }
 0x92c   :  { %v2735_v39 = vsub.f32 1.0, %v2862_v10 }
 0x93e   :  { %v2654_v50 = vpop.f32.mrf.mxu1 }
 0x93f   :  { %v2655_v52 = vadd.f32 %v2654_v50, %v9053_v58  ;;  %v2737_v58 = vmul.f32 %v2862_v10, %v7923_v4 }
 0x940   :  { %v2656_v30 = vpop.f32.mrf.mxu1 }
 0x941   :  { %v2657_v42 = vadd.f32 %v2656_v30, %v4632_v19 }
 0x943   :  { %v2714_v32 = vcombine.low %v2655_v52, %v2657_v42 }
 0x945   :  { %v2721_v54 = vrot.slane %v2714_v32, %v4608_v47 }
 0x947   :  { %v2728_v36 = vrot.slane %v2721_v54, %v4608_v47 }
 0x949   :  { %v2730_v40 = vmul.f32 %v2860_v27, %v2728_v36 }
 0x94b   :  { %v2733_v3 = vadd.f32 %v2731_v16, %v2730_v40 }
 0x94d   :  { %2863 = vtanh.f32 %v2733_v3 }
 0x95a   :  { %v2864_v49 = vpop.eup %2863 }
 0x95b   :  { %v2736_v9 = vmul.f32 %v2864_v49, %v2735_v39 }
 0x95d   :  { %v2738_v19 = vadd.f32 %v2737_v58, %v2736_v9 }
 0x95f   :  { %2783 = vst.msk [vmem:[%s8033_s4 + $0x7] ss:$8 sm:$0x3] %vm3516_vm0, %v2738_v19  ;;  %2742 = vst.msk [vmem:[#allocation2] sm:$0x3] %vm3516_vm0, %v2738_v19 }

</bundles_post_ra>
